<compile_context>
chip_gen: v7x
topology: tpu7x:2x2x1
jax: 0.10.0
libtpu: 0.0.40
codegen_flags: <defaults>
</compile_context>

<pallas_src>
import math
import jax
import jax.numpy as jnp
from jax.experimental import pallas as pl
from jax.experimental.pallas import tpu as pltpu

# ---- model hyper-parameters (small, consistent with the module) -------------
B, S, H = 2, 8, 32          # batch, seq len, hidden_size
NH = 4                      # attention heads (DiffuRec default)
DK = H // NH                # head dim
FF = 4 * H                  # feed-forward / time-embed inner dim
L = 4                       # num transformer blocks (num_blocks=4)
BS = B * S                  # folded batch*seq rows
LN_EPS = 1e-12              # DiffuRec LayerNorm epsilon
LAMBDA_UNCERTAINTY = 0.001  # args.lambda_uncertainty

NVEC_PER_LAYER = 9          # [ln1g, ln1b, bq, bk, bv, bo, ln2g, ln2b, fb2]
NVEC = L * NVEC_PER_LAYER + 2   # + final LayerNorm gamma/beta


def _tensorcores_per_chip():
    try:
        kind = jax.devices()[0].device_kind.lower()
    except Exception:
        return 1
    return 2 if "v7" in kind else 1


# Row block per grid step: whole (B*S) slab on single-TC chips (v5e/v6e), one
# batch element per grid step (=> per TensorCore) on 2-TC chips (v7x).
R = S if (_tensorcores_per_chip() >= 2 and B > 1) else BS
GRID = BS // R
NHR = NH * R                # packed-head lane width of the attention matrices


# ---- in-kernel helpers -------------------------------------------------------
def _layernorm(x, g, b):
    mu = jnp.mean(x, axis=-1, keepdims=True)
    var = jnp.mean(jnp.square(x - mu), axis=-1, keepdims=True)
    return g * ((x - mu) * jax.lax.rsqrt(var + LN_EPS)) + b


def _gelu(x):  # tanh-approx GELU used by DiffuRec's PositionwiseFeedForward
    return 0.5 * x * (1.0 + jnp.tanh(math.sqrt(2.0 / math.pi) * (x + 0.044715 * x ** 3)))


# ---- the Pallas kernel -------------------------------------------------------
def diffu_xstart_kernel(act_ref, amask_ref, hk_ref, hv_ref,
                        wqkv_ref, wo_ref, fw1_ref, fw2_ref, fb1_ref, vec_ref,
                        out_ref):
    # activation slab planes: 0 = rep_item, 1 = lambda noise,
    #                         2 = broadcast of (x_t[:, -1] + time_emb)
    rep = act_ref[0]                            # (R, H)
    noise = act_ref[1]
    addv = act_ref[2]
    x = rep + noise * addv                      # rep_diffu, (R, H)

    amask = amask_ref[...]                      # (R, NHR) additive mask (0 / -1e9)
    hk = hk_ref[...]                            # (H, NHR) block-diag K head mask (0/1)
    hv = hv_ref[...]                            # (NHR, H) block-diag V head mask (0/1)
    hv_bf = hv.astype(jnp.bfloat16)             # reused as MXU RHS for softmax denom
    vecs = vec_ref[...]                         # (NVEC, H) all LN params / small biases
    fb1_all = fb1_ref[...]                      # (L, FF)  FFN first-layer biases (f32)

    for i in range(L):                          # statically unrolled (LLO visibility)
        base = i * NVEC_PER_LAYER
        g1 = vecs[base + 0:base + 1, :]
        b1 = vecs[base + 1:base + 2, :]
        bq = vecs[base + 2:base + 3, :]         # pre-scaled by 1/sqrt(DK) at pack time
        bk = vecs[base + 3:base + 4, :]
        bv = vecs[base + 4:base + 5, :]
        bo = vecs[base + 5:base + 6, :]
        g2 = vecs[base + 6:base + 7, :]
        b2 = vecs[base + 7:base + 8, :]
        fb2 = vecs[base + 8:base + 9, :]

        # ---- multi-head self-attention sublayer (norm_first) ----
        xn = _layernorm(x, g1, b1).astype(jnp.bfloat16)
        # fused QKV projection: one MXU op, Wq columns pre-scaled by 1/sqrt(DK)
        qkv = jnp.dot(xn, wqkv_ref[i], preferred_element_type=jnp.float32)   # (R, 3H)
        q = qkv[:, 0:H] + bq
        k = qkv[:, H:2 * H] + bk
        v = qkv[:, 2 * H:3 * H] + bv

        # block-diagonal K: head h's K^T in rows [h*DK,(h+1)*DK), cols [h*R,(h+1)*R)
        kbd = (jnp.concatenate([k.T] * NH, axis=1) * hk).astype(jnp.bfloat16)  # (H, NHR)
        s = jnp.dot(q.astype(jnp.bfloat16), kbd,
                    preferred_element_type=jnp.float32) + amask
        # NOTE: row-wide max across all packed heads (algebraically valid; per-head
        # max would be more robust for extreme logit spreads, irrelevant at this scale).
        s = s - jnp.max(s, axis=-1, keepdims=True)
        p = jnp.exp(s).astype(jnp.bfloat16)                                   # (R, NHR)

        # block-diagonal V: head h's V in rows [h*R,(h+1)*R), cols [h*DK,(h+1)*DK)
        vbd = (jnp.concatenate([v] * NH, axis=0) * hv).astype(jnp.bfloat16)   # (NHR, H)
        ctx = jnp.dot(p, vbd, preferred_element_type=jnp.float32)             # unnormalized
        denom = jnp.dot(p, hv_bf, preferred_element_type=jnp.float32)         # per-head sums
        ctx = ctx * pl.reciprocal(denom, approx=True)                         # softmax norm (EUP)

        attn = jnp.dot(ctx.astype(jnp.bfloat16), wo_ref[i],
                       preferred_element_type=jnp.float32) + bo
        x = x + attn                            # dropout == identity (eval)

        # ---- position-wise feed-forward sublayer (norm_first) ----
        xn2 = _layernorm(x, g2, b2).astype(jnp.bfloat16)
        h1 = jnp.dot(xn2, fw1_ref[i], preferred_element_type=jnp.float32) + fb1_all[i:i + 1, :]
        h1 = _gelu(h1)
        ff = jnp.dot(h1.astype(jnp.bfloat16), fw2_ref[i],
                     preferred_element_type=jnp.float32) + fb2
        x = x + ff                              # dropout == identity (eval)

    # final: dropout (identity in eval) then norm_diffu_rep LayerNorm
    gf = vecs[L * NVEC_PER_LAYER + 0:L * NVEC_PER_LAYER + 1, :]
    bf = vecs[L * NVEC_PER_LAYER + 1:L * NVEC_PER_LAYER + 2, :]
    out_ref[...] = _layernorm(x, gf, bf).astype(out_ref.dtype)


# ---- one-time parameter packing (hoisted out of the per-call path) -----------
def pack_params(params):
    inv = 1.0 / math.sqrt(DK)
    # scale only the Wq / bq third of the fused QKV projection
    scale = jnp.concatenate([jnp.full((H,), inv, jnp.float32),
                             jnp.ones((2 * H,), jnp.float32)])

    wqkv = (params["wqkv"] * scale[None, None, :]).astype(jnp.bfloat16)    # (L, H, 3H)
    bqkv = params["bqkv"].reshape(L, 3 * H) * scale[None, :]               # f32

    row = lambda a: a.reshape(L, H)
    per_layer = jnp.stack(
        [row(params["ln1g"]), row(params["ln1b"]),
         bqkv[:, :H], bqkv[:, H:2 * H], bqkv[:, 2 * H:],
         row(params["bo"]), row(params["ln2g"]), row(params["ln2b"]),
         row(params["fb2"])], axis=1)                                      # (L, 9, H)
    vecs = jnp.concatenate([per_layer.reshape(L * NVEC_PER_LAYER, H),
                            params["lnfg"].reshape(1, H),
                            params["lnfb"].reshape(1, H)], axis=0)         # (NVEC, H) f32

    # constant block-diagonal head-packing masks (heads packed along lanes)
    hmask_k = (jnp.arange(H)[:, None] // DK ==
               jnp.arange(NHR)[None, :] // R).astype(jnp.float32)          # (H, NHR)
    hmask_v = hmask_k.T                                                    # (NHR, H)

    return {
        "wqkv": wqkv,                                   # bf16
        "wo": params["wo"].astype(jnp.bfloat16),        # (L, H, H)
        "fw1": params["fw1"].astype(jnp.bfloat16),      # (L, H, FF)
        "fw2": params["fw2"].astype(jnp.bfloat16),      # (L, FF, H)
        "fb1": params["fb1"].reshape(L, FF),            # f32
        "vecs": vecs,                                   # f32
        "hmask_k": hmask_k, "hmask_v": hmask_v,         # f32 constants
        "tw1": params["tw1"], "tb1": params["tb1"],     # time_embed MLP (stays in XLA)
        "tw2": params["tw2"], "tb2": params["tb2"],
    }


# ---- wrapper -----------------------------------------------------------------
@jax.jit
def diffu_xstart_forward(rep_item, x_t, t, mask_seq, lambda_noise, packed):
    # timestep_embedding + time_embed MLP: tiny (B,H)-row math, left to XLA
    half = H // 2
    freqs = jnp.exp(-math.log(10000.0) * jnp.arange(half, dtype=jnp.float32) / half)
    targs = t.reshape(B, 1).astype(jnp.float32) * freqs[None, :]           # (B, half)
    tse = jnp.concatenate([jnp.cos(targs), jnp.sin(targs)], axis=-1)       # (B, H)
    hmlp = tse @ packed["tw1"] + packed["tb1"]
    hmlp = hmlp * jax.nn.sigmoid(hmlp)                                     # SiLU
    temb = hmlp @ packed["tw2"] + packed["tb2"]                            # (B, H)

    # activation slab: plane0 rep_item, plane1 lambda noise, plane2 (x_t[:,-1]+temb)
    addv = jnp.broadcast_to((x_t[:, -1, :] + temb)[:, None, :], (B, S, H))
    act = jnp.stack([rep_item.reshape(BS, H),
                     lambda_noise.reshape(BS, H),
                     addv.reshape(BS, H)], axis=0)                         # (3, BS, H)

    # additive attention mask (0 keep / -1e9 drop), heads tiled along lanes
    keep = mask_seq.reshape(B, S) > 0
    if GRID == 1:   # whole batch folded into one block: need same-batch AND key-pad
        qb = jnp.arange(BS, dtype=jnp.int32) // S
        same = qb[:, None] == qb[None, :]
        am = jnp.where(same & keep.reshape(1, BS), 0.0, -1e9)
        amask = jnp.tile(am, (1, NH)).astype(jnp.float32)                  # (BS, NH*BS)
    else:           # one batch element per grid step: key-padding only
        am = jnp.broadcast_to(jnp.where(keep[:, None, :], 0.0, -1e9), (B, S, S))
        amask = jnp.tile(am, (1, 1, NH)).reshape(BS, NHR).astype(jnp.float32)

    full2 = lambda shp: pl.BlockSpec(shp, lambda b: (0, 0))
    full3 = lambda shp: pl.BlockSpec(shp, lambda b: (0, 0, 0))
    out = pl.pallas_call(
        diffu_xstart_kernel,
        out_shape=jax.ShapeDtypeStruct((BS, H), jnp.float32),
        grid=(GRID,),
        in_specs=[pl.BlockSpec((3, R, H), lambda b: (0, b, 0)),   # activation slab
                  pl.BlockSpec((R, NHR), lambda b: (b, 0)),       # additive attn mask
                  full2((H, NHR)),                                # block-diag K head mask
                  full2((NHR, H)),                                # block-diag V head mask
                  full3((L, H, 3 * H)),                           # fused Wqkv (bf16, pre-scaled)
                  full3((L, H, H)),                               # Wo (bf16)
                  full3((L, H, FF)),                              # FFN W1 (bf16)
                  full3((L, FF, H)),                              # FFN W2 (bf16)
                  full2((L, FF)),                                 # FFN b1 (f32)
                  full2((NVEC, H))],                              # LN params + small biases
        out_specs=pl.BlockSpec((R, H), lambda b: (b, 0)),
        compiler_params=pltpu.CompilerParams(
            dimension_semantics=("parallel",) if GRID > 1 else ("arbitrary",)),
    )(act, amask, packed["hmask_k"], packed["hmask_v"], packed["wqkv"],
      packed["wo"], packed["fw1"], packed["fw2"], packed["fb1"], packed["vecs"])
    return out.reshape(B, S, H)


# ---- deterministic parameter init (synthetic; not a checkpoint load) ---------
def init_params(key):
    ks = jax.random.split(key, 8)
    dense = lambda k, shp: (0.02 * jax.random.normal(k, shp, jnp.float32))
    return {
        "tw1": dense(ks[0], (H, FF)), "tb1": jnp.zeros((1, FF), jnp.float32),
        "tw2": dense(ks[1], (FF, H)), "tb2": jnp.zeros((1, H), jnp.float32),
        "ln1g": jnp.ones((L, 1, H), jnp.float32), "ln1b": jnp.zeros((L, 1, H), jnp.float32),
        "wqkv": dense(ks[2], (L, H, 3 * H)), "bqkv": jnp.zeros((L, 1, 3 * H), jnp.float32),
        "wo": dense(ks[3], (L, H, H)), "bo": jnp.zeros((L, 1, H), jnp.float32),
        "ln2g": jnp.ones((L, 1, H), jnp.float32), "ln2b": jnp.zeros((L, 1, H), jnp.float32),
        "fw1": dense(ks[4], (L, H, FF)), "fb1": jnp.zeros((L, 1, FF), jnp.float32),
        "fw2": dense(ks[5], (L, FF, H)), "fb2": jnp.zeros((L, 1, H), jnp.float32),
        "lnfg": jnp.ones((1, H), jnp.float32), "lnfb": jnp.zeros((1, H), jnp.float32),
    }


if __name__ == "__main__":
    root = jax.random.PRNGKey(0)
    k_par, k_rep, k_xt, k_noise = jax.random.split(root, 4)

    params = init_params(k_par)
    packed = pack_params(params)     # one-time packing, outside the per-call path

    rep_item = jax.random.normal(k_rep, (B, S, H), jnp.float32)
    x_t = jax.random.normal(k_xt, (B, S, H), jnp.float32)
    t = jnp.array([10.0, 500.0], jnp.float32)                      # one timestep per batch elem
    mask_seq = jnp.array([[1, 1, 1, 1, 1, 1, 0, 0],
                          [1, 1, 1, 1, 1, 1, 1, 1]], jnp.float32)  # (B, S)
    # th.normal(mean=lam, std=lam) of rep_item's shape, sampled deterministically here
    lambda_noise = (LAMBDA_UNCERTAINTY
                    + LAMBDA_UNCERTAINTY * jax.random.normal(k_noise, (B, S, H), jnp.float32))
    # TODO(synk): nn.Dropout layers are treated as identity (eval mode); training-mode
    # dropout masks have no deterministic Pallas equivalent here.

    out = diffu_xstart_forward(rep_item, x_t, t, mask_seq, lambda_noise, packed)
    out = jax.block_until_ready(out)
    assert out.shape == (B, S, H) and bool(jnp.all(jnp.isfinite(out)))
    print("KERNEL_OK")
</pallas_src>

<mosaic_0001>
module attributes {stable_mosaic.version = 11 : i64} {
  func.func @diffu_xstart_kernel(%arg0: i32, %arg1: memref<3x16x32xf32, #tpu.memory_space<vmem>>, %arg2: memref<16x64xf32, #tpu.memory_space<vmem>>, %arg3: memref<32x64xf32, #tpu.memory_space<vmem>>, %arg4: memref<64x32xf32, #tpu.memory_space<vmem>>, %arg5: memref<4x32x96xbf16, #tpu.memory_space<vmem>>, %arg6: memref<4x32x32xbf16, #tpu.memory_space<vmem>>, %arg7: memref<4x32x128xbf16, #tpu.memory_space<vmem>>, %arg8: memref<4x128x32xbf16, #tpu.memory_space<vmem>>, %arg9: memref<4x128xf32, #tpu.memory_space<vmem>>, %arg10: memref<38x32xf32, #tpu.memory_space<vmem>>, %arg11: memref<16x32xf32, #tpu.memory_space<vmem>>) attributes {dimension_semantics = [#tpu.dimension_semantics<arbitrary>], iteration_bounds = array<i64: 1>, scalar_prefetch = 0 : i64, scratch_operands = 0 : i64, tpu.core_type = #tpu.core_type<tc>, window_params = [{transform_indices = @transform_0, window_bounds = array<i64: 3, 16, 32>}, {transform_indices = @transform_1, window_bounds = array<i64: 16, 64>}, {pipeline_mode = #tpu.pipeline_mode<synchronous>, transform_indices = @transform_2, window_bounds = array<i64: 32, 64>}, {pipeline_mode = #tpu.pipeline_mode<synchronous>, transform_indices = @transform_3, window_bounds = array<i64: 64, 32>}, {pipeline_mode = #tpu.pipeline_mode<synchronous>, transform_indices = @transform_4, window_bounds = array<i64: 4, 32, 96>}, {pipeline_mode = #tpu.pipeline_mode<synchronous>, transform_indices = @transform_5, window_bounds = array<i64: 4, 32, 32>}, {pipeline_mode = #tpu.pipeline_mode<synchronous>, transform_indices = @transform_6, window_bounds = array<i64: 4, 32, 128>}, {pipeline_mode = #tpu.pipeline_mode<synchronous>, transform_indices = @transform_7, window_bounds = array<i64: 4, 128, 32>}, {pipeline_mode = #tpu.pipeline_mode<synchronous>, transform_indices = @transform_8, window_bounds = array<i64: 4, 128>}, {pipeline_mode = #tpu.pipeline_mode<synchronous>, transform_indices = @transform_9, window_bounds = array<i64: 38, 32>}, {transform_indices = @transform_10, window_bounds = array<i64: 16, 32>}]} {
    %c0 = arith.constant 0 : index
    %c0_0 = arith.constant 0 : index
    %c0_1 = arith.constant 0 : index
    %0 = vector.load %arg1[%c0, %c0_0, %c0_1] : memref<3x16x32xf32, #tpu.memory_space<vmem>>, vector<1x16x32xf32>
    %1 = vector.shape_cast %0 : vector<1x16x32xf32> to vector<16x32xf32>
    %c1 = arith.constant 1 : index
    %c0_2 = arith.constant 0 : index
    %c0_3 = arith.constant 0 : index
    %2 = vector.load %arg1[%c1, %c0_2, %c0_3] : memref<3x16x32xf32, #tpu.memory_space<vmem>>, vector<1x16x32xf32>
    %3 = vector.shape_cast %2 : vector<1x16x32xf32> to vector<16x32xf32>
    %c2 = arith.constant 2 : index
    %c0_4 = arith.constant 0 : index
    %c0_5 = arith.constant 0 : index
    %4 = vector.load %arg1[%c2, %c0_4, %c0_5] : memref<3x16x32xf32, #tpu.memory_space<vmem>>, vector<1x16x32xf32>
    %5 = vector.shape_cast %4 : vector<1x16x32xf32> to vector<16x32xf32>
    %6 = arith.mulf %3, %5 : vector<16x32xf32>
    %7 = arith.addf %1, %6 : vector<16x32xf32>
    %c0_6 = arith.constant 0 : index
    %c0_7 = arith.constant 0 : index
    %8 = vector.load %arg2[%c0_6, %c0_7] : memref<16x64xf32, #tpu.memory_space<vmem>>, vector<16x64xf32>
    %c0_8 = arith.constant 0 : index
    %c0_9 = arith.constant 0 : index
    %9 = vector.load %arg3[%c0_8, %c0_9] : memref<32x64xf32, #tpu.memory_space<vmem>>, vector<32x64xf32>
    %c0_10 = arith.constant 0 : index
    %c0_11 = arith.constant 0 : index
    %10 = vector.load %arg4[%c0_10, %c0_11] : memref<64x32xf32, #tpu.memory_space<vmem>>, vector<64x32xf32>
    %11 = arith.truncf %10 : vector<64x32xf32> to vector<64x32xbf16>
    %c0_12 = arith.constant 0 : index
    %c0_13 = arith.constant 0 : index
    %12 = vector.load %arg10[%c0_12, %c0_13] : memref<38x32xf32, #tpu.memory_space<vmem>>, vector<38x32xf32>
    %c0_14 = arith.constant 0 : index
    %c0_15 = arith.constant 0 : index
    %13 = vector.load %arg9[%c0_14, %c0_15] : memref<4x128xf32, #tpu.memory_space<vmem>>, vector<4x128xf32>
    %14 = vector.extract_strided_slice %12 {offsets = [0, 0], sizes = [1, 32], strides = [1, 1]} : vector<38x32xf32> to vector<1x32xf32>
    %15 = vector.extract_strided_slice %12 {offsets = [1, 0], sizes = [1, 32], strides = [1, 1]} : vector<38x32xf32> to vector<1x32xf32>
    %16 = vector.extract_strided_slice %12 {offsets = [2, 0], sizes = [1, 32], strides = [1, 1]} : vector<38x32xf32> to vector<1x32xf32>
    %17 = vector.extract_strided_slice %12 {offsets = [3, 0], sizes = [1, 32], strides = [1, 1]} : vector<38x32xf32> to vector<1x32xf32>
    %18 = vector.extract_strided_slice %12 {offsets = [4, 0], sizes = [1, 32], strides = [1, 1]} : vector<38x32xf32> to vector<1x32xf32>
    %19 = vector.extract_strided_slice %12 {offsets = [5, 0], sizes = [1, 32], strides = [1, 1]} : vector<38x32xf32> to vector<1x32xf32>
    %20 = vector.extract_strided_slice %12 {offsets = [6, 0], sizes = [1, 32], strides = [1, 1]} : vector<38x32xf32> to vector<1x32xf32>
    %21 = vector.extract_strided_slice %12 {offsets = [7, 0], sizes = [1, 32], strides = [1, 1]} : vector<38x32xf32> to vector<1x32xf32>
    %22 = vector.extract_strided_slice %12 {offsets = [8, 0], sizes = [1, 32], strides = [1, 1]} : vector<38x32xf32> to vector<1x32xf32>
    %cst = arith.constant dense<0.000000e+00> : vector<16xf32>
    %23 = vector.multi_reduction <add>, %7, %cst [1] : vector<16x32xf32> to vector<16xf32>
    %24 = vector.shape_cast %23 : vector<16xf32> to vector<16x1xf32>
    %cst_16 = arith.constant 3.200000e+01 : f32
    %25 = vector.broadcast %cst_16 : f32 to vector<16x1xf32>
    %26 = arith.divf %24, %25 : vector<16x1xf32>
    %27 = vector.broadcast %26 : vector<16x1xf32> to vector<16x32xf32>
    %28 = arith.subf %7, %27 : vector<16x32xf32>
    %29 = arith.mulf %28, %28 : vector<16x32xf32>
    %cst_17 = arith.constant dense<0.000000e+00> : vector<16xf32>
    %30 = vector.multi_reduction <add>, %29, %cst_17 [1] : vector<16x32xf32> to vector<16xf32>
    %31 = vector.shape_cast %30 : vector<16xf32> to vector<16x1xf32>
    %cst_18 = arith.constant 3.200000e+01 : f32
    %32 = vector.broadcast %cst_18 : f32 to vector<16x1xf32>
    %33 = arith.divf %31, %32 : vector<16x1xf32>
    %34 = vector.broadcast %26 : vector<16x1xf32> to vector<16x32xf32>
    %35 = arith.subf %7, %34 : vector<16x32xf32>
    %cst_19 = arith.constant 9.99999996E-13 : f32
    %36 = vector.broadcast %cst_19 : f32 to vector<16x1xf32>
    %37 = arith.addf %33, %36 : vector<16x1xf32>
    %38 = math.rsqrt %37 : vector<16x1xf32>
    %39 = vector.broadcast %38 : vector<16x1xf32> to vector<16x32xf32>
    %40 = arith.mulf %35, %39 : vector<16x32xf32>
    %41 = vector.broadcast %14 : vector<1x32xf32> to vector<16x32xf32>
    %42 = arith.mulf %41, %40 : vector<16x32xf32>
    %43 = vector.broadcast %15 : vector<1x32xf32> to vector<16x32xf32>
    %44 = arith.addf %42, %43 : vector<16x32xf32>
    %45 = arith.truncf %44 : vector<16x32xf32> to vector<16x32xbf16>
    %c0_20 = arith.constant 0 : index
    %c0_21 = arith.constant 0 : index
    %c0_22 = arith.constant 0 : index
    %46 = vector.load %arg5[%c0_20, %c0_21, %c0_22] : memref<4x32x96xbf16, #tpu.memory_space<vmem>>, vector<1x32x96xbf16>
    %47 = vector.shape_cast %46 : vector<1x32x96xbf16> to vector<32x96xbf16>
    %cst_23 = arith.constant dense<0.000000e+00> : vector<16x96xf32>
    %48 = tpu.matmul %45, %47, %cst_23 {dimension_numbers = #tpu.dot_dimension_numbers<[1], [0], [0], [1], [0, 0, 1, 1], [], []>} : vector<16x32xbf16>, vector<32x96xbf16>, vector<16x96xf32> -> vector<16x96xf32>
    %49 = vector.extract_strided_slice %48 {offsets = [0, 0], sizes = [16, 32], strides = [1, 1]} : vector<16x96xf32> to vector<16x32xf32>
    %50 = vector.broadcast %16 : vector<1x32xf32> to vector<16x32xf32>
    %51 = arith.addf %49, %50 : vector<16x32xf32>
    %52 = vector.extract_strided_slice %48 {offsets = [0, 32], sizes = [16, 32], strides = [1, 1]} : vector<16x96xf32> to vector<16x32xf32>
    %53 = vector.broadcast %17 : vector<1x32xf32> to vector<16x32xf32>
    %54 = arith.addf %52, %53 : vector<16x32xf32>
    %55 = vector.extract_strided_slice %48 {offsets = [0, 64], sizes = [16, 32], strides = [1, 1]} : vector<16x96xf32> to vector<16x32xf32>
    %56 = vector.broadcast %18 : vector<1x32xf32> to vector<16x32xf32>
    %57 = arith.addf %55, %56 : vector<16x32xf32>
    %58 = tpu.transpose %54, [1, 0] : vector<16x32xf32> -> vector<32x16xf32>
    %59 = tpu.concatenate %58, %58, %58, %58 in 1 : vector<32x16xf32>, vector<32x16xf32>, vector<32x16xf32>, vector<32x16xf32> -> vector<32x64xf32>
    %60 = arith.mulf %59, %9 : vector<32x64xf32>
    %61 = arith.truncf %60 : vector<32x64xf32> to vector<32x64xbf16>
    %62 = arith.truncf %51 : vector<16x32xf32> to vector<16x32xbf16>
    %cst_24 = arith.constant dense<0.000000e+00> : vector<16x64xf32>
    %63 = tpu.matmul %62, %61, %cst_24 {dimension_numbers = #tpu.dot_dimension_numbers<[1], [0], [0], [1], [0, 0, 1, 1], [], []>} : vector<16x32xbf16>, vector<32x64xbf16>, vector<16x64xf32> -> vector<16x64xf32>
    %64 = arith.addf %63, %8 : vector<16x64xf32>
    %cst_25 = arith.constant dense<0xFF800000> : vector<16xf32>
    %65 = vector.multi_reduction <maximumf>, %64, %cst_25 [1] : vector<16x64xf32> to vector<16xf32>
    %66 = vector.shape_cast %65 : vector<16xf32> to vector<16x1xf32>
    %67 = vector.broadcast %66 : vector<16x1xf32> to vector<16x64xf32>
    %68 = arith.subf %64, %67 : vector<16x64xf32>
    %69 = math.exp %68 : vector<16x64xf32>
    %70 = arith.truncf %69 : vector<16x64xf32> to vector<16x64xbf16>
    %71 = tpu.concatenate %57, %57, %57, %57 in 0 : vector<16x32xf32>, vector<16x32xf32>, vector<16x32xf32>, vector<16x32xf32> -> vector<64x32xf32>
    %72 = arith.mulf %71, %10 : vector<64x32xf32>
    %73 = arith.truncf %72 : vector<64x32xf32> to vector<64x32xbf16>
    %cst_26 = arith.constant dense<0.000000e+00> : vector<16x32xf32>
    %74 = tpu.matmul %70, %73, %cst_26 {dimension_numbers = #tpu.dot_dimension_numbers<[1], [0], [0], [1], [0, 0, 1, 1], [], []>} : vector<16x64xbf16>, vector<64x32xbf16>, vector<16x32xf32> -> vector<16x32xf32>
    %cst_27 = arith.constant dense<0.000000e+00> : vector<16x32xf32>
    %75 = tpu.matmul %70, %11, %cst_27 {dimension_numbers = #tpu.dot_dimension_numbers<[1], [0], [0], [1], [0, 0, 1, 1], [], []>} : vector<16x64xbf16>, vector<64x32xbf16>, vector<16x32xf32> -> vector<16x32xf32>
    %76 = tpu.reciprocal %75 {approx = true} : vector<16x32xf32> -> vector<16x32xf32>
    %77 = arith.mulf %74, %76 : vector<16x32xf32>
    %78 = arith.truncf %77 : vector<16x32xf32> to vector<16x32xbf16>
    %c0_28 = arith.constant 0 : index
    %c0_29 = arith.constant 0 : index
    %c0_30 = arith.constant 0 : index
    %79 = vector.load %arg6[%c0_28, %c0_29, %c0_30] : memref<4x32x32xbf16, #tpu.memory_space<vmem>>, vector<1x32x32xbf16>
    %80 = vector.shape_cast %79 : vector<1x32x32xbf16> to vector<32x32xbf16>
    %cst_31 = arith.constant dense<0.000000e+00> : vector<16x32xf32>
    %81 = tpu.matmul %78, %80, %cst_31 {dimension_numbers = #tpu.dot_dimension_numbers<[1], [0], [0], [1], [0, 0, 1, 1], [], []>} : vector<16x32xbf16>, vector<32x32xbf16>, vector<16x32xf32> -> vector<16x32xf32>
    %82 = vector.broadcast %19 : vector<1x32xf32> to vector<16x32xf32>
    %83 = arith.addf %81, %82 : vector<16x32xf32>
    %84 = arith.addf %7, %83 : vector<16x32xf32>
    %cst_32 = arith.constant dense<0.000000e+00> : vector<16xf32>
    %85 = vector.multi_reduction <add>, %84, %cst_32 [1] : vector<16x32xf32> to vector<16xf32>
    %86 = vector.shape_cast %85 : vector<16xf32> to vector<16x1xf32>
    %cst_33 = arith.constant 3.200000e+01 : f32
    %87 = vector.broadcast %cst_33 : f32 to vector<16x1xf32>
    %88 = arith.divf %86, %87 : vector<16x1xf32>
    %89 = vector.broadcast %88 : vector<16x1xf32> to vector<16x32xf32>
    %90 = arith.subf %84, %89 : vector<16x32xf32>
    %91 = arith.mulf %90, %90 : vector<16x32xf32>
    %cst_34 = arith.constant dense<0.000000e+00> : vector<16xf32>
    %92 = vector.multi_reduction <add>, %91, %cst_34 [1] : vector<16x32xf32> to vector<16xf32>
    %93 = vector.shape_cast %92 : vector<16xf32> to vector<16x1xf32>
    %cst_35 = arith.constant 3.200000e+01 : f32
    %94 = vector.broadcast %cst_35 : f32 to vector<16x1xf32>
    %95 = arith.divf %93, %94 : vector<16x1xf32>
    %96 = vector.broadcast %88 : vector<16x1xf32> to vector<16x32xf32>
    %97 = arith.subf %84, %96 : vector<16x32xf32>
    %cst_36 = arith.constant 9.99999996E-13 : f32
    %98 = vector.broadcast %cst_36 : f32 to vector<16x1xf32>
    %99 = arith.addf %95, %98 : vector<16x1xf32>
    %100 = math.rsqrt %99 : vector<16x1xf32>
    %101 = vector.broadcast %100 : vector<16x1xf32> to vector<16x32xf32>
    %102 = arith.mulf %97, %101 : vector<16x32xf32>
    %103 = vector.broadcast %20 : vector<1x32xf32> to vector<16x32xf32>
    %104 = arith.mulf %103, %102 : vector<16x32xf32>
    %105 = vector.broadcast %21 : vector<1x32xf32> to vector<16x32xf32>
    %106 = arith.addf %104, %105 : vector<16x32xf32>
    %107 = arith.truncf %106 : vector<16x32xf32> to vector<16x32xbf16>
    %c0_37 = arith.constant 0 : index
    %c0_38 = arith.constant 0 : index
    %c0_39 = arith.constant 0 : index
    %108 = vector.load %arg7[%c0_37, %c0_38, %c0_39] : memref<4x32x128xbf16, #tpu.memory_space<vmem>>, vector<1x32x128xbf16>
    %109 = vector.shape_cast %108 : vector<1x32x128xbf16> to vector<32x128xbf16>
    %cst_40 = arith.constant dense<0.000000e+00> : vector<16x128xf32>
    %110 = tpu.matmul %107, %109, %cst_40 {dimension_numbers = #tpu.dot_dimension_numbers<[1], [0], [0], [1], [0, 0, 1, 1], [], []>} : vector<16x32xbf16>, vector<32x128xbf16>, vector<16x128xf32> -> vector<16x128xf32>
    %111 = vector.extract_strided_slice %13 {offsets = [0, 0], sizes = [1, 128], strides = [1, 1]} : vector<4x128xf32> to vector<1x128xf32>
    %112 = vector.broadcast %111 : vector<1x128xf32> to vector<16x128xf32>
    %113 = arith.addf %110, %112 : vector<16x128xf32>
    %cst_41 = arith.constant 5.000000e-01 : f32
    %114 = vector.broadcast %cst_41 : f32 to vector<16x128xf32>
    %115 = arith.mulf %114, %113 : vector<16x128xf32>
    %116 = arith.mulf %113, %113 : vector<16x128xf32>
    %117 = arith.mulf %113, %116 : vector<16x128xf32>
    %cst_42 = arith.constant 4.471500e-02 : f32
    %118 = vector.broadcast %cst_42 : f32 to vector<16x128xf32>
    %119 = arith.mulf %118, %117 : vector<16x128xf32>
    %120 = arith.addf %113, %119 : vector<16x128xf32>
    %cst_43 = arith.constant 0.797884583 : f32
    %121 = vector.broadcast %cst_43 : f32 to vector<16x128xf32>
    %122 = arith.mulf %121, %120 : vector<16x128xf32>
    %123 = math.tanh %122 : vector<16x128xf32>
    %cst_44 = arith.constant 1.000000e+00 : f32
    %124 = vector.broadcast %cst_44 : f32 to vector<16x128xf32>
    %125 = arith.addf %124, %123 : vector<16x128xf32>
    %126 = arith.mulf %115, %125 : vector<16x128xf32>
    %127 = arith.truncf %126 : vector<16x128xf32> to vector<16x128xbf16>
    %c0_45 = arith.constant 0 : index
    %c0_46 = arith.constant 0 : index
    %c0_47 = arith.constant 0 : index
    %128 = vector.load %arg8[%c0_45, %c0_46, %c0_47] : memref<4x128x32xbf16, #tpu.memory_space<vmem>>, vector<1x128x32xbf16>
    %129 = vector.shape_cast %128 : vector<1x128x32xbf16> to vector<128x32xbf16>
    %cst_48 = arith.constant dense<0.000000e+00> : vector<16x32xf32>
    %130 = tpu.matmul %127, %129, %cst_48 {dimension_numbers = #tpu.dot_dimension_numbers<[1], [0], [0], [1], [0, 0, 1, 1], [], []>} : vector<16x128xbf16>, vector<128x32xbf16>, vector<16x32xf32> -> vector<16x32xf32>
    %131 = vector.broadcast %22 : vector<1x32xf32> to vector<16x32xf32>
    %132 = arith.addf %130, %131 : vector<16x32xf32>
    %133 = arith.addf %84, %132 : vector<16x32xf32>
    %134 = vector.extract_strided_slice %12 {offsets = [9, 0], sizes = [1, 32], strides = [1, 1]} : vector<38x32xf32> to vector<1x32xf32>
    %135 = vector.extract_strided_slice %12 {offsets = [10, 0], sizes = [1, 32], strides = [1, 1]} : vector<38x32xf32> to vector<1x32xf32>
    %136 = vector.extract_strided_slice %12 {offsets = [11, 0], sizes = [1, 32], strides = [1, 1]} : vector<38x32xf32> to vector<1x32xf32>
    %137 = vector.extract_strided_slice %12 {offsets = [12, 0], sizes = [1, 32], strides = [1, 1]} : vector<38x32xf32> to vector<1x32xf32>
    %138 = vector.extract_strided_slice %12 {offsets = [13, 0], sizes = [1, 32], strides = [1, 1]} : vector<38x32xf32> to vector<1x32xf32>
    %139 = vector.extract_strided_slice %12 {offsets = [14, 0], sizes = [1, 32], strides = [1, 1]} : vector<38x32xf32> to vector<1x32xf32>
    %140 = vector.extract_strided_slice %12 {offsets = [15, 0], sizes = [1, 32], strides = [1, 1]} : vector<38x32xf32> to vector<1x32xf32>
    %141 = vector.extract_strided_slice %12 {offsets = [16, 0], sizes = [1, 32], strides = [1, 1]} : vector<38x32xf32> to vector<1x32xf32>
    %142 = vector.extract_strided_slice %12 {offsets = [17, 0], sizes = [1, 32], strides = [1, 1]} : vector<38x32xf32> to vector<1x32xf32>
    %cst_49 = arith.constant dense<0.000000e+00> : vector<16xf32>
    %143 = vector.multi_reduction <add>, %133, %cst_49 [1] : vector<16x32xf32> to vector<16xf32>
    %144 = vector.shape_cast %143 : vector<16xf32> to vector<16x1xf32>
    %cst_50 = arith.constant 3.200000e+01 : f32
    %145 = vector.broadcast %cst_50 : f32 to vector<16x1xf32>
    %146 = arith.divf %144, %145 : vector<16x1xf32>
    %147 = vector.broadcast %146 : vector<16x1xf32> to vector<16x32xf32>
    %148 = arith.subf %133, %147 : vector<16x32xf32>
    %149 = arith.mulf %148, %148 : vector<16x32xf32>
    %cst_51 = arith.constant dense<0.000000e+00> : vector<16xf32>
    %150 = vector.multi_reduction <add>, %149, %cst_51 [1] : vector<16x32xf32> to vector<16xf32>
    %151 = vector.shape_cast %150 : vector<16xf32> to vector<16x1xf32>
    %cst_52 = arith.constant 3.200000e+01 : f32
    %152 = vector.broadcast %cst_52 : f32 to vector<16x1xf32>
    %153 = arith.divf %151, %152 : vector<16x1xf32>
    %154 = vector.broadcast %146 : vector<16x1xf32> to vector<16x32xf32>
    %155 = arith.subf %133, %154 : vector<16x32xf32>
    %cst_53 = arith.constant 9.99999996E-13 : f32
    %156 = vector.broadcast %cst_53 : f32 to vector<16x1xf32>
    %157 = arith.addf %153, %156 : vector<16x1xf32>
    %158 = math.rsqrt %157 : vector<16x1xf32>
    %159 = vector.broadcast %158 : vector<16x1xf32> to vector<16x32xf32>
    %160 = arith.mulf %155, %159 : vector<16x32xf32>
    %161 = vector.broadcast %134 : vector<1x32xf32> to vector<16x32xf32>
    %162 = arith.mulf %161, %160 : vector<16x32xf32>
    %163 = vector.broadcast %135 : vector<1x32xf32> to vector<16x32xf32>
    %164 = arith.addf %162, %163 : vector<16x32xf32>
    %165 = arith.truncf %164 : vector<16x32xf32> to vector<16x32xbf16>
    %c1_54 = arith.constant 1 : index
    %c0_55 = arith.constant 0 : index
    %c0_56 = arith.constant 0 : index
    %166 = vector.load %arg5[%c1_54, %c0_55, %c0_56] : memref<4x32x96xbf16, #tpu.memory_space<vmem>>, vector<1x32x96xbf16>
    %167 = vector.shape_cast %166 : vector<1x32x96xbf16> to vector<32x96xbf16>
    %cst_57 = arith.constant dense<0.000000e+00> : vector<16x96xf32>
    %168 = tpu.matmul %165, %167, %cst_57 {dimension_numbers = #tpu.dot_dimension_numbers<[1], [0], [0], [1], [0, 0, 1, 1], [], []>} : vector<16x32xbf16>, vector<32x96xbf16>, vector<16x96xf32> -> vector<16x96xf32>
    %169 = vector.extract_strided_slice %168 {offsets = [0, 0], sizes = [16, 32], strides = [1, 1]} : vector<16x96xf32> to vector<16x32xf32>
    %170 = vector.broadcast %136 : vector<1x32xf32> to vector<16x32xf32>
    %171 = arith.addf %169, %170 : vector<16x32xf32>
    %172 = vector.extract_strided_slice %168 {offsets = [0, 32], sizes = [16, 32], strides = [1, 1]} : vector<16x96xf32> to vector<16x32xf32>
    %173 = vector.broadcast %137 : vector<1x32xf32> to vector<16x32xf32>
    %174 = arith.addf %172, %173 : vector<16x32xf32>
    %175 = vector.extract_strided_slice %168 {offsets = [0, 64], sizes = [16, 32], strides = [1, 1]} : vector<16x96xf32> to vector<16x32xf32>
    %176 = vector.broadcast %138 : vector<1x32xf32> to vector<16x32xf32>
    %177 = arith.addf %175, %176 : vector<16x32xf32>
    %178 = tpu.transpose %174, [1, 0] : vector<16x32xf32> -> vector<32x16xf32>
    %179 = tpu.concatenate %178, %178, %178, %178 in 1 : vector<32x16xf32>, vector<32x16xf32>, vector<32x16xf32>, vector<32x16xf32> -> vector<32x64xf32>
    %180 = arith.mulf %179, %9 : vector<32x64xf32>
    %181 = arith.truncf %180 : vector<32x64xf32> to vector<32x64xbf16>
    %182 = arith.truncf %171 : vector<16x32xf32> to vector<16x32xbf16>
    %cst_58 = arith.constant dense<0.000000e+00> : vector<16x64xf32>
    %183 = tpu.matmul %182, %181, %cst_58 {dimension_numbers = #tpu.dot_dimension_numbers<[1], [0], [0], [1], [0, 0, 1, 1], [], []>} : vector<16x32xbf16>, vector<32x64xbf16>, vector<16x64xf32> -> vector<16x64xf32>
    %184 = arith.addf %183, %8 : vector<16x64xf32>
    %cst_59 = arith.constant dense<0xFF800000> : vector<16xf32>
    %185 = vector.multi_reduction <maximumf>, %184, %cst_59 [1] : vector<16x64xf32> to vector<16xf32>
    %186 = vector.shape_cast %185 : vector<16xf32> to vector<16x1xf32>
    %187 = vector.broadcast %186 : vector<16x1xf32> to vector<16x64xf32>
    %188 = arith.subf %184, %187 : vector<16x64xf32>
    %189 = math.exp %188 : vector<16x64xf32>
    %190 = arith.truncf %189 : vector<16x64xf32> to vector<16x64xbf16>
    %191 = tpu.concatenate %177, %177, %177, %177 in 0 : vector<16x32xf32>, vector<16x32xf32>, vector<16x32xf32>, vector<16x32xf32> -> vector<64x32xf32>
    %192 = arith.mulf %191, %10 : vector<64x32xf32>
    %193 = arith.truncf %192 : vector<64x32xf32> to vector<64x32xbf16>
    %cst_60 = arith.constant dense<0.000000e+00> : vector<16x32xf32>
    %194 = tpu.matmul %190, %193, %cst_60 {dimension_numbers = #tpu.dot_dimension_numbers<[1], [0], [0], [1], [0, 0, 1, 1], [], []>} : vector<16x64xbf16>, vector<64x32xbf16>, vector<16x32xf32> -> vector<16x32xf32>
    %cst_61 = arith.constant dense<0.000000e+00> : vector<16x32xf32>
    %195 = tpu.matmul %190, %11, %cst_61 {dimension_numbers = #tpu.dot_dimension_numbers<[1], [0], [0], [1], [0, 0, 1, 1], [], []>} : vector<16x64xbf16>, vector<64x32xbf16>, vector<16x32xf32> -> vector<16x32xf32>
    %196 = tpu.reciprocal %195 {approx = true} : vector<16x32xf32> -> vector<16x32xf32>
    %197 = arith.mulf %194, %196 : vector<16x32xf32>
    %198 = arith.truncf %197 : vector<16x32xf32> to vector<16x32xbf16>
    %c1_62 = arith.constant 1 : index
    %c0_63 = arith.constant 0 : index
    %c0_64 = arith.constant 0 : index
    %199 = vector.load %arg6[%c1_62, %c0_63, %c0_64] : memref<4x32x32xbf16, #tpu.memory_space<vmem>>, vector<1x32x32xbf16>
    %200 = vector.shape_cast %199 : vector<1x32x32xbf16> to vector<32x32xbf16>
    %cst_65 = arith.constant dense<0.000000e+00> : vector<16x32xf32>
    %201 = tpu.matmul %198, %200, %cst_65 {dimension_numbers = #tpu.dot_dimension_numbers<[1], [0], [0], [1], [0, 0, 1, 1], [], []>} : vector<16x32xbf16>, vector<32x32xbf16>, vector<16x32xf32> -> vector<16x32xf32>
    %202 = vector.broadcast %139 : vector<1x32xf32> to vector<16x32xf32>
    %203 = arith.addf %201, %202 : vector<16x32xf32>
    %204 = arith.addf %133, %203 : vector<16x32xf32>
    %cst_66 = arith.constant dense<0.000000e+00> : vector<16xf32>
    %205 = vector.multi_reduction <add>, %204, %cst_66 [1] : vector<16x32xf32> to vector<16xf32>
    %206 = vector.shape_cast %205 : vector<16xf32> to vector<16x1xf32>
    %cst_67 = arith.constant 3.200000e+01 : f32
    %207 = vector.broadcast %cst_67 : f32 to vector<16x1xf32>
    %208 = arith.divf %206, %207 : vector<16x1xf32>
    %209 = vector.broadcast %208 : vector<16x1xf32> to vector<16x32xf32>
    %210 = arith.subf %204, %209 : vector<16x32xf32>
    %211 = arith.mulf %210, %210 : vector<16x32xf32>
    %cst_68 = arith.constant dense<0.000000e+00> : vector<16xf32>
    %212 = vector.multi_reduction <add>, %211, %cst_68 [1] : vector<16x32xf32> to vector<16xf32>
    %213 = vector.shape_cast %212 : vector<16xf32> to vector<16x1xf32>
    %cst_69 = arith.constant 3.200000e+01 : f32
    %214 = vector.broadcast %cst_69 : f32 to vector<16x1xf32>
    %215 = arith.divf %213, %214 : vector<16x1xf32>
    %216 = vector.broadcast %208 : vector<16x1xf32> to vector<16x32xf32>
    %217 = arith.subf %204, %216 : vector<16x32xf32>
    %cst_70 = arith.constant 9.99999996E-13 : f32
    %218 = vector.broadcast %cst_70 : f32 to vector<16x1xf32>
    %219 = arith.addf %215, %218 : vector<16x1xf32>
    %220 = math.rsqrt %219 : vector<16x1xf32>
    %221 = vector.broadcast %220 : vector<16x1xf32> to vector<16x32xf32>
    %222 = arith.mulf %217, %221 : vector<16x32xf32>
    %223 = vector.broadcast %140 : vector<1x32xf32> to vector<16x32xf32>
    %224 = arith.mulf %223, %222 : vector<16x32xf32>
    %225 = vector.broadcast %141 : vector<1x32xf32> to vector<16x32xf32>
    %226 = arith.addf %224, %225 : vector<16x32xf32>
    %227 = arith.truncf %226 : vector<16x32xf32> to vector<16x32xbf16>
    %c1_71 = arith.constant 1 : index
    %c0_72 = arith.constant 0 : index
    %c0_73 = arith.constant 0 : index
    %228 = vector.load %arg7[%c1_71, %c0_72, %c0_73] : memref<4x32x128xbf16, #tpu.memory_space<vmem>>, vector<1x32x128xbf16>
    %229 = vector.shape_cast %228 : vector<1x32x128xbf16> to vector<32x128xbf16>
    %cst_74 = arith.constant dense<0.000000e+00> : vector<16x128xf32>
    %230 = tpu.matmul %227, %229, %cst_74 {dimension_numbers = #tpu.dot_dimension_numbers<[1], [0], [0], [1], [0, 0, 1, 1], [], []>} : vector<16x32xbf16>, vector<32x128xbf16>, vector<16x128xf32> -> vector<16x128xf32>
    %231 = vector.extract_strided_slice %13 {offsets = [1, 0], sizes = [1, 128], strides = [1, 1]} : vector<4x128xf32> to vector<1x128xf32>
    %232 = vector.broadcast %231 : vector<1x128xf32> to vector<16x128xf32>
    %233 = arith.addf %230, %232 : vector<16x128xf32>
    %cst_75 = arith.constant 5.000000e-01 : f32
    %234 = vector.broadcast %cst_75 : f32 to vector<16x128xf32>
    %235 = arith.mulf %234, %233 : vector<16x128xf32>
    %236 = arith.mulf %233, %233 : vector<16x128xf32>
    %237 = arith.mulf %233, %236 : vector<16x128xf32>
    %cst_76 = arith.constant 4.471500e-02 : f32
    %238 = vector.broadcast %cst_76 : f32 to vector<16x128xf32>
    %239 = arith.mulf %238, %237 : vector<16x128xf32>
    %240 = arith.addf %233, %239 : vector<16x128xf32>
    %cst_77 = arith.constant 0.797884583 : f32
    %241 = vector.broadcast %cst_77 : f32 to vector<16x128xf32>
    %242 = arith.mulf %241, %240 : vector<16x128xf32>
    %243 = math.tanh %242 : vector<16x128xf32>
    %cst_78 = arith.constant 1.000000e+00 : f32
    %244 = vector.broadcast %cst_78 : f32 to vector<16x128xf32>
    %245 = arith.addf %244, %243 : vector<16x128xf32>
    %246 = arith.mulf %235, %245 : vector<16x128xf32>
    %247 = arith.truncf %246 : vector<16x128xf32> to vector<16x128xbf16>
    %c1_79 = arith.constant 1 : index
    %c0_80 = arith.constant 0 : index
    %c0_81 = arith.constant 0 : index
    %248 = vector.load %arg8[%c1_79, %c0_80, %c0_81] : memref<4x128x32xbf16, #tpu.memory_space<vmem>>, vector<1x128x32xbf16>
    %249 = vector.shape_cast %248 : vector<1x128x32xbf16> to vector<128x32xbf16>
    %cst_82 = arith.constant dense<0.000000e+00> : vector<16x32xf32>
    %250 = tpu.matmul %247, %249, %cst_82 {dimension_numbers = #tpu.dot_dimension_numbers<[1], [0], [0], [1], [0, 0, 1, 1], [], []>} : vector<16x128xbf16>, vector<128x32xbf16>, vector<16x32xf32> -> vector<16x32xf32>
    %251 = vector.broadcast %142 : vector<1x32xf32> to vector<16x32xf32>
    %252 = arith.addf %250, %251 : vector<16x32xf32>
    %253 = arith.addf %204, %252 : vector<16x32xf32>
    %254 = vector.extract_strided_slice %12 {offsets = [18, 0], sizes = [1, 32], strides = [1, 1]} : vector<38x32xf32> to vector<1x32xf32>
    %255 = vector.extract_strided_slice %12 {offsets = [19, 0], sizes = [1, 32], strides = [1, 1]} : vector<38x32xf32> to vector<1x32xf32>
    %256 = vector.extract_strided_slice %12 {offsets = [20, 0], sizes = [1, 32], strides = [1, 1]} : vector<38x32xf32> to vector<1x32xf32>
    %257 = vector.extract_strided_slice %12 {offsets = [21, 0], sizes = [1, 32], strides = [1, 1]} : vector<38x32xf32> to vector<1x32xf32>
    %258 = vector.extract_strided_slice %12 {offsets = [22, 0], sizes = [1, 32], strides = [1, 1]} : vector<38x32xf32> to vector<1x32xf32>
    %259 = vector.extract_strided_slice %12 {offsets = [23, 0], sizes = [1, 32], strides = [1, 1]} : vector<38x32xf32> to vector<1x32xf32>
    %260 = vector.extract_strided_slice %12 {offsets = [24, 0], sizes = [1, 32], strides = [1, 1]} : vector<38x32xf32> to vector<1x32xf32>
    %261 = vector.extract_strided_slice %12 {offsets = [25, 0], sizes = [1, 32], strides = [1, 1]} : vector<38x32xf32> to vector<1x32xf32>
    %262 = vector.extract_strided_slice %12 {offsets = [26, 0], sizes = [1, 32], strides = [1, 1]} : vector<38x32xf32> to vector<1x32xf32>
    %cst_83 = arith.constant dense<0.000000e+00> : vector<16xf32>
    %263 = vector.multi_reduction <add>, %253, %cst_83 [1] : vector<16x32xf32> to vector<16xf32>
    %264 = vector.shape_cast %263 : vector<16xf32> to vector<16x1xf32>
    %cst_84 = arith.constant 3.200000e+01 : f32
    %265 = vector.broadcast %cst_84 : f32 to vector<16x1xf32>
    %266 = arith.divf %264, %265 : vector<16x1xf32>
    %267 = vector.broadcast %266 : vector<16x1xf32> to vector<16x32xf32>
    %268 = arith.subf %253, %267 : vector<16x32xf32>
    %269 = arith.mulf %268, %268 : vector<16x32xf32>
    %cst_85 = arith.constant dense<0.000000e+00> : vector<16xf32>
    %270 = vector.multi_reduction <add>, %269, %cst_85 [1] : vector<16x32xf32> to vector<16xf32>
    %271 = vector.shape_cast %270 : vector<16xf32> to vector<16x1xf32>
    %cst_86 = arith.constant 3.200000e+01 : f32
    %272 = vector.broadcast %cst_86 : f32 to vector<16x1xf32>
    %273 = arith.divf %271, %272 : vector<16x1xf32>
    %274 = vector.broadcast %266 : vector<16x1xf32> to vector<16x32xf32>
    %275 = arith.subf %253, %274 : vector<16x32xf32>
    %cst_87 = arith.constant 9.99999996E-13 : f32
    %276 = vector.broadcast %cst_87 : f32 to vector<16x1xf32>
    %277 = arith.addf %273, %276 : vector<16x1xf32>
    %278 = math.rsqrt %277 : vector<16x1xf32>
    %279 = vector.broadcast %278 : vector<16x1xf32> to vector<16x32xf32>
    %280 = arith.mulf %275, %279 : vector<16x32xf32>
    %281 = vector.broadcast %254 : vector<1x32xf32> to vector<16x32xf32>
    %282 = arith.mulf %281, %280 : vector<16x32xf32>
    %283 = vector.broadcast %255 : vector<1x32xf32> to vector<16x32xf32>
    %284 = arith.addf %282, %283 : vector<16x32xf32>
    %285 = arith.truncf %284 : vector<16x32xf32> to vector<16x32xbf16>
    %c2_88 = arith.constant 2 : index
    %c0_89 = arith.constant 0 : index
    %c0_90 = arith.constant 0 : index
    %286 = vector.load %arg5[%c2_88, %c0_89, %c0_90] : memref<4x32x96xbf16, #tpu.memory_space<vmem>>, vector<1x32x96xbf16>
    %287 = vector.shape_cast %286 : vector<1x32x96xbf16> to vector<32x96xbf16>
    %cst_91 = arith.constant dense<0.000000e+00> : vector<16x96xf32>
    %288 = tpu.matmul %285, %287, %cst_91 {dimension_numbers = #tpu.dot_dimension_numbers<[1], [0], [0], [1], [0, 0, 1, 1], [], []>} : vector<16x32xbf16>, vector<32x96xbf16>, vector<16x96xf32> -> vector<16x96xf32>
    %289 = vector.extract_strided_slice %288 {offsets = [0, 0], sizes = [16, 32], strides = [1, 1]} : vector<16x96xf32> to vector<16x32xf32>
    %290 = vector.broadcast %256 : vector<1x32xf32> to vector<16x32xf32>
    %291 = arith.addf %289, %290 : vector<16x32xf32>
    %292 = vector.extract_strided_slice %288 {offsets = [0, 32], sizes = [16, 32], strides = [1, 1]} : vector<16x96xf32> to vector<16x32xf32>
    %293 = vector.broadcast %257 : vector<1x32xf32> to vector<16x32xf32>
    %294 = arith.addf %292, %293 : vector<16x32xf32>
    %295 = vector.extract_strided_slice %288 {offsets = [0, 64], sizes = [16, 32], strides = [1, 1]} : vector<16x96xf32> to vector<16x32xf32>
    %296 = vector.broadcast %258 : vector<1x32xf32> to vector<16x32xf32>
    %297 = arith.addf %295, %296 : vector<16x32xf32>
    %298 = tpu.transpose %294, [1, 0] : vector<16x32xf32> -> vector<32x16xf32>
    %299 = tpu.concatenate %298, %298, %298, %298 in 1 : vector<32x16xf32>, vector<32x16xf32>, vector<32x16xf32>, vector<32x16xf32> -> vector<32x64xf32>
    %300 = arith.mulf %299, %9 : vector<32x64xf32>
    %301 = arith.truncf %300 : vector<32x64xf32> to vector<32x64xbf16>
    %302 = arith.truncf %291 : vector<16x32xf32> to vector<16x32xbf16>
    %cst_92 = arith.constant dense<0.000000e+00> : vector<16x64xf32>
    %303 = tpu.matmul %302, %301, %cst_92 {dimension_numbers = #tpu.dot_dimension_numbers<[1], [0], [0], [1], [0, 0, 1, 1], [], []>} : vector<16x32xbf16>, vector<32x64xbf16>, vector<16x64xf32> -> vector<16x64xf32>
    %304 = arith.addf %303, %8 : vector<16x64xf32>
    %cst_93 = arith.constant dense<0xFF800000> : vector<16xf32>
    %305 = vector.multi_reduction <maximumf>, %304, %cst_93 [1] : vector<16x64xf32> to vector<16xf32>
    %306 = vector.shape_cast %305 : vector<16xf32> to vector<16x1xf32>
    %307 = vector.broadcast %306 : vector<16x1xf32> to vector<16x64xf32>
    %308 = arith.subf %304, %307 : vector<16x64xf32>
    %309 = math.exp %308 : vector<16x64xf32>
    %310 = arith.truncf %309 : vector<16x64xf32> to vector<16x64xbf16>
    %311 = tpu.concatenate %297, %297, %297, %297 in 0 : vector<16x32xf32>, vector<16x32xf32>, vector<16x32xf32>, vector<16x32xf32> -> vector<64x32xf32>
    %312 = arith.mulf %311, %10 : vector<64x32xf32>
    %313 = arith.truncf %312 : vector<64x32xf32> to vector<64x32xbf16>
    %cst_94 = arith.constant dense<0.000000e+00> : vector<16x32xf32>
    %314 = tpu.matmul %310, %313, %cst_94 {dimension_numbers = #tpu.dot_dimension_numbers<[1], [0], [0], [1], [0, 0, 1, 1], [], []>} : vector<16x64xbf16>, vector<64x32xbf16>, vector<16x32xf32> -> vector<16x32xf32>
    %cst_95 = arith.constant dense<0.000000e+00> : vector<16x32xf32>
    %315 = tpu.matmul %310, %11, %cst_95 {dimension_numbers = #tpu.dot_dimension_numbers<[1], [0], [0], [1], [0, 0, 1, 1], [], []>} : vector<16x64xbf16>, vector<64x32xbf16>, vector<16x32xf32> -> vector<16x32xf32>
    %316 = tpu.reciprocal %315 {approx = true} : vector<16x32xf32> -> vector<16x32xf32>
    %317 = arith.mulf %314, %316 : vector<16x32xf32>
    %318 = arith.truncf %317 : vector<16x32xf32> to vector<16x32xbf16>
    %c2_96 = arith.constant 2 : index
    %c0_97 = arith.constant 0 : index
    %c0_98 = arith.constant 0 : index
    %319 = vector.load %arg6[%c2_96, %c0_97, %c0_98] : memref<4x32x32xbf16, #tpu.memory_space<vmem>>, vector<1x32x32xbf16>
    %320 = vector.shape_cast %319 : vector<1x32x32xbf16> to vector<32x32xbf16>
    %cst_99 = arith.constant dense<0.000000e+00> : vector<16x32xf32>
    %321 = tpu.matmul %318, %320, %cst_99 {dimension_numbers = #tpu.dot_dimension_numbers<[1], [0], [0], [1], [0, 0, 1, 1], [], []>} : vector<16x32xbf16>, vector<32x32xbf16>, vector<16x32xf32> -> vector<16x32xf32>
    %322 = vector.broadcast %259 : vector<1x32xf32> to vector<16x32xf32>
    %323 = arith.addf %321, %322 : vector<16x32xf32>
    %324 = arith.addf %253, %323 : vector<16x32xf32>
    %cst_100 = arith.constant dense<0.000000e+00> : vector<16xf32>
    %325 = vector.multi_reduction <add>, %324, %cst_100 [1] : vector<16x32xf32> to vector<16xf32>
    %326 = vector.shape_cast %325 : vector<16xf32> to vector<16x1xf32>
    %cst_101 = arith.constant 3.200000e+01 : f32
    %327 = vector.broadcast %cst_101 : f32 to vector<16x1xf32>
    %328 = arith.divf %326, %327 : vector<16x1xf32>
    %329 = vector.broadcast %328 : vector<16x1xf32> to vector<16x32xf32>
    %330 = arith.subf %324, %329 : vector<16x32xf32>
    %331 = arith.mulf %330, %330 : vector<16x32xf32>
    %cst_102 = arith.constant dense<0.000000e+00> : vector<16xf32>
    %332 = vector.multi_reduction <add>, %331, %cst_102 [1] : vector<16x32xf32> to vector<16xf32>
    %333 = vector.shape_cast %332 : vector<16xf32> to vector<16x1xf32>
    %cst_103 = arith.constant 3.200000e+01 : f32
    %334 = vector.broadcast %cst_103 : f32 to vector<16x1xf32>
    %335 = arith.divf %333, %334 : vector<16x1xf32>
    %336 = vector.broadcast %328 : vector<16x1xf32> to vector<16x32xf32>
    %337 = arith.subf %324, %336 : vector<16x32xf32>
    %cst_104 = arith.constant 9.99999996E-13 : f32
    %338 = vector.broadcast %cst_104 : f32 to vector<16x1xf32>
    %339 = arith.addf %335, %338 : vector<16x1xf32>
    %340 = math.rsqrt %339 : vector<16x1xf32>
    %341 = vector.broadcast %340 : vector<16x1xf32> to vector<16x32xf32>
    %342 = arith.mulf %337, %341 : vector<16x32xf32>
    %343 = vector.broadcast %260 : vector<1x32xf32> to vector<16x32xf32>
    %344 = arith.mulf %343, %342 : vector<16x32xf32>
    %345 = vector.broadcast %261 : vector<1x32xf32> to vector<16x32xf32>
    %346 = arith.addf %344, %345 : vector<16x32xf32>
    %347 = arith.truncf %346 : vector<16x32xf32> to vector<16x32xbf16>
    %c2_105 = arith.constant 2 : index
    %c0_106 = arith.constant 0 : index
    %c0_107 = arith.constant 0 : index
    %348 = vector.load %arg7[%c2_105, %c0_106, %c0_107] : memref<4x32x128xbf16, #tpu.memory_space<vmem>>, vector<1x32x128xbf16>
    %349 = vector.shape_cast %348 : vector<1x32x128xbf16> to vector<32x128xbf16>
    %cst_108 = arith.constant dense<0.000000e+00> : vector<16x128xf32>
    %350 = tpu.matmul %347, %349, %cst_108 {dimension_numbers = #tpu.dot_dimension_numbers<[1], [0], [0], [1], [0, 0, 1, 1], [], []>} : vector<16x32xbf16>, vector<32x128xbf16>, vector<16x128xf32> -> vector<16x128xf32>
    %351 = vector.extract_strided_slice %13 {offsets = [2, 0], sizes = [1, 128], strides = [1, 1]} : vector<4x128xf32> to vector<1x128xf32>
    %352 = vector.broadcast %351 : vector<1x128xf32> to vector<16x128xf32>
    %353 = arith.addf %350, %352 : vector<16x128xf32>
    %cst_109 = arith.constant 5.000000e-01 : f32
    %354 = vector.broadcast %cst_109 : f32 to vector<16x128xf32>
    %355 = arith.mulf %354, %353 : vector<16x128xf32>
    %356 = arith.mulf %353, %353 : vector<16x128xf32>
    %357 = arith.mulf %353, %356 : vector<16x128xf32>
    %cst_110 = arith.constant 4.471500e-02 : f32
    %358 = vector.broadcast %cst_110 : f32 to vector<16x128xf32>
    %359 = arith.mulf %358, %357 : vector<16x128xf32>
    %360 = arith.addf %353, %359 : vector<16x128xf32>
    %cst_111 = arith.constant 0.797884583 : f32
    %361 = vector.broadcast %cst_111 : f32 to vector<16x128xf32>
    %362 = arith.mulf %361, %360 : vector<16x128xf32>
    %363 = math.tanh %362 : vector<16x128xf32>
    %cst_112 = arith.constant 1.000000e+00 : f32
    %364 = vector.broadcast %cst_112 : f32 to vector<16x128xf32>
    %365 = arith.addf %364, %363 : vector<16x128xf32>
    %366 = arith.mulf %355, %365 : vector<16x128xf32>
    %367 = arith.truncf %366 : vector<16x128xf32> to vector<16x128xbf16>
    %c2_113 = arith.constant 2 : index
    %c0_114 = arith.constant 0 : index
    %c0_115 = arith.constant 0 : index
    %368 = vector.load %arg8[%c2_113, %c0_114, %c0_115] : memref<4x128x32xbf16, #tpu.memory_space<vmem>>, vector<1x128x32xbf16>
    %369 = vector.shape_cast %368 : vector<1x128x32xbf16> to vector<128x32xbf16>
    %cst_116 = arith.constant dense<0.000000e+00> : vector<16x32xf32>
    %370 = tpu.matmul %367, %369, %cst_116 {dimension_numbers = #tpu.dot_dimension_numbers<[1], [0], [0], [1], [0, 0, 1, 1], [], []>} : vector<16x128xbf16>, vector<128x32xbf16>, vector<16x32xf32> -> vector<16x32xf32>
    %371 = vector.broadcast %262 : vector<1x32xf32> to vector<16x32xf32>
    %372 = arith.addf %370, %371 : vector<16x32xf32>
    %373 = arith.addf %324, %372 : vector<16x32xf32>
    %374 = vector.extract_strided_slice %12 {offsets = [27, 0], sizes = [1, 32], strides = [1, 1]} : vector<38x32xf32> to vector<1x32xf32>
    %375 = vector.extract_strided_slice %12 {offsets = [28, 0], sizes = [1, 32], strides = [1, 1]} : vector<38x32xf32> to vector<1x32xf32>
    %376 = vector.extract_strided_slice %12 {offsets = [29, 0], sizes = [1, 32], strides = [1, 1]} : vector<38x32xf32> to vector<1x32xf32>
    %377 = vector.extract_strided_slice %12 {offsets = [30, 0], sizes = [1, 32], strides = [1, 1]} : vector<38x32xf32> to vector<1x32xf32>
    %378 = vector.extract_strided_slice %12 {offsets = [31, 0], sizes = [1, 32], strides = [1, 1]} : vector<38x32xf32> to vector<1x32xf32>
    %379 = vector.extract_strided_slice %12 {offsets = [32, 0], sizes = [1, 32], strides = [1, 1]} : vector<38x32xf32> to vector<1x32xf32>
    %380 = vector.extract_strided_slice %12 {offsets = [33, 0], sizes = [1, 32], strides = [1, 1]} : vector<38x32xf32> to vector<1x32xf32>
    %381 = vector.extract_strided_slice %12 {offsets = [34, 0], sizes = [1, 32], strides = [1, 1]} : vector<38x32xf32> to vector<1x32xf32>
    %382 = vector.extract_strided_slice %12 {offsets = [35, 0], sizes = [1, 32], strides = [1, 1]} : vector<38x32xf32> to vector<1x32xf32>
    %cst_117 = arith.constant dense<0.000000e+00> : vector<16xf32>
    %383 = vector.multi_reduction <add>, %373, %cst_117 [1] : vector<16x32xf32> to vector<16xf32>
    %384 = vector.shape_cast %383 : vector<16xf32> to vector<16x1xf32>
    %cst_118 = arith.constant 3.200000e+01 : f32
    %385 = vector.broadcast %cst_118 : f32 to vector<16x1xf32>
    %386 = arith.divf %384, %385 : vector<16x1xf32>
    %387 = vector.broadcast %386 : vector<16x1xf32> to vector<16x32xf32>
    %388 = arith.subf %373, %387 : vector<16x32xf32>
    %389 = arith.mulf %388, %388 : vector<16x32xf32>
    %cst_119 = arith.constant dense<0.000000e+00> : vector<16xf32>
    %390 = vector.multi_reduction <add>, %389, %cst_119 [1] : vector<16x32xf32> to vector<16xf32>
    %391 = vector.shape_cast %390 : vector<16xf32> to vector<16x1xf32>
    %cst_120 = arith.constant 3.200000e+01 : f32
    %392 = vector.broadcast %cst_120 : f32 to vector<16x1xf32>
    %393 = arith.divf %391, %392 : vector<16x1xf32>
    %394 = vector.broadcast %386 : vector<16x1xf32> to vector<16x32xf32>
    %395 = arith.subf %373, %394 : vector<16x32xf32>
    %cst_121 = arith.constant 9.99999996E-13 : f32
    %396 = vector.broadcast %cst_121 : f32 to vector<16x1xf32>
    %397 = arith.addf %393, %396 : vector<16x1xf32>
    %398 = math.rsqrt %397 : vector<16x1xf32>
    %399 = vector.broadcast %398 : vector<16x1xf32> to vector<16x32xf32>
    %400 = arith.mulf %395, %399 : vector<16x32xf32>
    %401 = vector.broadcast %374 : vector<1x32xf32> to vector<16x32xf32>
    %402 = arith.mulf %401, %400 : vector<16x32xf32>
    %403 = vector.broadcast %375 : vector<1x32xf32> to vector<16x32xf32>
    %404 = arith.addf %402, %403 : vector<16x32xf32>
    %405 = arith.truncf %404 : vector<16x32xf32> to vector<16x32xbf16>
    %c3 = arith.constant 3 : index
    %c0_122 = arith.constant 0 : index
    %c0_123 = arith.constant 0 : index
    %406 = vector.load %arg5[%c3, %c0_122, %c0_123] : memref<4x32x96xbf16, #tpu.memory_space<vmem>>, vector<1x32x96xbf16>
    %407 = vector.shape_cast %406 : vector<1x32x96xbf16> to vector<32x96xbf16>
    %cst_124 = arith.constant dense<0.000000e+00> : vector<16x96xf32>
    %408 = tpu.matmul %405, %407, %cst_124 {dimension_numbers = #tpu.dot_dimension_numbers<[1], [0], [0], [1], [0, 0, 1, 1], [], []>} : vector<16x32xbf16>, vector<32x96xbf16>, vector<16x96xf32> -> vector<16x96xf32>
    %409 = vector.extract_strided_slice %408 {offsets = [0, 0], sizes = [16, 32], strides = [1, 1]} : vector<16x96xf32> to vector<16x32xf32>
    %410 = vector.broadcast %376 : vector<1x32xf32> to vector<16x32xf32>
    %411 = arith.addf %409, %410 : vector<16x32xf32>
    %412 = vector.extract_strided_slice %408 {offsets = [0, 32], sizes = [16, 32], strides = [1, 1]} : vector<16x96xf32> to vector<16x32xf32>
    %413 = vector.broadcast %377 : vector<1x32xf32> to vector<16x32xf32>
    %414 = arith.addf %412, %413 : vector<16x32xf32>
    %415 = vector.extract_strided_slice %408 {offsets = [0, 64], sizes = [16, 32], strides = [1, 1]} : vector<16x96xf32> to vector<16x32xf32>
    %416 = vector.broadcast %378 : vector<1x32xf32> to vector<16x32xf32>
    %417 = arith.addf %415, %416 : vector<16x32xf32>
    %418 = tpu.transpose %414, [1, 0] : vector<16x32xf32> -> vector<32x16xf32>
    %419 = tpu.concatenate %418, %418, %418, %418 in 1 : vector<32x16xf32>, vector<32x16xf32>, vector<32x16xf32>, vector<32x16xf32> -> vector<32x64xf32>
    %420 = arith.mulf %419, %9 : vector<32x64xf32>
    %421 = arith.truncf %420 : vector<32x64xf32> to vector<32x64xbf16>
    %422 = arith.truncf %411 : vector<16x32xf32> to vector<16x32xbf16>
    %cst_125 = arith.constant dense<0.000000e+00> : vector<16x64xf32>
    %423 = tpu.matmul %422, %421, %cst_125 {dimension_numbers = #tpu.dot_dimension_numbers<[1], [0], [0], [1], [0, 0, 1, 1], [], []>} : vector<16x32xbf16>, vector<32x64xbf16>, vector<16x64xf32> -> vector<16x64xf32>
    %424 = arith.addf %423, %8 : vector<16x64xf32>
    %cst_126 = arith.constant dense<0xFF800000> : vector<16xf32>
    %425 = vector.multi_reduction <maximumf>, %424, %cst_126 [1] : vector<16x64xf32> to vector<16xf32>
    %426 = vector.shape_cast %425 : vector<16xf32> to vector<16x1xf32>
    %427 = vector.broadcast %426 : vector<16x1xf32> to vector<16x64xf32>
    %428 = arith.subf %424, %427 : vector<16x64xf32>
    %429 = math.exp %428 : vector<16x64xf32>
    %430 = arith.truncf %429 : vector<16x64xf32> to vector<16x64xbf16>
    %431 = tpu.concatenate %417, %417, %417, %417 in 0 : vector<16x32xf32>, vector<16x32xf32>, vector<16x32xf32>, vector<16x32xf32> -> vector<64x32xf32>
    %432 = arith.mulf %431, %10 : vector<64x32xf32>
    %433 = arith.truncf %432 : vector<64x32xf32> to vector<64x32xbf16>
    %cst_127 = arith.constant dense<0.000000e+00> : vector<16x32xf32>
    %434 = tpu.matmul %430, %433, %cst_127 {dimension_numbers = #tpu.dot_dimension_numbers<[1], [0], [0], [1], [0, 0, 1, 1], [], []>} : vector<16x64xbf16>, vector<64x32xbf16>, vector<16x32xf32> -> vector<16x32xf32>
    %cst_128 = arith.constant dense<0.000000e+00> : vector<16x32xf32>
    %435 = tpu.matmul %430, %11, %cst_128 {dimension_numbers = #tpu.dot_dimension_numbers<[1], [0], [0], [1], [0, 0, 1, 1], [], []>} : vector<16x64xbf16>, vector<64x32xbf16>, vector<16x32xf32> -> vector<16x32xf32>
    %436 = tpu.reciprocal %435 {approx = true} : vector<16x32xf32> -> vector<16x32xf32>
    %437 = arith.mulf %434, %436 : vector<16x32xf32>
    %438 = arith.truncf %437 : vector<16x32xf32> to vector<16x32xbf16>
    %c3_129 = arith.constant 3 : index
    %c0_130 = arith.constant 0 : index
    %c0_131 = arith.constant 0 : index
    %439 = vector.load %arg6[%c3_129, %c0_130, %c0_131] : memref<4x32x32xbf16, #tpu.memory_space<vmem>>, vector<1x32x32xbf16>
    %440 = vector.shape_cast %439 : vector<1x32x32xbf16> to vector<32x32xbf16>
    %cst_132 = arith.constant dense<0.000000e+00> : vector<16x32xf32>
    %441 = tpu.matmul %438, %440, %cst_132 {dimension_numbers = #tpu.dot_dimension_numbers<[1], [0], [0], [1], [0, 0, 1, 1], [], []>} : vector<16x32xbf16>, vector<32x32xbf16>, vector<16x32xf32> -> vector<16x32xf32>
    %442 = vector.broadcast %379 : vector<1x32xf32> to vector<16x32xf32>
    %443 = arith.addf %441, %442 : vector<16x32xf32>
    %444 = arith.addf %373, %443 : vector<16x32xf32>
    %cst_133 = arith.constant dense<0.000000e+00> : vector<16xf32>
    %445 = vector.multi_reduction <add>, %444, %cst_133 [1] : vector<16x32xf32> to vector<16xf32>
    %446 = vector.shape_cast %445 : vector<16xf32> to vector<16x1xf32>
    %cst_134 = arith.constant 3.200000e+01 : f32
    %447 = vector.broadcast %cst_134 : f32 to vector<16x1xf32>
    %448 = arith.divf %446, %447 : vector<16x1xf32>
    %449 = vector.broadcast %448 : vector<16x1xf32> to vector<16x32xf32>
    %450 = arith.subf %444, %449 : vector<16x32xf32>
    %451 = arith.mulf %450, %450 : vector<16x32xf32>
    %cst_135 = arith.constant dense<0.000000e+00> : vector<16xf32>
    %452 = vector.multi_reduction <add>, %451, %cst_135 [1] : vector<16x32xf32> to vector<16xf32>
    %453 = vector.shape_cast %452 : vector<16xf32> to vector<16x1xf32>
    %cst_136 = arith.constant 3.200000e+01 : f32
    %454 = vector.broadcast %cst_136 : f32 to vector<16x1xf32>
    %455 = arith.divf %453, %454 : vector<16x1xf32>
    %456 = vector.broadcast %448 : vector<16x1xf32> to vector<16x32xf32>
    %457 = arith.subf %444, %456 : vector<16x32xf32>
    %cst_137 = arith.constant 9.99999996E-13 : f32
    %458 = vector.broadcast %cst_137 : f32 to vector<16x1xf32>
    %459 = arith.addf %455, %458 : vector<16x1xf32>
    %460 = math.rsqrt %459 : vector<16x1xf32>
    %461 = vector.broadcast %460 : vector<16x1xf32> to vector<16x32xf32>
    %462 = arith.mulf %457, %461 : vector<16x32xf32>
    %463 = vector.broadcast %380 : vector<1x32xf32> to vector<16x32xf32>
    %464 = arith.mulf %463, %462 : vector<16x32xf32>
    %465 = vector.broadcast %381 : vector<1x32xf32> to vector<16x32xf32>
    %466 = arith.addf %464, %465 : vector<16x32xf32>
    %467 = arith.truncf %466 : vector<16x32xf32> to vector<16x32xbf16>
    %c3_138 = arith.constant 3 : index
    %c0_139 = arith.constant 0 : index
    %c0_140 = arith.constant 0 : index
    %468 = vector.load %arg7[%c3_138, %c0_139, %c0_140] : memref<4x32x128xbf16, #tpu.memory_space<vmem>>, vector<1x32x128xbf16>
    %469 = vector.shape_cast %468 : vector<1x32x128xbf16> to vector<32x128xbf16>
    %cst_141 = arith.constant dense<0.000000e+00> : vector<16x128xf32>
    %470 = tpu.matmul %467, %469, %cst_141 {dimension_numbers = #tpu.dot_dimension_numbers<[1], [0], [0], [1], [0, 0, 1, 1], [], []>} : vector<16x32xbf16>, vector<32x128xbf16>, vector<16x128xf32> -> vector<16x128xf32>
    %471 = vector.extract_strided_slice %13 {offsets = [3, 0], sizes = [1, 128], strides = [1, 1]} : vector<4x128xf32> to vector<1x128xf32>
    %472 = vector.broadcast %471 : vector<1x128xf32> to vector<16x128xf32>
    %473 = arith.addf %470, %472 : vector<16x128xf32>
    %cst_142 = arith.constant 5.000000e-01 : f32
    %474 = vector.broadcast %cst_142 : f32 to vector<16x128xf32>
    %475 = arith.mulf %474, %473 : vector<16x128xf32>
    %476 = arith.mulf %473, %473 : vector<16x128xf32>
    %477 = arith.mulf %473, %476 : vector<16x128xf32>
    %cst_143 = arith.constant 4.471500e-02 : f32
    %478 = vector.broadcast %cst_143 : f32 to vector<16x128xf32>
    %479 = arith.mulf %478, %477 : vector<16x128xf32>
    %480 = arith.addf %473, %479 : vector<16x128xf32>
    %cst_144 = arith.constant 0.797884583 : f32
    %481 = vector.broadcast %cst_144 : f32 to vector<16x128xf32>
    %482 = arith.mulf %481, %480 : vector<16x128xf32>
    %483 = math.tanh %482 : vector<16x128xf32>
    %cst_145 = arith.constant 1.000000e+00 : f32
    %484 = vector.broadcast %cst_145 : f32 to vector<16x128xf32>
    %485 = arith.addf %484, %483 : vector<16x128xf32>
    %486 = arith.mulf %475, %485 : vector<16x128xf32>
    %487 = arith.truncf %486 : vector<16x128xf32> to vector<16x128xbf16>
    %c3_146 = arith.constant 3 : index
    %c0_147 = arith.constant 0 : index
    %c0_148 = arith.constant 0 : index
    %488 = vector.load %arg8[%c3_146, %c0_147, %c0_148] : memref<4x128x32xbf16, #tpu.memory_space<vmem>>, vector<1x128x32xbf16>
    %489 = vector.shape_cast %488 : vector<1x128x32xbf16> to vector<128x32xbf16>
    %cst_149 = arith.constant dense<0.000000e+00> : vector<16x32xf32>
    %490 = tpu.matmul %487, %489, %cst_149 {dimension_numbers = #tpu.dot_dimension_numbers<[1], [0], [0], [1], [0, 0, 1, 1], [], []>} : vector<16x128xbf16>, vector<128x32xbf16>, vector<16x32xf32> -> vector<16x32xf32>
    %491 = vector.broadcast %382 : vector<1x32xf32> to vector<16x32xf32>
    %492 = arith.addf %490, %491 : vector<16x32xf32>
    %493 = arith.addf %444, %492 : vector<16x32xf32>
    %494 = vector.extract_strided_slice %12 {offsets = [36, 0], sizes = [1, 32], strides = [1, 1]} : vector<38x32xf32> to vector<1x32xf32>
    %495 = vector.extract_strided_slice %12 {offsets = [37, 0], sizes = [1, 32], strides = [1, 1]} : vector<38x32xf32> to vector<1x32xf32>
    %cst_150 = arith.constant dense<0.000000e+00> : vector<16xf32>
    %496 = vector.multi_reduction <add>, %493, %cst_150 [1] : vector<16x32xf32> to vector<16xf32>
    %497 = vector.shape_cast %496 : vector<16xf32> to vector<16x1xf32>
    %cst_151 = arith.constant 3.200000e+01 : f32
    %498 = vector.broadcast %cst_151 : f32 to vector<16x1xf32>
    %499 = arith.divf %497, %498 : vector<16x1xf32>
    %500 = vector.broadcast %499 : vector<16x1xf32> to vector<16x32xf32>
    %501 = arith.subf %493, %500 : vector<16x32xf32>
    %502 = arith.mulf %501, %501 : vector<16x32xf32>
    %cst_152 = arith.constant dense<0.000000e+00> : vector<16xf32>
    %503 = vector.multi_reduction <add>, %502, %cst_152 [1] : vector<16x32xf32> to vector<16xf32>
    %504 = vector.shape_cast %503 : vector<16xf32> to vector<16x1xf32>
    %cst_153 = arith.constant 3.200000e+01 : f32
    %505 = vector.broadcast %cst_153 : f32 to vector<16x1xf32>
    %506 = arith.divf %504, %505 : vector<16x1xf32>
    %507 = vector.broadcast %499 : vector<16x1xf32> to vector<16x32xf32>
    %508 = arith.subf %493, %507 : vector<16x32xf32>
    %cst_154 = arith.constant 9.99999996E-13 : f32
    %509 = vector.broadcast %cst_154 : f32 to vector<16x1xf32>
    %510 = arith.addf %506, %509 : vector<16x1xf32>
    %511 = math.rsqrt %510 : vector<16x1xf32>
    %512 = vector.broadcast %511 : vector<16x1xf32> to vector<16x32xf32>
    %513 = arith.mulf %508, %512 : vector<16x32xf32>
    %514 = vector.broadcast %494 : vector<1x32xf32> to vector<16x32xf32>
    %515 = arith.mulf %514, %513 : vector<16x32xf32>
    %516 = vector.broadcast %495 : vector<1x32xf32> to vector<16x32xf32>
    %517 = arith.addf %515, %516 : vector<16x32xf32>
    %c0_155 = arith.constant 0 : index
    %c0_156 = arith.constant 0 : index
    %518 = vector.load %arg11[%c0_155, %c0_156] : memref<16x32xf32, #tpu.memory_space<vmem>>, vector<16x32xf32>
    tpu.vector_store %arg11[%c0_155, %c0_156], %517 {strides = array<i32>} : memref<16x32xf32, #tpu.memory_space<vmem>>, vector<16x32xf32>,
    return
  }
  func.func @transform_0(%arg0: i32) -> (i32, i32, i32) {
    %c0_i32 = arith.constant 0 : i32
    %c0_i32_0 = arith.constant 0 : i32
    %c0_i32_1 = arith.constant 0 : i32
    return %c0_i32, %arg0, %c0_i32_0 : i32, i32, i32
  }
  func.func @transform_1(%arg0: i32) -> (i32, i32) {
    %c0_i32 = arith.constant 0 : i32
    %c0_i32_0 = arith.constant 0 : i32
    return %arg0, %c0_i32 : i32, i32
  }
  func.func @transform_2(%arg0: i32) -> (i32, i32) {
    %c0_i32 = arith.constant 0 : i32
    %c0_i32_0 = arith.constant 0 : i32
    %c0_i32_1 = arith.constant 0 : i32
    return %c0_i32, %c0_i32_0 : i32, i32
  }
  func.func @transform_3(%arg0: i32) -> (i32, i32) {
    %c0_i32 = arith.constant 0 : i32
    %c0_i32_0 = arith.constant 0 : i32
    %c0_i32_1 = arith.constant 0 : i32
    return %c0_i32, %c0_i32_0 : i32, i32
  }
  func.func @transform_4(%arg0: i32) -> (i32, i32, i32) {
    %c0_i32 = arith.constant 0 : i32
    %c0_i32_0 = arith.constant 0 : i32
    %c0_i32_1 = arith.constant 0 : i32
    %c0_i32_2 = arith.constant 0 : i32
    return %c0_i32, %c0_i32_0, %c0_i32_1 : i32, i32, i32
  }
  func.func @transform_5(%arg0: i32) -> (i32, i32, i32) {
    %c0_i32 = arith.constant 0 : i32
    %c0_i32_0 = arith.constant 0 : i32
    %c0_i32_1 = arith.constant 0 : i32
    %c0_i32_2 = arith.constant 0 : i32
    return %c0_i32, %c0_i32_0, %c0_i32_1 : i32, i32, i32
  }
  func.func @transform_6(%arg0: i32) -> (i32, i32, i32) {
    %c0_i32 = arith.constant 0 : i32
    %c0_i32_0 = arith.constant 0 : i32
    %c0_i32_1 = arith.constant 0 : i32
    %c0_i32_2 = arith.constant 0 : i32
    return %c0_i32, %c0_i32_0, %c0_i32_1 : i32, i32, i32
  }
  func.func @transform_7(%arg0: i32) -> (i32, i32, i32) {
    %c0_i32 = arith.constant 0 : i32
    %c0_i32_0 = arith.constant 0 : i32
    %c0_i32_1 = arith.constant 0 : i32
    %c0_i32_2 = arith.constant 0 : i32
    return %c0_i32, %c0_i32_0, %c0_i32_1 : i32, i32, i32
  }
  func.func @transform_8(%arg0: i32) -> (i32, i32) {
    %c0_i32 = arith.constant 0 : i32
    %c0_i32_0 = arith.constant 0 : i32
    %c0_i32_1 = arith.constant 0 : i32
    return %c0_i32, %c0_i32_0 : i32, i32
  }
  func.func @transform_9(%arg0: i32) -> (i32, i32) {
    %c0_i32 = arith.constant 0 : i32
    %c0_i32_0 = arith.constant 0 : i32
    %c0_i32_1 = arith.constant 0 : i32
    return %c0_i32, %c0_i32_0 : i32, i32
  }
  func.func @transform_10(%arg0: i32) -> (i32, i32) {
    %c0_i32 = arith.constant 0 : i32
    %c0_i32_0 = arith.constant 0 : i32
    return %arg0, %c0_i32 : i32, i32
  }
}

</mosaic_0001>

<bundles_post_ra>
// kernel: tile.9
= control target key start
LH: loop header
LB: loop body
LE: loop exit
PB: predicated region body
PF: predicated region fallthrough
CT: control target
= control target key end

     0   :  { %vm82_vm0 = vcmask 1047556   ;;  %vm84_vm1 = vcmask 130048   ;;  %s195_s9 = smov 48   ;;  %s196_s14 = smov 16   ;;  %vm103_vm2 = vcmask 523648   ;;  %vm124_vm3 = vcmask 392448   ;;  %s289_s0 = inlined_call_operand.vmem [shape: f32[16,4,16], index: 0, kind: input, shape index: {}]   ;;  %s290_s1 = inlined_call_operand.vmem [shape: f32[16,64], index: 1, kind: output, shape index: {}]  }
   0x1   :  { %v180_v0 = vld [vmem:[%s289_s0 + $0x1c] sm:$0xf]  ;;  %v181_v1 = vld [vmem:[%s289_s0 + $0x18] sm:$0xf]  ;;  %v182_v2 = vld [vmem:[%s289_s0 + $0x14] sm:$0xf] }
   0x2   :  { %48 = vst [vmem:[#allocation0 + $0x38] sm:$0xf] %v180_v0  ;;  %53 = vst [vmem:[#allocation0 + $0x30] sm:$0xf] %v181_v1  ;;  %v183_v3 = vld [vmem:[%s289_s0 + $0x10] sm:$0xf] }
   0x3   :  { %58 = vst [vmem:[#allocation0 + $0x28] sm:$0xf] %v182_v2  ;;  %v184_v4 = vld [vmem:[%s289_s0 + $0xc] sm:$0xf]  ;;  %v185_v5 = vld [vmem:[%s289_s0 + $0x8] sm:$0xf] }
   0x4   :  { %63 = vst [vmem:[#allocation0 + $0x20] sm:$0xf] %v183_v3  ;;  %68 = vst [vmem:[#allocation0 + $0x18] sm:$0xf] %v184_v4  ;;  %v186_v6 = vld [vmem:[%s289_s0 + $0x4] sm:$0xf] }
   0x5   :  { %73 = vst [vmem:[#allocation0 + $0x10] sm:$0xf] %v185_v5  ;;  %v78_v7 = vld [vmem:[%s289_s0] sm:$0xf]  ;;  %77 = vst [vmem:[#allocation0 + $0x8] sm:$0xf] %v186_v6 }
   0x6   :  { %79 = vst [vmem:[#allocation0] sm:$0xf] %v78_v7  ;;  %v172_v8 = vld [vmem:[%s289_s0 + $0x3c] sm:$0xf]  ;;  %v173_v9 = vld [vmem:[%s289_s0 + $0x38] sm:$0xf] }
   0x7   :  { %8 = vst [vmem:[#allocation0 + $0x78] sm:$0xf] %v172_v8  ;;  %13 = vst [vmem:[#allocation0 + $0x70] sm:$0xf] %v173_v9  ;;  %v174_v10 = vld [vmem:[%s289_s0 + $0x34] sm:$0xf] }
   0x8   :  { %v175_v11 = vld [vmem:[%s289_s0 + $0x30] sm:$0xf]  ;;  %v176_v12 = vld [vmem:[%s289_s0 + $0x2c] sm:$0xf]  ;;  %18 = vst [vmem:[#allocation0 + $0x68] sm:$0xf] %v174_v10 }
   0x9   :  { %23 = vst [vmem:[#allocation0 + $0x60] sm:$0xf] %v175_v11  ;;  %28 = vst [vmem:[#allocation0 + $0x58] sm:$0xf] %v176_v12  ;;  %v177_v13 = vld [vmem:[%s289_s0 + $0x28] sm:$0xf] }
   0xa   :  { %v178_v14 = vld [vmem:[%s289_s0 + $0x24] sm:$0xf]  ;;  %v179_v15 = vld [vmem:[%s289_s0 + $0x20] sm:$0xf]  ;;  %33 = vst [vmem:[#allocation0 + $0x50] sm:$0xf] %v177_v13 }
   0xb   :  { %38 = vst [vmem:[#allocation0 + $0x48] sm:$0xf] %v178_v14  ;;  %43 = vst [vmem:[#allocation0 + $0x40] sm:$0xf] %v179_v15  ;;  %s194_s0 = smov 32   ;;  %vm145_vm4 = vcmask 261248  }
   0xc   :  { %v119_v16 = vld [vmem:[#allocation0 + $0x2] ss:$8 sm:$0xf0]   ;;  %v98_v17 = vld [vmem:[#allocation0 + $0x3] ss:$8 sm:$0xf0]  }
   0xd   :  { %v117_v18 = vld [vmem:[#allocation0 + $0x2] ss:$8 sm:$0xf]   ;;  %v96_v19 = vld [vmem:[#allocation0 + $0x3] ss:$8 sm:$0xf]  }
   0xe   :  { %v121_v20 = vsel %vm82_vm0, %v119_v16, %v117_v18  ;;  %v100_v21 = vsel %vm82_vm0, %v98_v17, %v96_v19  ;;  %v138_v24 = vld [vmem:[#allocation0 + $0x1] ss:$8 sm:$0xf]   ;;  %v80_v32 = vld [vmem:[#allocation0] ss:$8 sm:$0xf]  }
   0xf   :  { %122 = vrot.lane.b32.xlu1 %v121_v20, %s194_s0  ;;  %101 = vrot.lane.b32.xlu0 %v100_v21, %s195_s9  ;;  %v140_v25 = vld [vmem:[#allocation0 + $0x1] ss:$8 sm:$0xf0]   ;;  %v81_v33 = vld [vmem:[#allocation0] ss:$8 sm:$0xf0]  }
  0x10   :  { %v129_v22 = vld [vmem:[#allocation0 + $0x42] ss:$8 sm:$0xf0]   ;;  %v108_v23 = vld [vmem:[#allocation0 + $0x43] ss:$8 sm:$0xf0]   ;;  %v83_v34 = vsel %vm82_vm0, %v81_v33, %v80_v32  ;;  %v142_v38 = vsel %vm82_vm0, %v140_v25, %v138_v24 }
  0x11   :  { %v150_v31 = vld [vmem:[#allocation0 + $0x41] ss:$8 sm:$0xf0]   ;;  %v89_v36 = vld [vmem:[#allocation0 + $0x40] ss:$8 sm:$0xf0]  }
  0x12   :  { %v127_v26 = vld [vmem:[#allocation0 + $0x42] ss:$8 sm:$0xf]   ;;  %v106_v27 = vld [vmem:[#allocation0 + $0x43] ss:$8 sm:$0xf]  }
  0x13   :  { %v131_v28 = vsel %vm82_vm0, %v129_v22, %v127_v26  ;;  %v110_v29 = vsel %vm82_vm0, %v108_v23, %v106_v27  ;;  %v148_v30 = vld [vmem:[#allocation0 + $0x41] ss:$8 sm:$0xf]   ;;  %v87_v35 = vld [vmem:[#allocation0 + $0x40] ss:$8 sm:$0xf]  }
  0x14   :  { %132 = vrot.lane.b32.xlu1 %v131_v28, %s194_s0  ;;  %111 = vrot.lane.b32.xlu0 %v110_v29, %s195_s9  ;;  %v152_v37 = vsel %vm82_vm0, %v150_v31, %v148_v30  ;;  %85 = vst.msk [vmem:[%s290_s1] sm:$0xff] %vm84_vm1, %v83_v34   ;;  %v91_v39 = vsel %vm82_vm0, %v89_v36, %v87_v35 }
  0x15   :  { %187 = vst.msk [vmem:[%s290_s1 + $0x8] sm:$0xff] %vm84_vm1, %v91_v39  }
  0x18   :  { %153 = vrot.lane.b32.xlu1 %v152_v37, %s196_s14  ;;  %143 = vrot.lane.b32.xlu0 %v142_v38, %s196_s14 }
  0x81   :  { %v123_v40 = vpop.permute.xlu1 %122   ;;  %v102_v41 = vpop.permute.xlu0 %101  }
  0x82   :  { %104 = vst.msk [vmem:[%s290_s1] sm:$0xff] %vm103_vm2, %v102_v41  }
  0x83   :  { %125 = vst.msk [vmem:[%s290_s1] sm:$0xff] %vm124_vm3, %v123_v40  }
  0x86   :  { %v133_v42 = vpop.permute.xlu1 %132   ;;  %v112_v43 = vpop.permute.xlu0 %111  }
  0x87   :  { %188 = vst.msk [vmem:[%s290_s1 + $0x8] sm:$0xff] %vm103_vm2, %v112_v43  }
  0x88   :  { %189 = vst.msk [vmem:[%s290_s1 + $0x8] sm:$0xff] %vm124_vm3, %v133_v42  }
  0x8a   :  { %v154_v44 = vpop.permute.xlu1 %153   ;;  %v144_v45 = vpop.permute.xlu0 %143  }
  0x8b   :  { %190 = vst.msk [vmem:[%s290_s1 + $0x8] sm:$0xff] %vm145_vm4, %v154_v44   ;;  %146 = vst.msk [vmem:[%s290_s1] sm:$0xff] %vm145_vm4, %v144_v45  }

// kernel: diffu_xstart_forward.1
= control target key start
LH: loop header
LB: loop body
LE: loop exit
PB: predicated region body
PF: predicated region fallthrough
CT: control target
= control target key end

     0   :  { %vm73_vm0 = vcmask 261120   ;;  %s4881_s0 = inlined_call_operand.vmem [shape: f32[3,16,32], index: 0, kind: input, shape index: {}]   ;;  %s4882_s1 = inlined_call_operand.vmem [shape: f32[16,64], index: 1, kind: input, shape index: {}]   ;;  %s4883_s2 = inlined_call_operand.vmem [shape: f32[32,64], index: 2, kind: input, shape index: {}]   ;;  %s4884_s3 = inlined_call_operand.vmem [shape: f32[64,32], index: 3, kind: input, shape index: {}]   ;;  %s4885_s4 = inlined_call_operand.vmem [shape: bf16[4,32,96], index: 4, kind: input, shape index: {}]   ;;  %s4886_s5 = inlined_call_operand.vmem [shape: bf16[4,32,32], index: 5, kind: input, shape index: {}]   ;;  %s4887_s6 = inlined_call_operand.vmem [shape: bf16[4,32,128], index: 6, kind: input, shape index: {}]   ;;  %s4888_s7 = inlined_call_operand.vmem [shape: bf16[4,128,32], index: 7, kind: input, shape index: {}]   ;;  %s4889_s8 = inlined_call_operand.vmem [shape: f32[4,128], index: 8, kind: input, shape index: {}]   ;;  %s4890_s9 = inlined_call_operand.vmem [shape: f32[38,32], index: 9, kind: input, shape index: {}]   ;;  %s4891_s10 = inlined_call_operand.hbm [shape: f32[16,32], index: 10, kind: output, shape index: {}]  }
   0x1   :  { %v37_v0 = vld [vmem:[%s4881_s0] sm:$0xff]  ;;  %v2970_v1 = vld [vmem:[%s4881_s0 + $0x10] sm:$0xff]  ;;  %v38_v4 = vld [vmem:[%s4881_s0 + $0x8] sm:$0xff] }
   0x2   :  { %v2972_v2 = vld [vmem:[%s4881_s0 + $0x20] sm:$0xff]  ;;  %v2971_v5 = vld [vmem:[%s4881_s0 + $0x18] sm:$0xff]  ;;  %v2973_v6 = vld [vmem:[%s4881_s0 + $0x28] sm:$0xff] }
   0x3   :  { %v45_v3 = vmul.f32 %v2972_v2, %v2970_v1  ;;  %v46_v7 = vmul.f32 %v2973_v6, %v2971_v5 }
   0x5   :  { %v3830_v8 = vadd.f32 %v45_v3, %v37_v0  ;;  %v3832_v9 = vadd.f32 %v46_v7, %v38_v4 }
   0x7   :  { %v74_v10 = vsel %vm73_vm0, %v3830_v8, 0.0  ;;  %v77_v11 = vsel %vm73_vm0, %v3832_v9, 0.0 }
   0x8   :  { %75 = vadd.xlane.f32.xlu0 %v74_v10 }
   0xc   :  { %78 = vadd.xlane.f32.xlu0 %v77_v11 }
   0xd   :  { %15 = vsyncpa [#allocation3], 0  ;;  %v3576_v22 = vld [vmem:[%s4885_s4] sm:$0xff]   ;;  %v3747_v23 = vmov 0.0   ;;  %vm3748_vm1 = vmmov 0   ;;  %v3577_v24 = vld [vmem:[%s4885_s4 + $0x8] sm:$0xff]   ;;  %v101_v25 = vlaneseq }
   0xe   :  { %3262 = vmatprep.subr.bf16.mxu0 %v3747_v23  ;;  %3266 = vmatprep.mubr.msk.bf16.mxu0 %vm3748_vm1, %v3747_v23  ;;  %v3864_v28 = vld [vmem:[%s4890_s9] sm:$0xff]  ;;  %s3749_s30 = smov 32   ;;  %s3750_s11 = smov 96   ;;  %v3931_v6 = vld [vmem:[%s4884_s3 + $0x8] sm:$0xff]  ;;  %v3938_v7 = vld [vmem:[%s4884_s3 + $0x10] sm:$0xff]  ;;  %vm280_vm2 = vcmask 130048  }
   0xf   :  { %3263 = vmatpush3.bf16.msra.mxu0 %v3576_v22  ;;  %3270 = vmatprep.subr.bf16.mxu1 %v3747_v23  ;;  %v3856_v26 = vshrl.u32 %v101_v25, 7  ;;  %s3751_s12 = smov 64   ;;  %s3752_s13 = smov 16   ;;  %v3924_v5 = vld [vmem:[%s4884_s3] sm:$0xff]  ;;  %v3945_v10 = vld [vmem:[%s4884_s3 + $0x18] sm:$0xff]  ;;  %vm289_vm3 = vcmask 392192  }
  0x10   :  { %3264 = vmatprep.subr.bf16.mxu0 %v3747_v23  ;;  %3274 = vmatprep.mubr.msk.bf16.mxu1 %vm3748_vm1, %v3747_v23  ;;  %s3753_s14 = smov 48   ;;  %v3952_v11 = vld [vmem:[%s4884_s3 + $0x20] sm:$0xff]  ;;  %vm345_vm4 = vcmask 523264  }
  0x11   :  { %v3859_v27 = vsub.s32 3, %v3856_v26  ;;  %v3870_v36 = vsub.s32 0, %v3856_v26  ;;  %v3875_v40 = vsub.s32 1, %v3856_v26  ;;  %v3883_v49 = vsub.s32 2, %v3856_v26  ;;  %v3982_v22 = vld [vmem:[%s4883_s2] sm:$0xff] }
  0x12   :  { %v3904_v63 = vsub.s32 4, %v3856_v26 }
  0x13   :  { %3265 = vmatpush3.bf16.msra.mxu0 %v3577_v24  ;;  %v183_v29 = vrot.slane %v3864_v28, %v3859_v27  ;;  %v104_v39 = vrot.slane %v3864_v28, %v3870_v36  ;;  %v110_v44 = vrot.slane %v3864_v28, %v3875_v40  ;;  %v177_v51 = vrot.slane %v3864_v28, %v3883_v49 }
  0x14   :  { %3302 = vmatprep.subr.bf16.mxu0 %v3747_v23  ;;  %v193_v0 = vrot.slane %v3864_v28, %v3904_v63 }
  0x22   :  { %185 = vrot.lane.b32.xlu0 %v183_v29, %s3749_s30  ;;  %v3989_v29 = vld [vmem:[%s4883_s2 + $0x8] sm:$0xff] }
  0x95   :  { %v76_v12 = vpop.xlane.xlu0 %75 }
  0x96   :  { %v81_v13 = vmul.f32 0.03125, %v76_v12  ;;  %v3959_v12 = vld [vmem:[%s4884_s3 + $0x28] sm:$0xff] }
  0x98   :  { %v83_v14 = vsub.f32 %v3830_v8, %v81_v13  ;;  %v3966_v13 = vld [vmem:[%s4884_s3 + $0x30] sm:$0xff] }
  0x99   :  { %v79_v15 = vpop.xlane.xlu0 %78 }
  0x9a   :  { %v82_v16 = vmul.f32 0.03125, %v79_v15  ;;  %v85_v17 = vmul.f32 %v83_v14, %v83_v14 }
  0x9c   :  { %v84_v18 = vsub.f32 %v3832_v9, %v82_v16  ;;  %v87_v19 = vsel %vm73_vm0, %v85_v17, 0.0 }
  0x9d   :  { %88 = vadd.xlane.f32.xlu1 %v87_v19  ;;  %v186_v50 = vpop.permute.xlu0 %185 }
  0x9e   :  { %v86_v20 = vmul.f32 %v84_v18, %v84_v18 }
  0xa0   :  { %v90_v21 = vsel %vm73_vm0, %v86_v20, 0.0 }
  0xa1   :  { %91 = vadd.xlane.f32.xlu1 %v90_v21 }
 0x12a   :  { %v89_v30 = vpop.xlane.xlu1 %88 }
 0x12b   :  { %v93_v31 = vmul.f32 0.03125, %v89_v30 }
 0x12d   :  { %v95_v32 = vadd.f32 1e-12, %v93_v31 }
 0x12e   :  { %v92_v33 = vpop.xlane.xlu1 %91 }
 0x12f   :  { %3632 = vrsqrt.f32 %v95_v32  ;;  %v94_v34 = vmul.f32 0.03125, %v92_v33 }
 0x131   :  { %v96_v35 = vadd.f32 1e-12, %v94_v34 }
 0x133   :  { %3634 = vrsqrt.f32 %v96_v35 }
 0x139   :  { %v3633_v37 = vpop.eup %3632 }
 0x13a   :  { %v99_v38 = vmul.f32 %v3633_v37, %v83_v14  ;;  %v3973_v14 = vld [vmem:[%s4884_s3 + $0x38] sm:$0xff] }
 0x13c   :  { %v105_v43 = vmul.f32 %v104_v39, %v99_v38 }
 0x13d   :  { %v3635_v41 = vpop.eup %3634 }
 0x13e   :  { %v100_v42 = vmul.f32 %v3635_v41, %v84_v18  ;;  %v111_v46 = vadd.f32 %v110_v44, %v105_v43 }
 0x140   :  { %v106_v45 = vmul.f32 %v104_v39, %v100_v42 }
 0x142   :  { %v112_v47 = vadd.f32 %v110_v44, %v106_v45  ;;  %v4001_v45 = vld [vmem:[%s4883_s2 + $0x10] sm:$0xff] }
 0x144   :  { %v113_v48 = vpack.c.bf16 %v112_v47, %v111_v46 }
 0x146   :  { %3267 = vmatmul.mubr.msk.bf16.vlgmr.msra.gmra.mrb[0].mxu0 %vm73_vm0, %v113_v48  ;;  %v4008_v48 = vld [vmem:[%s4883_s2 + $0x18] sm:$0xff] }
 0x147   :  { %3306 = vmatprep.mubr.msk.bf16.mxu0 %vm3748_vm1, %v3747_v23 }
 0x219   :  { %v3887_v52 = vpop.f32.mrb[0].mxu0 }
 0x21a   :  { %v188_v53 = vadd.f32 %v186_v50, %v3887_v52  ;;  %v3268_v54 = vpop.f32.mrb[1].mxu0  ;;  %v3893_v56 = vadd.f32 %v177_v51, %v3887_v52 }
 0x21b   :  { %v3890_v55 = vpop.f32.mrb[2].mxu0 }
 0x21c   :  { %v3896_v57 = vadd.f32 %v177_v51, %v3890_v55  ;;  %v3269_v58 = vpop.f32.mrb[3].mxu0  ;;  %202 = vrot.lane.b32.xlu1 %v188_v53, %s3750_s11  ;;  %v189_v59 = vadd.f32 %v186_v50, %v3890_v55 }
 0x21e   :  { %v300_v60 = vpack.c.bf16 %v3896_v57, %v3893_v56 }
 0x220   :  { %204 = vrot.lane.b32.xlu1 %v189_v59, %s3750_s11 }
 0x28e   :  { %v203_v61 = vpop.permute.xlu1 %202 }
 0x28f   :  { %208 = vxpose.xlu1.b32.start [1/2] (short) (narrow) %v203_v61, 32 }
 0x292   :  { %v205_v62 = vpop.permute.xlu1 %204 }
 0x293   :  { %209 = vxpose.xlu1.b32.end [2/2] (short) (narrow) %v205_v62, 32 }
 0x2b9   :  { %195 = vrot.lane.b32.xlu1 %v193_v0, %s3751_s12 }
 0x30f   :  { %v224_v1 = vpop.trf.xlu1 }
 0x310   :  { %244 = vrot.lane.b32.xlu0 %v224_v1, %s3752_s13 }
 0x313   :  { %v225_v2 = vpop.trf.xlu1 }
 0x314   :  { %256 = vrot.lane.b32.xlu0 %v224_v1, %s3749_s30 }
 0x317   :  { %v226_v3 = vpop.trf.xlu1 }
 0x318   :  { %268 = vrot.lane.b32.xlu0 %v224_v1, %s3753_s14 }
 0x31b   :  { %v227_v4 = vpop.trf.xlu1 }
 0x31c   :  { %246 = vrot.lane.b32.xlu0 %v225_v2, %s3752_s13 }
 0x320   :  { %258 = vrot.lane.b32.xlu0 %v225_v2, %s3749_s30 }
 0x324   :  { %270 = vrot.lane.b32.xlu0 %v225_v2, %s3753_s14 }
 0x328   :  { %248 = vrot.lane.b32.xlu0 %v226_v3, %s3752_s13 }
 0x32b   :  { %v196_v59 = vpop.permute.xlu1 %195 }
 0x32c   :  { %260 = vrot.lane.b32.xlu0 %v226_v3, %s3749_s30  ;;  %v198_v0 = vadd.f32 %v196_v59, %v3887_v52 }
 0x330   :  { %272 = vrot.lane.b32.xlu0 %v226_v3, %s3753_s14 }
 0x334   :  { %250 = vrot.lane.b32.xlu0 %v227_v4, %s3752_s13 }
 0x338   :  { %262 = vrot.lane.b32.xlu0 %v227_v4, %s3749_s30 }
 0x33c   :  { %274 = vrot.lane.b32.xlu0 %v227_v4, %s3753_s14 }
 0x340   :  { %367 = vrot.lane.b32.xlu0 %v3924_v5, %s3751_s12 }
 0x344   :  { %369 = vrot.lane.b32.xlu0 %v3931_v6, %s3751_s12 }
 0x348   :  { %371 = vrot.lane.b32.xlu0 %v3938_v7, %s3751_s12 }
 0x34c   :  { %373 = vrot.lane.b32.xlu0 %v3945_v10, %s3751_s12 }
 0x350   :  { %375 = vrot.lane.b32.xlu0 %v3952_v11, %s3751_s12 }
 0x354   :  { %377 = vrot.lane.b32.xlu0 %v3959_v12, %s3751_s12 }
 0x358   :  { %379 = vrot.lane.b32.xlu0 %v3966_v13, %s3751_s12 }
 0x35c   :  { %381 = vrot.lane.b32.xlu0 %v3973_v14, %s3751_s12 }
 0x382   :  { %v245_v15 = vpop.permute.xlu0 %244 }
 0x383   :  { %v281_v20 = vsel %vm280_vm2, %v224_v1, %v245_v15  ;;  %v199_v1 = vadd.f32 %v196_v59, %v3890_v55 }
 0x386   :  { %v257_v16 = vpop.permute.xlu0 %256 }
 0x387   :  { %v285_v21 = vsel %vm73_vm0, %v281_v20, %v257_v16 }
 0x38a   :  { %v269_v17 = vpop.permute.xlu0 %268 }
 0x38b   :  { %v290_v24 = vsel %vm289_vm3, %v285_v21, %v269_v17 }
 0x38c   :  { %v294_v33 = vmul.f32 %v290_v24, %v3982_v22 }
 0x38e   :  { %v247_v18 = vpop.permute.xlu0 %246 }
 0x38f   :  { %v282_v25 = vsel %vm280_vm2, %v225_v2, %v247_v18 }
 0x392   :  { %v259_v19 = vpop.permute.xlu0 %258 }
 0x393   :  { %v286_v30 = vsel %vm73_vm0, %v282_v25, %v259_v19 }
 0x396   :  { %v271_v31 = vpop.permute.xlu0 %270 }
 0x397   :  { %v291_v32 = vsel %vm289_vm3, %v286_v30, %v271_v31 }
 0x398   :  { %v295_v34 = vmul.f32 %v291_v32, %v3989_v29 }
 0x39a   :  { %v249_v35 = vpop.permute.xlu0 %248  ;;  %v298_v37 = vpack.c.bf16 %v295_v34, %v294_v33  ;;  %v4054_v34 = vld [vmem:[%s4882_s1] sm:$0xff] }
 0x39b   :  { %v283_v43 = vsel %vm280_vm2, %v226_v3, %v249_v35 }
 0x39c   :  { %3271 = vmatpush3.bf16.msra.mxu1 %v298_v37  ;;  %v4059_v37 = vld [vmem:[%s4882_s1 + $0x8] sm:$0xff] }
 0x39d   :  { %3272 = vmatprep.subr.bf16.mxu1 %v3747_v23 }
 0x39e   :  { %v261_v38 = vpop.permute.xlu0 %260 }
 0x39f   :  { %v287_v44 = vsel %vm73_vm0, %v283_v43, %v261_v38 }
 0x3a2   :  { %v273_v39 = vpop.permute.xlu0 %272 }
 0x3a3   :  { %v292_v46 = vsel %vm289_vm3, %v287_v44, %v273_v39 }
 0x3a4   :  { %v296_v54 = vmul.f32 %v292_v46, %v4001_v45 }
 0x3a6   :  { %v251_v41 = vpop.permute.xlu0 %250 }
 0x3a7   :  { %v284_v47 = vsel %vm280_vm2, %v227_v4, %v251_v41 }
 0x3aa   :  { %v263_v42 = vpop.permute.xlu0 %262 }
 0x3ab   :  { %v288_v50 = vsel %vm73_vm0, %v284_v47, %v263_v42 }
 0x3ae   :  { %v275_v51 = vpop.permute.xlu0 %274 }
 0x3af   :  { %v293_v53 = vsel %vm289_vm3, %v288_v50, %v275_v51 }
 0x3b0   :  { %v297_v58 = vmul.f32 %v293_v53, %v4008_v48 }
 0x3b2   :  { %v4014_v61 = vpop.permute.xlu0 %367  ;;  %v299_v62 = vpack.c.bf16 %v297_v58, %v296_v54 }
 0x3b3   :  { %v391_v3 = vmul.f32 %v4014_v61, %v198_v0 }
 0x3b4   :  { %3273 = vmatpush3.bf16.msra.mxu1 %v299_v62 }
 0x3b5   :  { %3278 = vmatprep.subr.bf16.mxu1 %v3747_v23 }
 0x3b6   :  { %v4019_v2 = vpop.permute.xlu0 %369 }
 0x3b7   :  { %3275 = vmatmul.mubr.msk.bf16.vlgmr.msra.gmra.mrb[0].mxu1 %vm73_vm0, %v300_v60  ;;  %v392_v4 = vmul.f32 %v4019_v2, %v199_v1 }
 0x3b8   :  { %3286 = vmatprep.mubr.msk.bf16.mxu1 %vm3748_vm1, %v3747_v23 }
 0x3b9   :  { %v399_v15 = vpack.c.bf16 %v392_v4, %v391_v3  ;;  %v4071_v3 = vpack.c.bf16 %v3931_v6, %v3924_v5  ;;  %v4090_v5 = vpack.c.bf16 %v3973_v14, %v3966_v13  ;;  %v3578_v6 = vld [vmem:[%s4886_s5] sm:$0xff]  }
 0x3ba   :  { %v4029_v52 = vpop.permute.xlu0 %371  ;;  %3303 = vmatpush3.bf16.msra.mxu0 %v3578_v6  ;;  %v3581_v6 = vld [vmem:[%s4887_s6 + $0x8] sm:$0xff]  }
 0x3bb   :  { %407 = vrot.lane.b32.xlu0 %v399_v15, %s3751_s12  ;;  %v393_v16 = vmul.f32 %v4029_v52, %v198_v0  ;;  %v4076_v15 = vpack.c.bf16 %v3945_v10, %v3938_v7  ;;  %3304 = vmatprep.subr.bf16.mxu0 %v3747_v23  ;;  %v3579_v7 = vld [vmem:[%s4886_s5 + $0x8] sm:$0xff]  }
 0x3be   :  { %v4032_v55 = vpop.permute.xlu0 %373  ;;  %3305 = vmatpush3.bf16.msra.mxu0 %v3579_v7 }
 0x3bf   :  { %v394_v56 = vmul.f32 %v4032_v55, %v199_v1  ;;  %3318 = vmatprep.subr.bf16.mxu0 %v3747_v23 }
 0x3c1   :  { %v400_v57 = vpack.c.bf16 %v394_v56, %v393_v16  ;;  %v4084_v16 = vpack.c.bf16 %v3959_v12, %v3952_v11 }
 0x3c2   :  { %v4036_v60 = vpop.permute.xlu0 %375 }
 0x3c3   :  { %409 = vrot.lane.b32.xlu1 %v400_v57, %s3751_s12  ;;  %v395_v18 = vmul.f32 %v4036_v60, %v198_v0 }
 0x3c6   :  { %v4039_v17 = vpop.permute.xlu0 %377 }
 0x3c7   :  { %v396_v19 = vmul.f32 %v4039_v17, %v199_v1 }
 0x3c9   :  { %v401_v20 = vpack.c.bf16 %v396_v19, %v395_v18 }
 0x3ca   :  { %v4043_v21 = vpop.permute.xlu0 %379 }
 0x3cb   :  { %v397_v25 = vmul.f32 %v4043_v21, %v198_v0 }
 0x3ce   :  { %v4045_v24 = vpop.permute.xlu0 %381 }
 0x3cf   :  { %v398_v30 = vmul.f32 %v4045_v24, %v199_v1 }
 0x3d1   :  { %v402_v31 = vpack.c.bf16 %v398_v30, %v397_v25 }
 0x42d   :  { %v408_v32 = vpop.permute.xlu0 %407 }
 0x42e   :  { %3279 = vmatpush3.bf16.msra.mxu1 %v408_v32  ;;  %v4111_v32 = vsub.s32 5, %v3856_v26 }
 0x42f   :  { %3280 = vmatprep.subr.bf16.mxu1 %v3747_v23 }
 0x435   :  { %v410_v33 = vpop.permute.xlu1 %409 }
 0x436   :  { %3281 = vmatpush3.bf16.msra.mxu1 %v410_v33  ;;  %v516_v33 = vrot.slane %v3864_v28, %v4111_v32 }
 0x437   :  { %3282 = vmatprep.subr.bf16.mxu1 %v3747_v23 }
 0x48a   :  { %v338_v35 = vpop.f32.mrb[0].mxu1 }
 0x48b   :  { %v339_v38 = vadd.f32 %v338_v35, %v4054_v34  ;;  %v3276_v39 = vpop.f32.mrb[1].mxu1 }
 0x48c   :  { %v341_v41 = vpop.f32.mrb[2].mxu1 }
 0x48d   :  { %v342_v42 = vadd.f32 %v341_v41, %v4059_v37  ;;  %v3277_v43 = vpop.f32.mrb[3].mxu1  ;;  %v346_v44 = vsel %vm345_vm4, %v339_v38, -inf }
 0x48e   :  { %347 = vmax.xlane.f32.xlu0 %v346_v44 }
 0x48f   :  { %v349_v46 = vsel %vm345_vm4, %v342_v42, -inf }
 0x490   :  { %350 = vmax.xlane.f32.xlu1 %v349_v46 }
 0x4a1   :  { %413 = vrot.lane.b32.xlu1 %v402_v31, %s3751_s12 }
 0x4a4   :  { %411 = vrot.lane.b32.xlu0 %v401_v20, %s3751_s12 }
 0x51b   :  { %v348_v47 = vpop.xlane.xlu0 %347 }
 0x51c   :  { %v352_v50 = vsub.f32 %v339_v38, %v348_v47 }
 0x51d   :  { %v351_v51 = vpop.xlane.xlu1 %350 }
 0x51e   :  { %v354_v53 = vmul.f32 1.442695, %v352_v50  ;;  %v353_v54 = vsub.f32 %v342_v42, %v351_v51 }
 0x51f   :  { %v412_v58 = vpop.permute.xlu0 %411 }
 0x520   :  { %v356_v59 = vmul.f32 1.442695, %v353_v54  ;;  %3283 = vmatpush3.bf16.msra.mxu1 %v412_v58  ;;  %3636 = vpow2.f32 %v354_v53 }
 0x521   :  { %3284 = vmatprep.subr.bf16.mxu1 %v3747_v23  ;;  %v414_v62 = vpop.permute.xlu1 %413 }
 0x522   :  { %3638 = vpow2.f32 %v356_v59 }
 0x524   :  { %3285 = vmatpush3.bf16.msra.mxu1 %v414_v62 }
 0x525   :  { %3290 = vmatprep.subr.bf16.mxu1 %v3747_v23 }
 0x52a   :  { %v3637_v0 = vpop.eup %3636 }
 0x52c   :  { %v3639_v1 = vpop.eup %3638 }
 0x52d   :  { %v358_v4 = vpack.c.bf16 %v3639_v1, %v3637_v0 }
 0x52f   :  { %3287 = vmatmul.mubr.msk.bf16.vlgmr.msra.gmra.mrb[4].mxu1 %vm345_vm4, %v358_v4 }
 0x530   :  { %3291 = vmatpush3.bf16.msra.mxu1 %v4071_v3  ;;  %3298 = vmatprep.mubr.msk.bf16.mxu1 %vm3748_vm1, %v3747_v23 }
 0x531   :  { %3292 = vmatprep.subr.bf16.mxu1 %v3747_v23 }
 0x534   :  { %3293 = vmatpush3.bf16.msra.mxu1 %v4076_v15 }
 0x535   :  { %3294 = vmatprep.subr.bf16.mxu1 %v3747_v23 }
 0x538   :  { %3295 = vmatpush3.bf16.msra.mxu1 %v4084_v16 }
 0x539   :  { %3296 = vmatprep.subr.bf16.mxu1 %v3747_v23 }
 0x53c   :  { %3297 = vmatpush3.bf16.msra.mxu1 %v4090_v5 }
 0x53d   :  { %3310 = vmatprep.subr.bf16.mxu1 %v3747_v23 }
 0x53f   :  { %3299 = vmatmul.mubr.msk.bf16.vlgmr.msra.gmra.mrb[8].mxu1 %vm345_vm4, %v358_v4  ;;  %v3580_v4 = vld [vmem:[%s4887_s6] sm:$0xff]  }
 0x540   :  { %3314 = vmatprep.mubr.msk.bf16.mxu1 %vm3748_vm1, %v3747_v23  ;;  %3311 = vmatpush3.bf16.msra.mxu1 %v3580_v4 }
 0x541   :  { %3312 = vmatprep.subr.bf16.mxu1 %v3747_v23 }
 0x544   :  { %3313 = vmatpush3.bf16.msra.mxu1 %v3581_v6 }
 0x545   :  { %3338 = vmatprep.subr.bf16.mxu1 %v3747_v23 }
 0x602   :  { %v456_v10 = vpop.f32.mrb[4].mxu1 }
 0x603   :  { %v3288_v11 = vpop.f32.mrb[5].mxu1 }
 0x604   :  { %v459_v12 = vpop.f32.mrb[6].mxu1 }
 0x605   :  { %v3289_v13 = vpop.f32.mrb[7].mxu1 }
 0x612   :  { %v497_v14 = vpop.f32.mrb[8].mxu1 }
 0x613   :  { %3640 = vrcp.f32 %v497_v14  ;;  %v3300_v56 = vpop.f32.mrb[9].mxu1 }
 0x614   :  { %v500_v57 = vpop.f32.mrb[10].mxu1  ;;  %v4138_v56 = vsub.s32 6, %v3856_v26 }
 0x615   :  { %3642 = vrcp.f32 %v500_v57  ;;  %v3301_v18 = vpop.f32.mrb[11].mxu1 }
 0x616   :  { %v604_v18 = vrot.slane %v3864_v28, %v4138_v56 }
 0x61d   :  { %v3641_v19 = vpop.eup %3640 }
 0x61e   :  { %v506_v20 = vmul.f32 %v3641_v19, %v456_v10 }
 0x61f   :  { %v3643_v25 = vpop.eup %3642 }
 0x620   :  { %v507_v30 = vmul.f32 %v3643_v25, %v459_v12 }
 0x622   :  { %v508_v31 = vpack.c.bf16 %v507_v30, %v506_v20  ;;  %v4143_v20 = vsub.s32 7, %v3856_v26  ;;  %v3582_v26 = vld [vmem:[%s4888_s7] sm:$0xff]  }
 0x624   :  { %3307 = vmatmul.mubr.msk.bf16.vlgmr.msra.gmra.mrb[4].mxu0 %vm73_vm0, %v508_v31 }
 0x625   :  { %3334 = vmatprep.mubr.msk.bf16.mxu0 %vm3748_vm1, %v3747_v23  ;;  %3319 = vmatpush3.bf16.msra.mxu0 %v3582_v26  ;;  %v4202_v26 = vld [vmem:[%s4890_s9 + $0x8] sm:$0xff] }
 0x626   :  { %3320 = vmatprep.subr.bf16.mxu0 %v3747_v23 }
 0x6f7   :  { %v566_v35 = vpop.f32.mrb[4].mxu0 }
 0x6f8   :  { %v567_v38 = vadd.f32 %v566_v35, %v516_v33  ;;  %v3308_v39 = vpop.f32.mrb[5].mxu0 }
 0x6f9   :  { %v569_v41 = vpop.f32.mrb[6].mxu0 }
 0x6fa   :  { %v4116_v42 = vadd.f32 %v567_v38, %v3830_v8  ;;  %v570_v43 = vadd.f32 %v569_v41, %v516_v33  ;;  %v3309_v44 = vpop.f32.mrb[7].mxu0  ;;  %v610_v33 = vrot.slane %v3864_v28, %v4143_v20  ;;  %v3583_v28 = vld [vmem:[%s4888_s7 + $0x8] sm:$0xff]  }
 0x6fb   :  { %3321 = vmatpush3.bf16.msra.mxu0 %v3583_v28  ;;  %v3585_v44 = vld [vmem:[%s4888_s7 + $0x18] sm:$0xff]   ;;  %v716_v28 = vrot.slane %v4202_v26, %v3870_v36 }
 0x6fc   :  { %v4119_v46 = vadd.f32 %v570_v43, %v3832_v9  ;;  %v575_v47 = vsel %vm73_vm0, %v4116_v42, 0.0  ;;  %3322 = vmatprep.subr.bf16.mxu0 %v3747_v23  ;;  %v3584_v43 = vld [vmem:[%s4888_s7 + $0x10] sm:$0xff]  }
 0x6fd   :  { %576 = vadd.xlane.f32.xlu0 %v575_v47  ;;  %v3586_v47 = vld [vmem:[%s4888_s7 + $0x20] sm:$0xff]  }
 0x6fe   :  { %v578_v50 = vsel %vm73_vm0, %v4119_v46, 0.0 }
 0x6ff   :  { %579 = vadd.xlane.f32.xlu1 %v578_v50  ;;  %3323 = vmatpush3.bf16.msra.mxu0 %v3584_v43  ;;  %v3587_v50 = vld [vmem:[%s4888_s7 + $0x28] sm:$0xff]  }
 0x700   :  { %3324 = vmatprep.subr.bf16.mxu0 %v3747_v23 }
 0x703   :  { %3325 = vmatpush3.bf16.msra.mxu0 %v3585_v44 }
 0x704   :  { %3326 = vmatprep.subr.bf16.mxu0 %v3747_v23 }
 0x707   :  { %3327 = vmatpush3.bf16.msra.mxu0 %v3586_v47 }
 0x708   :  { %3328 = vmatprep.subr.bf16.mxu0 %v3747_v23 }
 0x70b   :  { %3329 = vmatpush3.bf16.msra.mxu0 %v3587_v50 }
 0x70c   :  { %3330 = vmatprep.subr.bf16.mxu0 %v3747_v23 }
 0x78a   :  { %v577_v51 = vpop.xlane.xlu0 %576 }
 0x78b   :  { %v581_v53 = vmul.f32 0.03125, %v577_v51  ;;  %v3588_v51 = vld [vmem:[%s4888_s7 + $0x30] sm:$0xff]  }
 0x78c   :  { %v580_v54 = vpop.xlane.xlu1 %579  ;;  %3331 = vmatpush3.bf16.msra.mxu0 %v3588_v51 }
 0x78d   :  { %v583_v58 = vsub.f32 %v4116_v42, %v581_v53  ;;  %v582_v8 = vmul.f32 0.03125, %v580_v54  ;;  %v3589_v53 = vld [vmem:[%s4888_s7 + $0x38] sm:$0xff]   ;;  %3332 = vmatprep.subr.bf16.mxu0 %v3747_v23  ;;  %v4185_v54 = vld [vmem:[%s4889_s8] sm:$0xf] }
 0x78f   :  { %v584_v59 = vsub.f32 %v4119_v46, %v582_v8  ;;  %v585_v62 = vmul.f32 %v583_v58, %v583_v58 }
 0x790   :  { %3333 = vmatpush3.bf16.msra.mxu0 %v3589_v53 }
 0x791   :  { %v587_v9 = vsel %vm73_vm0, %v585_v62, 0.0  ;;  %v586_v0 = vmul.f32 %v584_v59, %v584_v59  ;;  %3366 = vmatprep.subr.bf16.mxu0 %v3747_v23 }
 0x792   :  { %588 = vadd.xlane.f32.xlu0 %v587_v9 }
 0x793   :  { %v590_v1 = vsel %vm73_vm0, %v586_v0, 0.0 }
 0x796   :  { %591 = vadd.xlane.f32.xlu0 %v590_v1 }
 0x81f   :  { %v589_v7 = vpop.xlane.xlu0 %588 }
 0x820   :  { %v593_v10 = vmul.f32 0.03125, %v589_v7 }
 0x822   :  { %v595_v11 = vadd.f32 1e-12, %v593_v10 }
 0x823   :  { %v592_v12 = vpop.xlane.xlu0 %591 }
 0x824   :  { %3644 = vrsqrt.f32 %v595_v11  ;;  %v594_v13 = vmul.f32 0.03125, %v592_v12 }
 0x826   :  { %v596_v14 = vadd.f32 1e-12, %v594_v13 }
 0x828   :  { %3646 = vrsqrt.f32 %v596_v14 }
 0x82e   :  { %v3645_v57 = vpop.eup %3644 }
 0x82f   :  { %v599_v19 = vmul.f32 %v3645_v57, %v583_v58  ;;  %v621_v58 = vrot.slane %v4185_v54, %v3870_v36 }
 0x831   :  { %v605_v30 = vmul.f32 %v604_v18, %v599_v19 }
 0x832   :  { %v3647_v25 = vpop.eup %3646 }
 0x833   :  { %v600_v31 = vmul.f32 %v3647_v25, %v584_v59  ;;  %v611_v38 = vadd.f32 %v610_v33, %v605_v30 }
 0x835   :  { %v606_v35 = vmul.f32 %v604_v18, %v600_v31 }
 0x837   :  { %v612_v39 = vadd.f32 %v610_v33, %v606_v35 }
 0x839   :  { %v613_v41 = vpack.c.bf16 %v612_v39, %v611_v38 }
 0x83b   :  { %3315 = vmatmul.mubr.msk.bf16.vlgmr.msra.gmra.mrb[12].mxu1 %vm73_vm0, %v613_v41 }
 0x83c   :  { %3342 = vmatprep.mubr.msk.bf16.mxu1 %vm3748_vm1, %v3747_v23 }
 0x90e   :  { %v671_v8 = vpop.f32.mrb[12].mxu1 }
 0x90f   :  { %v672_v59 = vadd.f32 %v671_v8, %v621_v58  ;;  %v3316_v62 = vpop.f32.mrb[13].mxu1 }
 0x910   :  { %v674_v9 = vpop.f32.mrb[14].mxu1 }
 0x911   :  { %v680_v0 = vmul.f32 %v672_v59, %v672_v59  ;;  %v675_v1 = vadd.f32 %v674_v9, %v621_v58  ;;  %v3317_v4 = vpop.f32.mrb[15].mxu1  ;;  %v678_v31 = vmul.f32 0.5, %v672_v59 }
 0x913   :  { %v682_v6 = vmul.f32 %v680_v0, %v672_v59  ;;  %v681_v7 = vmul.f32 %v675_v1, %v675_v1  ;;  %v679_v33 = vmul.f32 0.5, %v675_v1 }
 0x915   :  { %v684_v10 = vmul.f32 0.044715, %v682_v6  ;;  %v683_v11 = vmul.f32 %v681_v7, %v675_v1 }
 0x917   :  { %v686_v12 = vadd.f32 %v684_v10, %v672_v59  ;;  %v685_v13 = vmul.f32 0.044715, %v683_v11 }
 0x919   :  { %v688_v14 = vmul.f32 0.7978846, %v686_v12  ;;  %v687_v57 = vadd.f32 %v685_v13, %v675_v1  ;;  %v3590_v12 = vld [vmem:[%s4885_s4 + $0x10] sm:$0xff]   ;;  %v3591_v13 = vld [vmem:[%s4885_s4 + $0x18] sm:$0xff]  }
 0x91a   :  { %3339 = vmatpush3.bf16.msra.mxu1 %v3590_v12 }
 0x91b   :  { %3648 = vtanh.f32 %v688_v14  ;;  %v689_v18 = vmul.f32 0.7978846, %v687_v57  ;;  %3340 = vmatprep.subr.bf16.mxu1 %v3747_v23  ;;  %v917_v14 = vrot.slane %v4202_v26, %v3904_v63 }
 0x91d   :  { %3650 = vtanh.f32 %v689_v18 }
 0x91e   :  { %3341 = vmatpush3.bf16.msra.mxu1 %v3591_v13 }
 0x91f   :  { %3346 = vmatprep.subr.bf16.mxu1 %v3747_v23 }
 0x925   :  { %v3649_v19 = vpop.eup %3648 }
 0x926   :  { %v692_v25 = vadd.f32 1.0, %v3649_v19 }
 0x927   :  { %v3651_v30 = vpop.eup %3650 }
 0x928   :  { %v693_v35 = vadd.f32 1.0, %v3651_v30  ;;  %v694_v38 = vmul.f32 %v692_v25, %v678_v31 }
 0x92a   :  { %v695_v39 = vmul.f32 %v693_v35, %v679_v33  ;;  %v837_v33 = vrot.slane %v4202_v26, %v3875_v40 }
 0x92c   :  { %v696_v41 = vpack.c.bf16 %v695_v39, %v694_v38 }
 0x92e   :  { %3335 = vmatmul.mubr.bf16.vlgmr.msra.gmra.mrb[8].mxu0 %v696_v41 }
 0x92f   :  { %3367 = vmatpush3.bf16.msra.mxu0 %v4071_v3  ;;  %3374 = vmatprep.mubr.msk.bf16.mxu0 %vm3748_vm1, %v3747_v23 }
 0x930   :  { %3368 = vmatprep.subr.bf16.mxu0 %v3747_v23 }
 0x933   :  { %3369 = vmatpush3.bf16.msra.mxu0 %v4076_v15 }
 0x934   :  { %3370 = vmatprep.subr.bf16.mxu0 %v3747_v23 }
 0x937   :  { %3371 = vmatpush3.bf16.msra.mxu0 %v4084_v16 }
 0x938   :  { %3372 = vmatprep.subr.bf16.mxu0 %v3747_v23 }
 0x93b   :  { %3373 = vmatpush3.bf16.msra.mxu0 %v4090_v5 }
 0x93c   :  { %3394 = vmatprep.subr.bf16.mxu0 %v3747_v23 }
 0xa01   :  { %v799_v43 = vpop.f32.mrb[8].mxu0 }
 0xa02   :  { %v800_v44 = vadd.f32 %v799_v43, %v716_v28  ;;  %v3336_v47 = vpop.f32.mrb[9].mxu0  ;;  %v843_v43 = vrot.slane %v4202_v26, %v3883_v49 }
 0xa03   :  { %v802_v50 = vpop.f32.mrb[10].mxu0 }
 0xa04   :  { %v4207_v51 = vadd.f32 %v800_v44, %v4116_v42  ;;  %v803_v53 = vadd.f32 %v802_v50, %v716_v28  ;;  %v3337_v58 = vpop.f32.mrb[11].mxu0 }
 0xa06   :  { %v4210_v8 = vadd.f32 %v803_v53, %v4119_v46  ;;  %v808_v59 = vsel %vm73_vm0, %v4207_v51, 0.0 }
 0xa07   :  { %809 = vadd.xlane.f32.xlu1 %v808_v59  ;;  %v911_v59 = vrot.slane %v4202_v26, %v3859_v27 }
 0xa08   :  { %v811_v62 = vsel %vm73_vm0, %v4210_v8, 0.0 }
 0xa09   :  { %812 = vadd.xlane.f32.xlu0 %v811_v62 }
 0xa94   :  { %v810_v9 = vpop.xlane.xlu1 %809 }
 0xa95   :  { %v814_v0 = vmul.f32 0.03125, %v810_v9 }
 0xa96   :  { %v813_v1 = vpop.xlane.xlu0 %812 }
 0xa97   :  { %v816_v4 = vsub.f32 %v4207_v51, %v814_v0  ;;  %v815_v42 = vmul.f32 0.03125, %v813_v1 }
 0xa99   :  { %v817_v6 = vsub.f32 %v4210_v8, %v815_v42  ;;  %v818_v7 = vmul.f32 %v816_v4, %v816_v4 }
 0xa9b   :  { %v820_v46 = vsel %vm73_vm0, %v818_v7, 0.0  ;;  %v819_v10 = vmul.f32 %v817_v6, %v817_v6 }
 0xa9c   :  { %821 = vadd.xlane.f32.xlu1 %v820_v46 }
 0xa9d   :  { %v823_v11 = vsel %vm73_vm0, %v819_v10, 0.0 }
 0xa9e   :  { %824 = vadd.xlane.f32.xlu0 %v823_v11 }
 0xaad   :  { %919 = vrot.lane.b32.xlu1 %v917_v14, %s3749_s30 }
 0xb29   :  { %v822_v57 = vpop.xlane.xlu1 %821 }
 0xb2a   :  { %v826_v18 = vmul.f32 0.03125, %v822_v57 }
 0xb2b   :  { %v825_v19 = vpop.xlane.xlu0 %824 }
 0xb2c   :  { %v828_v25 = vadd.f32 1e-12, %v826_v18  ;;  %v827_v30 = vmul.f32 0.03125, %v825_v19  ;;  %v927_v18 = vrot.slane %v4202_v26, %v4111_v32 }
 0xb2d   :  { %v920_v58 = vpop.permute.xlu1 %919 }
 0xb2e   :  { %3652 = vrsqrt.f32 %v828_v25  ;;  %v829_v31 = vadd.f32 1e-12, %v827_v30 }
 0xb30   :  { %3654 = vrsqrt.f32 %v829_v31 }
 0xb38   :  { %v3653_v35 = vpop.eup %3652 }
 0xb39   :  { %v832_v38 = vmul.f32 %v3653_v35, %v816_v4 }
 0xb3a   :  { %v3655_v39 = vpop.eup %3654 }
 0xb3b   :  { %v838_v41 = vmul.f32 %v837_v33, %v832_v38  ;;  %v833_v28 = vmul.f32 %v3655_v39, %v817_v6 }
 0xb3d   :  { %v839_v44 = vmul.f32 %v837_v33, %v833_v28  ;;  %v844_v47 = vadd.f32 %v843_v43, %v838_v41 }
 0xb3f   :  { %v845_v50 = vadd.f32 %v843_v43, %v839_v44 }
 0xb41   :  { %v846_v53 = vpack.c.bf16 %v845_v50, %v844_v47 }
 0xb43   :  { %3343 = vmatmul.mubr.msk.bf16.vlgmr.msra.gmra.mrb[16].mxu1 %vm73_vm0, %v846_v53 }
 0xb44   :  { %3350 = vmatprep.mubr.msk.bf16.mxu1 %vm3748_vm1, %v3747_v23 }
 0xc16   :  { %v4240_v62 = vpop.f32.mrb[16].mxu1 }
 0xc17   :  { %v922_v9 = vadd.f32 %v920_v58, %v4240_v62  ;;  %v3344_v0 = vpop.f32.mrb[17].mxu1  ;;  %v4246_v4 = vadd.f32 %v911_v59, %v4240_v62 }
 0xc18   :  { %v4243_v1 = vpop.f32.mrb[18].mxu1 }
 0xc19   :  { %v4249_v42 = vadd.f32 %v911_v59, %v4243_v1  ;;  %v923_v6 = vadd.f32 %v920_v58, %v4243_v1  ;;  %936 = vrot.lane.b32.xlu0 %v922_v9, %s3750_s11  ;;  %v3345_v7 = vpop.f32.mrb[19].mxu1 }
 0xc1b   :  { %v1032_v46 = vpack.c.bf16 %v4249_v42, %v4246_v4  ;;  %938 = vrot.lane.b32.xlu1 %v923_v6, %s3750_s11 }
 0xc8b   :  { %v937_v10 = vpop.permute.xlu0 %936 }
 0xc8c   :  { %942 = vxpose.xlu1.b32.start [1/2] (short) (narrow) %v937_v10, 32 }
 0xc8d   :  { %v939_v11 = vpop.permute.xlu1 %938 }
 0xc90   :  { %943 = vxpose.xlu1.b32.end [2/2] (short) (narrow) %v939_v11, 32 }
 0xd0c   :  { %v958_v12 = vpop.trf.xlu1 }
 0xd0d   :  { %978 = vrot.lane.b32.xlu0 %v958_v12, %s3752_s13 }
 0xd10   :  { %v959_v13 = vpop.trf.xlu1 }
 0xd11   :  { %990 = vrot.lane.b32.xlu0 %v958_v12, %s3749_s30 }
 0xd14   :  { %v960_v14 = vpop.trf.xlu1 }
 0xd15   :  { %1002 = vrot.lane.b32.xlu0 %v958_v12, %s3753_s14 }
 0xd18   :  { %v961_v57 = vpop.trf.xlu1 }
 0xd19   :  { %980 = vrot.lane.b32.xlu0 %v959_v13, %s3752_s13  ;;  %1008 = vrot.lane.b32.xlu1 %v961_v57, %s3753_s14 }
 0xd1d   :  { %992 = vrot.lane.b32.xlu0 %v959_v13, %s3749_s30 }
 0xd21   :  { %1004 = vrot.lane.b32.xlu0 %v959_v13, %s3753_s14 }
 0xd25   :  { %982 = vrot.lane.b32.xlu0 %v960_v14, %s3752_s13 }
 0xd29   :  { %994 = vrot.lane.b32.xlu0 %v960_v14, %s3749_s30 }
 0xd2d   :  { %984 = vrot.lane.b32.xlu0 %v961_v57, %s3752_s13 }
 0xd31   :  { %996 = vrot.lane.b32.xlu0 %v961_v57, %s3749_s30 }
 0xd35   :  { %1006 = vrot.lane.b32.xlu0 %v960_v14, %s3753_s14 }
 0xd39   :  { %929 = vrot.lane.b32.xlu0 %v927_v18, %s3751_s12 }
 0xd7f   :  { %v979_v19 = vpop.permute.xlu0 %978 }
 0xd80   :  { %v1014_v35 = vsel %vm280_vm2, %v958_v12, %v979_v19 }
 0xd83   :  { %v991_v25 = vpop.permute.xlu0 %990 }
 0xd84   :  { %v1018_v38 = vsel %vm73_vm0, %v1014_v35, %v991_v25 }
 0xd87   :  { %v1003_v30 = vpop.permute.xlu0 %1002 }
 0xd88   :  { %v1022_v39 = vsel %vm289_vm3, %v1018_v38, %v1003_v30 }
 0xd89   :  { %v1026_v47 = vmul.f32 %v1022_v39, %v3982_v22 }
 0xd8b   :  { %v981_v31 = vpop.permute.xlu0 %980  ;;  %v1009_v10 = vpop.permute.xlu1 %1008 }
 0xd8c   :  { %v1015_v41 = vsel %vm280_vm2, %v959_v13, %v981_v31 }
 0xd8f   :  { %v993_v33 = vpop.permute.xlu0 %992 }
 0xd90   :  { %v1019_v28 = vsel %vm73_vm0, %v1015_v41, %v993_v33 }
 0xd93   :  { %v1005_v43 = vpop.permute.xlu0 %1004 }
 0xd94   :  { %v1023_v44 = vsel %vm289_vm3, %v1019_v28, %v1005_v43 }
 0xd95   :  { %v1027_v50 = vmul.f32 %v1023_v44, %v3989_v29 }
 0xd97   :  { %v1030_v53 = vpack.c.bf16 %v1027_v50, %v1026_v47  ;;  %v983_v58 = vpop.permute.xlu0 %982 }
 0xd98   :  { %v1016_v11 = vsel %vm280_vm2, %v960_v14, %v983_v58 }
 0xd99   :  { %3347 = vmatpush3.bf16.msra.mxu1 %v1030_v53 }
 0xd9a   :  { %3348 = vmatprep.subr.bf16.mxu1 %v3747_v23 }
 0xd9b   :  { %v995_v59 = vpop.permute.xlu0 %994 }
 0xd9c   :  { %v1020_v22 = vsel %vm73_vm0, %v1016_v11, %v995_v59 }
 0xd9f   :  { %v985_v9 = vpop.permute.xlu0 %984 }
 0xda0   :  { %v1017_v0 = vsel %vm280_vm2, %v961_v57, %v985_v9 }
 0xda3   :  { %v997_v6 = vpop.permute.xlu0 %996 }
 0xda4   :  { %v1021_v7 = vsel %vm73_vm0, %v1017_v0, %v997_v6 }
 0xda5   :  { %v1025_v12 = vsel %vm289_vm3, %v1021_v7, %v1009_v10 }
 0xda6   :  { %v1029_v18 = vmul.f32 %v1025_v12, %v4008_v48 }
 0xda7   :  { %v1007_v29 = vpop.permute.xlu0 %1006 }
 0xda8   :  { %v1024_v13 = vsel %vm289_vm3, %v1020_v22, %v1007_v29 }
 0xda9   :  { %v1028_v19 = vmul.f32 %v1024_v13, %v4001_v45 }
 0xdab   :  { %v1031_v25 = vpack.c.bf16 %v1029_v18, %v1028_v19  ;;  %v930_v30 = vpop.permute.xlu0 %929  ;;  %v3592_v18 = vld [vmem:[%s4886_s5 + $0x10] sm:$0xff]   ;;  %v3593_v19 = vld [vmem:[%s4886_s5 + $0x18] sm:$0xff]  }
 0xdac   :  { %v932_v57 = vadd.f32 %v930_v30, %v4240_v62  ;;  %v933_v31 = vadd.f32 %v930_v30, %v4243_v1 }
 0xdad   :  { %3349 = vmatpush3.bf16.msra.mxu1 %v1031_v25 }
 0xdae   :  { %v1090_v14 = vmul.f32 %v932_v57, %v4014_v61  ;;  %v1091_v33 = vmul.f32 %v933_v31, %v4019_v2  ;;  %v1094_v35 = vmul.f32 %v932_v57, %v4036_v60  ;;  %v1095_v38 = vmul.f32 %v933_v31, %v4039_v17  ;;  %3354 = vmatprep.subr.bf16.mxu1 %v3747_v23 }
 0xdaf   :  { %v1096_v48 = vmul.f32 %v932_v57, %v4043_v21  ;;  %v1097_v45 = vmul.f32 %v933_v31, %v4045_v24  ;;  %v1092_v39 = vmul.f32 %v932_v57, %v4029_v52  ;;  %v1093_v62 = vmul.f32 %v933_v31, %v4032_v55 }
 0xdb0   :  { %3351 = vmatmul.mubr.msk.bf16.vlgmr.msra.gmra.mrb[20].mxu1 %vm73_vm0, %v1032_v46  ;;  %v1098_v1 = vpack.c.bf16 %v1091_v33, %v1090_v14  ;;  %v1100_v41 = vpack.c.bf16 %v1095_v38, %v1094_v35 }
 0xdb1   :  { %v1101_v28 = vpack.c.bf16 %v1097_v45, %v1096_v48  ;;  %v1099_v43 = vpack.c.bf16 %v1093_v62, %v1092_v39  ;;  %3362 = vmatprep.mubr.msk.bf16.mxu1 %vm3748_vm1, %v3747_v23 }
 0xdb2   :  { %1106 = vrot.lane.b32.xlu1 %v1098_v1, %s3751_s12 }
 0xdb6   :  { %1110 = vrot.lane.b32.xlu1 %v1100_v41, %s3751_s12  ;;  %v1216_v41 = vrot.slane %v4202_v26, %v4138_v56 }
 0xdba   :  { %1112 = vrot.lane.b32.xlu1 %v1101_v28, %s3751_s12 }
 0xe24   :  { %v1107_v44 = vpop.permute.xlu1 %1106 }
 0xe25   :  { %3355 = vmatpush3.bf16.msra.mxu1 %v1107_v44 }
 0xe26   :  { %3356 = vmatprep.subr.bf16.mxu1 %v3747_v23 }
 0xe83   :  { %v1070_v4 = vpop.f32.mrb[20].mxu1 }
 0xe84   :  { %v1071_v42 = vadd.f32 %v1070_v4, %v4054_v34  ;;  %v3352_v46 = vpop.f32.mrb[21].mxu1 }
 0xe85   :  { %v1073_v47 = vpop.f32.mrb[22].mxu1 }
 0xe86   :  { %v1074_v50 = vadd.f32 %v1073_v47, %v4059_v37  ;;  %v3353_v53 = vpop.f32.mrb[23].mxu1  ;;  %v1077_v58 = vsel %vm345_vm4, %v1071_v42, -inf  ;;  %v1111_v37 = vpop.permute.xlu1 %1110 }
 0xe87   :  { %1078 = vmax.xlane.f32.xlu0 %v1077_v58 }
 0xe88   :  { %v1080_v59 = vsel %vm345_vm4, %v1074_v50, -inf }
 0xe8a   :  { %v1113_v12 = vpop.permute.xlu1 %1112 }
 0xe8b   :  { %1081 = vmax.xlane.f32.xlu0 %v1080_v59 }
 0xea1   :  { %1108 = vrot.lane.b32.xlu0 %v1099_v43, %s3751_s12 }
 0xf14   :  { %v1079_v9 = vpop.xlane.xlu0 %1078 }
 0xf15   :  { %v1083_v0 = vsub.f32 %v1071_v42, %v1079_v9 }
 0xf17   :  { %v1085_v6 = vmul.f32 1.442695, %v1083_v0 }
 0xf18   :  { %v1082_v7 = vpop.xlane.xlu0 %1081 }
 0xf19   :  { %v1084_v10 = vsub.f32 %v1074_v50, %v1082_v7  ;;  %3656 = vpow2.f32 %v1085_v6 }
 0xf1b   :  { %v1087_v11 = vmul.f32 1.442695, %v1084_v10 }
 0xf1c   :  { %v1109_v34 = vpop.permute.xlu0 %1108 }
 0xf1d   :  { %3658 = vpow2.f32 %v1087_v11  ;;  %3357 = vmatpush3.bf16.msra.mxu1 %v1109_v34 }
 0xf1e   :  { %3358 = vmatprep.subr.bf16.mxu1 %v3747_v23 }
 0xf21   :  { %3359 = vmatpush3.bf16.msra.mxu1 %v1111_v37  ;;  %v3594_v37 = vld [vmem:[%s4887_s6 + $0x10] sm:$0xff]  }
 0xf22   :  { %3360 = vmatprep.subr.bf16.mxu1 %v3747_v23 }
 0xf23   :  { %v3657_v22 = vpop.eup %3656 }
 0xf25   :  { %3361 = vmatpush3.bf16.msra.mxu1 %v1113_v12  ;;  %v3595_v12 = vld [vmem:[%s4887_s6 + $0x18] sm:$0xff]  }
 0xf26   :  { %3378 = vmatprep.subr.bf16.mxu1 %v3747_v23 }
 0xf27   :  { %v3659_v29 = vpop.eup %3658 }
 0xf28   :  { %v1089_v13 = vpack.c.bf16 %v3659_v29, %v3657_v22 }
 0xf2a   :  { %3363 = vmatmul.mubr.msk.bf16.vlgmr.msra.gmra.mrb[24].mxu1 %vm345_vm4, %v1089_v13  ;;  %3375 = vmatmul.mubr.msk.bf16.vlgmr.msra.gmra.mrb[12].mxu0 %vm345_vm4, %v1089_v13 }
 0xf2b   :  { %3382 = vmatprep.mubr.msk.bf16.mxu1 %vm3748_vm1, %v3747_v23  ;;  %3410 = vmatprep.mubr.msk.bf16.mxu0 %vm3748_vm1, %v3747_v23 }
 0xf2c   :  { %3379 = vmatpush3.bf16.msra.mxu1 %v3592_v18 }
 0xf2d   :  { %3380 = vmatprep.subr.bf16.mxu1 %v3747_v23 }
 0xf30   :  { %3381 = vmatpush3.bf16.msra.mxu1 %v3593_v19 }
 0xf31   :  { %3386 = vmatprep.subr.bf16.mxu1 %v3747_v23 }
 0xffd   :  { %v1155_v25 = vpop.f32.mrb[24].mxu1  ;;  %v1196_v30 = vpop.f32.mrb[12].mxu0 }
 0xffe   :  { %3660 = vrcp.f32 %v1196_v30  ;;  %v3364_v57 = vpop.f32.mrb[25].mxu1  ;;  %v3376_v31 = vpop.f32.mrb[13].mxu0 }
 0xfff   :  { %v1158_v14 = vpop.f32.mrb[26].mxu1  ;;  %v1199_v33 = vpop.f32.mrb[14].mxu0  ;;  %v1304_v57 = vrot.slane %v4202_v26, %v4143_v20  ;;  %v3596_v26 = vld [vmem:[%s4888_s7 + $0x40] sm:$0xff]  }
0x1000   :  { %3662 = vrcp.f32 %v1199_v33  ;;  %v3365_v35 = vpop.f32.mrb[27].mxu1  ;;  %v3377_v38 = vpop.f32.mrb[15].mxu0  ;;  %3395 = vmatpush3.bf16.msra.mxu0 %v3596_v26 }
0x1001   :  { %3396 = vmatprep.subr.bf16.mxu0 %v3747_v23 }
0x1008   :  { %v3661_v48 = vpop.eup %3660 }
0x1009   :  { %v1205_v45 = vmul.f32 %v3661_v48, %v1155_v25 }
0x100a   :  { %v3663_v39 = vpop.eup %3662 }
0x100b   :  { %v1206_v62 = vmul.f32 %v3663_v39, %v1158_v14  ;;  %v4363_v14 = vld [vmem:[%s4890_s9 + $0x10] sm:$0xff] }
0x100c   :  { %v1310_v48 = vrot.slane %v4363_v14, %v3870_v36 }
0x100d   :  { %v1207_v1 = vpack.c.bf16 %v1206_v62, %v1205_v45 }
0x100f   :  { %3383 = vmatmul.mubr.msk.bf16.vlgmr.msra.gmra.mrb[28].mxu1 %vm73_vm0, %v1207_v1 }
0x1010   :  { %3390 = vmatprep.mubr.msk.bf16.mxu1 %vm3748_vm1, %v3747_v23  ;;  %3387 = vmatpush3.bf16.msra.mxu1 %v3594_v37 }
0x1011   :  { %3388 = vmatprep.subr.bf16.mxu1 %v3747_v23 }
0x1014   :  { %3389 = vmatpush3.bf16.msra.mxu1 %v3595_v12 }
0x1015   :  { %3414 = vmatprep.subr.bf16.mxu1 %v3747_v23 }
0x10e2   :  { %v1266_v28 = vpop.f32.mrb[28].mxu1 }
0x10e3   :  { %v1267_v43 = vadd.f32 %v1266_v28, %v1216_v41  ;;  %v3384_v44 = vpop.f32.mrb[29].mxu1  ;;  %v3598_v28 = vld [vmem:[%s4888_s7 + $0x50] sm:$0xff]  }
0x10e4   :  { %v1269_v4 = vpop.f32.mrb[30].mxu1  ;;  %v3600_v44 = vld [vmem:[%s4888_s7 + $0x60] sm:$0xff]  }
0x10e5   :  { %v4337_v42 = vadd.f32 %v1267_v43, %v4207_v51  ;;  %v1270_v46 = vadd.f32 %v1269_v4, %v1216_v41  ;;  %v3385_v47 = vpop.f32.mrb[31].mxu1  ;;  %v3597_v41 = vld [vmem:[%s4888_s7 + $0x48] sm:$0xff]   ;;  %v3599_v43 = vld [vmem:[%s4888_s7 + $0x58] sm:$0xff]  }
0x10e6   :  { %3397 = vmatpush3.bf16.msra.mxu0 %v3597_v41  ;;  %v3601_v4 = vld [vmem:[%s4888_s7 + $0x68] sm:$0xff]   ;;  %v3603_v47 = vld [vmem:[%s4888_s7 + $0x78] sm:$0xff]  }
0x10e7   :  { %v4340_v50 = vadd.f32 %v1270_v46, %v4210_v8  ;;  %v1275_v53 = vsel %vm73_vm0, %v4337_v42, 0.0  ;;  %3398 = vmatprep.subr.bf16.mxu0 %v3747_v23  ;;  %v3602_v46 = vld [vmem:[%s4888_s7 + $0x70] sm:$0xff]  }
0x10e8   :  { %1276 = vadd.xlane.f32.xlu1 %v1275_v53  ;;  %v1322_v53 = vrot.slane %v4185_v54, %v3875_v40 }
0x10e9   :  { %v1278_v58 = vsel %vm73_vm0, %v4340_v50, 0.0 }
0x10ea   :  { %1279 = vadd.xlane.f32.xlu0 %v1278_v58  ;;  %3399 = vmatpush3.bf16.msra.mxu0 %v3598_v28 }
0x10eb   :  { %3400 = vmatprep.subr.bf16.mxu0 %v3747_v23 }
0x10ee   :  { %3401 = vmatpush3.bf16.msra.mxu0 %v3599_v43 }
0x10ef   :  { %3402 = vmatprep.subr.bf16.mxu0 %v3747_v23 }
0x10f2   :  { %3403 = vmatpush3.bf16.msra.mxu0 %v3600_v44 }
0x10f3   :  { %3404 = vmatprep.subr.bf16.mxu0 %v3747_v23 }
0x10f6   :  { %3405 = vmatpush3.bf16.msra.mxu0 %v3601_v4 }
0x10f7   :  { %3406 = vmatprep.subr.bf16.mxu0 %v3747_v23 }
0x10fa   :  { %3407 = vmatpush3.bf16.msra.mxu0 %v3602_v46 }
0x10fb   :  { %3408 = vmatprep.subr.bf16.mxu0 %v3747_v23 }
0x10fe   :  { %3409 = vmatpush3.bf16.msra.mxu0 %v3603_v47 }
0x10ff   :  { %3442 = vmatprep.subr.bf16.mxu0 %v3747_v23 }
0x1175   :  { %v1277_v59 = vpop.xlane.xlu1 %1276 }
0x1176   :  { %v1281_v9 = vmul.f32 0.03125, %v1277_v59 }
0x1177   :  { %v1280_v0 = vpop.xlane.xlu0 %1279 }
0x1178   :  { %v1283_v6 = vsub.f32 %v4337_v42, %v1281_v9  ;;  %v1282_v51 = vmul.f32 0.03125, %v1280_v0 }
0x117a   :  { %v1284_v7 = vsub.f32 %v4340_v50, %v1282_v51  ;;  %v1285_v10 = vmul.f32 %v1283_v6, %v1283_v6 }
0x117c   :  { %v1287_v8 = vsel %vm73_vm0, %v1285_v10, 0.0  ;;  %v1286_v11 = vmul.f32 %v1284_v7, %v1284_v7 }
0x117d   :  { %1288 = vadd.xlane.f32.xlu1 %v1287_v8 }
0x117e   :  { %v1290_v34 = vsel %vm73_vm0, %v1286_v11, 0.0 }
0x1181   :  { %1291 = vadd.xlane.f32.xlu1 %v1290_v34 }
0x120a   :  { %v1289_v22 = vpop.xlane.xlu1 %1288 }
0x120b   :  { %v1293_v29 = vmul.f32 0.03125, %v1289_v22 }
0x120d   :  { %v1295_v13 = vadd.f32 1e-12, %v1293_v29 }
0x120e   :  { %v1292_v18 = vpop.xlane.xlu1 %1291 }
0x120f   :  { %3664 = vrsqrt.f32 %v1295_v13  ;;  %v1294_v19 = vmul.f32 0.03125, %v1292_v18 }
0x1211   :  { %v1296_v25 = vadd.f32 1e-12, %v1294_v19 }
0x1213   :  { %3666 = vrsqrt.f32 %v1296_v25 }
0x1219   :  { %v3665_v30 = vpop.eup %3664 }
0x121a   :  { %v1299_v31 = vmul.f32 %v3665_v30, %v1283_v6 }
0x121c   :  { %v1305_v35 = vmul.f32 %v1304_v57, %v1299_v31 }
0x121d   :  { %v3667_v33 = vpop.eup %3666 }
0x121e   :  { %v1300_v38 = vmul.f32 %v3667_v33, %v1284_v7  ;;  %v1311_v39 = vadd.f32 %v1310_v48, %v1305_v35 }
0x1220   :  { %v1306_v45 = vmul.f32 %v1304_v57, %v1300_v38  ;;  %v1418_v38 = vrot.slane %v4363_v14, %v3875_v40 }
0x1222   :  { %v1312_v62 = vadd.f32 %v1310_v48, %v1306_v45 }
0x1224   :  { %v1313_v1 = vpack.c.bf16 %v1312_v62, %v1311_v39 }
0x1226   :  { %3391 = vmatmul.mubr.msk.bf16.vlgmr.msra.gmra.mrb[32].mxu1 %vm73_vm0, %v1313_v1 }
0x1227   :  { %3418 = vmatprep.mubr.msk.bf16.mxu1 %vm3748_vm1, %v3747_v23 }
0x12f9   :  { %v1372_v58 = vpop.f32.mrb[32].mxu1 }
0x12fa   :  { %v1373_v59 = vadd.f32 %v1372_v58, %v1322_v53  ;;  %v3392_v9 = vpop.f32.mrb[33].mxu1 }
0x12fb   :  { %v1375_v0 = vpop.f32.mrb[34].mxu1 }
0x12fc   :  { %v1381_v6 = vmul.f32 %v1373_v59, %v1373_v59  ;;  %v1376_v51 = vadd.f32 %v1375_v0, %v1322_v53  ;;  %v3393_v7 = vpop.f32.mrb[35].mxu1  ;;  %v1379_v25 = vmul.f32 0.5, %v1373_v59 }
0x12fd   :  { %v1619_v7 = vrot.slane %v4363_v14, %v4111_v32 }
0x12fe   :  { %v1383_v10 = vmul.f32 %v1381_v6, %v1373_v59  ;;  %v1382_v8 = vmul.f32 %v1376_v51, %v1376_v51  ;;  %v1380_v30 = vmul.f32 0.5, %v1376_v51  ;;  %v3604_v6 = vld [vmem:[%s4885_s4 + $0x20] sm:$0xff]  }
0x12ff   :  { %3415 = vmatpush3.bf16.msra.mxu1 %v3604_v6 }
0x1300   :  { %v1385_v11 = vmul.f32 0.044715, %v1383_v10  ;;  %v1384_v34 = vmul.f32 %v1382_v8, %v1376_v51  ;;  %3416 = vmatprep.subr.bf16.mxu1 %v3747_v23 }
0x1302   :  { %v1387_v37 = vadd.f32 %v1385_v11, %v1373_v59  ;;  %v1386_v12 = vmul.f32 0.044715, %v1384_v34 }
0x1304   :  { %v1389_v22 = vmul.f32 0.7978846, %v1387_v37  ;;  %v1388_v29 = vadd.f32 %v1386_v12, %v1376_v51  ;;  %v3605_v51 = vld [vmem:[%s4885_s4 + $0x28] sm:$0xff]  }
0x1305   :  { %3417 = vmatpush3.bf16.msra.mxu1 %v3605_v51 }
0x1306   :  { %3668 = vtanh.f32 %v1389_v22  ;;  %v1390_v13 = vmul.f32 0.7978846, %v1388_v29  ;;  %3422 = vmatprep.subr.bf16.mxu1 %v3747_v23  ;;  %v1539_v22 = vrot.slane %v4363_v14, %v3883_v49 }
0x1308   :  { %3670 = vtanh.f32 %v1390_v13 }
0x1310   :  { %v3669_v18 = vpop.eup %3668 }
0x1311   :  { %v1393_v54 = vadd.f32 1.0, %v3669_v18 }
0x1312   :  { %v3671_v19 = vpop.eup %3670 }
0x1313   :  { %v1394_v57 = vadd.f32 1.0, %v3671_v19  ;;  %v1395_v31 = vmul.f32 %v1393_v54, %v1379_v25  ;;  %v1545_v25 = vrot.slane %v4363_v14, %v3859_v27 }
0x1315   :  { %v1396_v33 = vmul.f32 %v1394_v57, %v1380_v30 }
0x1317   :  { %v1397_v35 = vpack.c.bf16 %v1396_v33, %v1395_v31 }
0x1319   :  { %3411 = vmatmul.mubr.bf16.vlgmr.msra.gmra.mrb[16].mxu0 %v1397_v35 }
0x131a   :  { %3443 = vmatpush3.bf16.msra.mxu0 %v4071_v3  ;;  %3450 = vmatprep.mubr.msk.bf16.mxu0 %vm3748_vm1, %v3747_v23 }
0x131b   :  { %3444 = vmatprep.subr.bf16.mxu0 %v3747_v23 }
0x131e   :  { %3445 = vmatpush3.bf16.msra.mxu0 %v4076_v15 }
0x131f   :  { %3446 = vmatprep.subr.bf16.mxu0 %v3747_v23 }
0x1322   :  { %3447 = vmatpush3.bf16.msra.mxu0 %v4084_v16 }
0x1323   :  { %3448 = vmatprep.subr.bf16.mxu0 %v3747_v23 }
0x1326   :  { %3449 = vmatpush3.bf16.msra.mxu0 %v4090_v5 }
0x1327   :  { %3470 = vmatprep.subr.bf16.mxu0 %v3747_v23 }
0x13ec   :  { %v1501_v48 = vpop.f32.mrb[16].mxu0 }
0x13ed   :  { %v1502_v45 = vadd.f32 %v1501_v48, %v1418_v38  ;;  %v3412_v39 = vpop.f32.mrb[17].mxu0 }
0x13ee   :  { %v1504_v62 = vpop.f32.mrb[18].mxu0 }
0x13ef   :  { %v4417_v1 = vadd.f32 %v1502_v45, %v4337_v42  ;;  %v1505_v26 = vadd.f32 %v1504_v62, %v1418_v38  ;;  %v3413_v41 = vpop.f32.mrb[19].mxu0  ;;  %v1613_v38 = vrot.slane %v4363_v14, %v3904_v63 }
0x13f1   :  { %v4420_v28 = vadd.f32 %v1505_v26, %v4340_v50  ;;  %v1510_v43 = vsel %vm73_vm0, %v4417_v1, 0.0 }
0x13f2   :  { %1511 = vadd.xlane.f32.xlu0 %v1510_v43 }
0x13f3   :  { %v1513_v44 = vsel %vm73_vm0, %v4420_v28, 0.0 }
0x13f4   :  { %1514 = vadd.xlane.f32.xlu1 %v1513_v44 }
0x147f   :  { %v1512_v4 = vpop.xlane.xlu0 %1511 }
0x1480   :  { %v1516_v46 = vmul.f32 0.03125, %v1512_v4 }
0x1481   :  { %v1515_v47 = vpop.xlane.xlu1 %1514 }
0x1482   :  { %v1518_v53 = vsub.f32 %v4417_v1, %v1516_v46  ;;  %v1517_v42 = vmul.f32 0.03125, %v1515_v47 }
0x1484   :  { %v1519_v58 = vsub.f32 %v4420_v28, %v1517_v42  ;;  %v1520_v59 = vmul.f32 %v1518_v53, %v1518_v53 }
0x1486   :  { %v1522_v50 = vsel %vm73_vm0, %v1520_v59, 0.0  ;;  %v1521_v9 = vmul.f32 %v1519_v58, %v1519_v58 }
0x1487   :  { %1523 = vadd.xlane.f32.xlu0 %v1522_v50  ;;  %v1629_v50 = vrot.slane %v4363_v14, %v4138_v56 }
0x1488   :  { %v1525_v0 = vsel %vm73_vm0, %v1521_v9, 0.0 }
0x1489   :  { %1526 = vadd.xlane.f32.xlu1 %v1525_v0 }
0x149d   :  { %1621 = vrot.lane.b32.xlu0 %v1619_v7, %s3749_s30 }
0x1514   :  { %v1524_v10 = vpop.xlane.xlu0 %1523 }
0x1515   :  { %v1528_v8 = vmul.f32 0.03125, %v1524_v10 }
0x1516   :  { %v1527_v11 = vpop.xlane.xlu1 %1526 }
0x1517   :  { %v1530_v34 = vadd.f32 1e-12, %v1528_v8  ;;  %v1529_v37 = vmul.f32 0.03125, %v1527_v11 }
0x1518   :  { %v1622_v35 = vpop.permute.xlu0 %1621 }
0x1519   :  { %3672 = vrsqrt.f32 %v1530_v34  ;;  %v1531_v12 = vadd.f32 1e-12, %v1529_v37 }
0x151b   :  { %3674 = vrsqrt.f32 %v1531_v12 }
0x1523   :  { %v3673_v29 = vpop.eup %3672 }
0x1524   :  { %v1534_v13 = vmul.f32 %v3673_v29, %v1518_v53  ;;  %v4490_v29 = vld [vmem:[%s4883_s2] sm:$0xff] }
0x1525   :  { %v3675_v18 = vpop.eup %3674 }
0x1526   :  { %v1540_v54 = vmul.f32 %v1539_v22, %v1534_v13  ;;  %v1535_v19 = vmul.f32 %v3675_v18, %v1519_v58  ;;  %v4496_v18 = vld [vmem:[%s4883_s2 + $0x8] sm:$0xff] }
0x1528   :  { %v1541_v30 = vmul.f32 %v1539_v22, %v1535_v19  ;;  %v1546_v57 = vadd.f32 %v1545_v25, %v1540_v54 }
0x152a   :  { %v1547_v31 = vadd.f32 %v1545_v25, %v1541_v30 }
0x152c   :  { %v1548_v33 = vpack.c.bf16 %v1547_v31, %v1546_v57 }
0x152e   :  { %3419 = vmatmul.mubr.msk.bf16.vlgmr.msra.gmra.mrb[36].mxu1 %vm73_vm0, %v1548_v33 }
0x152f   :  { %3426 = vmatprep.mubr.msk.bf16.mxu1 %vm3748_vm1, %v3747_v23 }
0x1601   :  { %v4450_v48 = vpop.f32.mrb[36].mxu1 }
0x1602   :  { %v1624_v45 = vadd.f32 %v1622_v35, %v4450_v48  ;;  %v3420_v39 = vpop.f32.mrb[37].mxu1  ;;  %v4456_v26 = vadd.f32 %v1613_v38, %v4450_v48 }
0x1603   :  { %v4453_v62 = vpop.f32.mrb[38].mxu1 }
0x1604   :  { %v4459_v41 = vadd.f32 %v1613_v38, %v4453_v62  ;;  %1638 = vrot.lane.b32.xlu1 %v1624_v45, %s3750_s11  ;;  %v3421_v43 = vpop.f32.mrb[39].mxu1  ;;  %v1625_v44 = vadd.f32 %v1622_v35, %v4453_v62 }
0x1606   :  { %v1734_v4 = vpack.c.bf16 %v4459_v41, %v4456_v26  ;;  %v4544_v26 = vld [vmem:[%s4882_s1 + $0x8] sm:$0xff] }
0x1608   :  { %1640 = vrot.lane.b32.xlu1 %v1625_v44, %s3750_s11 }
0x1676   :  { %v1639_v46 = vpop.permute.xlu1 %1638 }
0x1677   :  { %1644 = vxpose.xlu0.b32.start [1/2] (short) (narrow) %v1639_v46, 32 }
0x167a   :  { %v1641_v47 = vpop.permute.xlu1 %1640 }
0x167b   :  { %1645 = vxpose.xlu0.b32.end [2/2] (short) (narrow) %v1641_v47, 32  ;;  %v4509_v47 = vld [vmem:[%s4883_s2 + $0x10] sm:$0xff] }
0x16f7   :  { %v1660_v53 = vpop.trf.xlu0 }
0x16f8   :  { %1680 = vrot.lane.b32.xlu1 %v1660_v53, %s3752_s13 }
0x16fb   :  { %v1661_v42 = vpop.trf.xlu0 }
0x16fc   :  { %1692 = vrot.lane.b32.xlu1 %v1660_v53, %s3749_s30 }
0x16ff   :  { %v1662_v58 = vpop.trf.xlu0 }
0x1700   :  { %1704 = vrot.lane.b32.xlu1 %v1660_v53, %s3753_s14 }
0x1703   :  { %v1663_v59 = vpop.trf.xlu0 }
0x1704   :  { %1682 = vrot.lane.b32.xlu1 %v1661_v42, %s3752_s13  ;;  %1698 = vrot.lane.b32.xlu0 %v1663_v59, %s3749_s30 }
0x1708   :  { %1694 = vrot.lane.b32.xlu1 %v1661_v42, %s3749_s30 }
0x170c   :  { %1706 = vrot.lane.b32.xlu1 %v1661_v42, %s3753_s14 }
0x1710   :  { %1684 = vrot.lane.b32.xlu1 %v1662_v58, %s3752_s13 }
0x1714   :  { %1696 = vrot.lane.b32.xlu1 %v1662_v58, %s3749_s30 }
0x1718   :  { %1686 = vrot.lane.b32.xlu1 %v1663_v59, %s3752_s13 }
0x171c   :  { %1708 = vrot.lane.b32.xlu1 %v1662_v58, %s3753_s14 }
0x1720   :  { %1710 = vrot.lane.b32.xlu1 %v1663_v59, %s3753_s14 }
0x1724   :  { %1631 = vrot.lane.b32.xlu1 %v1629_v50, %s3751_s12 }
0x176a   :  { %v1681_v9 = vpop.permute.xlu1 %1680 }
0x176b   :  { %v1716_v10 = vsel %vm280_vm2, %v1660_v53, %v1681_v9 }
0x176e   :  { %v1693_v0 = vpop.permute.xlu1 %1692 }
0x176f   :  { %v1720_v8 = vsel %vm73_vm0, %v1716_v10, %v1693_v0 }
0x1772   :  { %v1705_v6 = vpop.permute.xlu1 %1704 }
0x1773   :  { %v1724_v11 = vsel %vm289_vm3, %v1720_v8, %v1705_v6 }
0x1774   :  { %v1728_v13 = vmul.f32 %v4490_v29, %v1724_v11 }
0x1776   :  { %v1683_v51 = vpop.permute.xlu1 %1682  ;;  %v1699_v35 = vpop.permute.xlu0 %1698 }
0x1777   :  { %v1717_v34 = vsel %vm280_vm2, %v1661_v42, %v1683_v51  ;;  %v4515_v42 = vld [vmem:[%s4883_s2 + $0x18] sm:$0xff] }
0x177a   :  { %v1695_v7 = vpop.permute.xlu1 %1694 }
0x177b   :  { %v1721_v37 = vsel %vm73_vm0, %v1717_v34, %v1695_v7 }
0x177e   :  { %v1707_v12 = vpop.permute.xlu1 %1706 }
0x177f   :  { %v1725_v22 = vsel %vm289_vm3, %v1721_v37, %v1707_v12 }
0x1780   :  { %v1729_v54 = vmul.f32 %v4496_v18, %v1725_v22 }
0x1782   :  { %v1732_v19 = vpack.c.bf16 %v1729_v54, %v1728_v13  ;;  %v1685_v25 = vpop.permute.xlu1 %1684  ;;  %v4538_v54 = vld [vmem:[%s4882_s1] sm:$0xff] }
0x1783   :  { %v1718_v33 = vsel %vm280_vm2, %v1662_v58, %v1685_v25 }
0x1784   :  { %3423 = vmatpush3.bf16.msra.mxu1 %v1732_v19 }
0x1785   :  { %3424 = vmatprep.subr.bf16.mxu1 %v3747_v23 }
0x1786   :  { %v1697_v30 = vpop.permute.xlu1 %1696 }
0x1787   :  { %v1722_v45 = vsel %vm73_vm0, %v1718_v33, %v1697_v30 }
0x178a   :  { %v1687_v57 = vpop.permute.xlu1 %1686 }
0x178b   :  { %v1719_v38 = vsel %vm280_vm2, %v1663_v59, %v1687_v57 }
0x178c   :  { %v1723_v43 = vsel %vm73_vm0, %v1719_v38, %v1699_v35 }
0x178e   :  { %v1709_v31 = vpop.permute.xlu1 %1708 }
0x178f   :  { %v1726_v39 = vsel %vm289_vm3, %v1722_v45, %v1709_v31 }
0x1790   :  { %v1730_v53 = vmul.f32 %v4509_v47, %v1726_v39 }
0x1792   :  { %v1711_v44 = vpop.permute.xlu1 %1710 }
0x1793   :  { %v1727_v46 = vsel %vm289_vm3, %v1723_v43, %v1711_v44 }
0x1794   :  { %v1731_v58 = vmul.f32 %v4515_v42, %v1727_v46 }
0x1796   :  { %v1733_v59 = vpack.c.bf16 %v1731_v58, %v1730_v53  ;;  %v1632_v50 = vpop.permute.xlu1 %1631 }
0x1797   :  { %v1634_v9 = vadd.f32 %v1632_v50, %v4450_v48  ;;  %v1635_v0 = vadd.f32 %v1632_v50, %v4453_v62 }
0x1798   :  { %3425 = vmatpush3.bf16.msra.mxu1 %v1733_v59 }
0x1799   :  { %v1792_v6 = vmul.f32 %v1634_v9, %v4014_v61  ;;  %v1793_v51 = vmul.f32 %v1635_v0, %v4019_v2  ;;  %v1794_v7 = vmul.f32 %v1634_v9, %v4029_v52  ;;  %v1795_v10 = vmul.f32 %v1635_v0, %v4032_v55  ;;  %3430 = vmatprep.subr.bf16.mxu1 %v3747_v23 }
0x179a   :  { %v1796_v8 = vmul.f32 %v1634_v9, %v4036_v60  ;;  %v1797_v11 = vmul.f32 %v1635_v0, %v4039_v17  ;;  %v1798_v34 = vmul.f32 %v1634_v9, %v4043_v21  ;;  %v1799_v48 = vmul.f32 %v1635_v0, %v4045_v24  ;;  %v3606_v0 = vld [vmem:[%s4886_s5 + $0x20] sm:$0xff]  }
0x179b   :  { %3427 = vmatmul.mubr.msk.bf16.vlgmr.msra.gmra.mrb[40].mxu1 %vm73_vm0, %v1734_v4  ;;  %v1800_v62 = vpack.c.bf16 %v1793_v51, %v1792_v6  ;;  %v1801_v37 = vpack.c.bf16 %v1795_v10, %v1794_v7  ;;  %v3607_v6 = vld [vmem:[%s4886_s5 + $0x28] sm:$0xff]  }
0x179c   :  { %v1802_v12 = vpack.c.bf16 %v1797_v11, %v1796_v8  ;;  %v1803_v22 = vpack.c.bf16 %v1799_v48, %v1798_v34  ;;  %3438 = vmatprep.mubr.msk.bf16.mxu1 %vm3748_vm1, %v3747_v23 }
0x186e   :  { %v1772_v13 = vpop.f32.mrb[40].mxu1 }
0x186f   :  { %v1773_v19 = vadd.f32 %v4538_v54, %v1772_v13  ;;  %v3428_v25 = vpop.f32.mrb[41].mxu1 }
0x1870   :  { %v1775_v30 = vpop.f32.mrb[42].mxu1  ;;  %v1918_v25 = vrot.slane %v4363_v14, %v4143_v20 }
0x1871   :  { %v1776_v41 = vadd.f32 %v4544_v26, %v1775_v30  ;;  %v3429_v4 = vpop.f32.mrb[43].mxu1  ;;  %v1779_v57 = vsel %vm345_vm4, %v1773_v19, -inf }
0x1872   :  { %1780 = vmax.xlane.f32.xlu1 %v1779_v57 }
0x1873   :  { %v1782_v31 = vsel %vm345_vm4, %v1776_v41, -inf }
0x1874   :  { %1783 = vmax.xlane.f32.xlu0 %v1782_v31 }
0x1883   :  { %1808 = vrot.lane.b32.xlu1 %v1800_v62, %s3751_s12 }
0x1887   :  { %1810 = vrot.lane.b32.xlu1 %v1801_v37, %s3751_s12 }
0x188b   :  { %1812 = vrot.lane.b32.xlu1 %v1802_v12, %s3751_s12 }
0x188f   :  { %1814 = vrot.lane.b32.xlu1 %v1803_v22, %s3751_s12 }
0x18ff   :  { %v1781_v33 = vpop.xlane.xlu1 %1780 }
0x1900   :  { %v1785_v35 = vsub.f32 %v1773_v19, %v1781_v33 }
0x1901   :  { %v1784_v38 = vpop.xlane.xlu0 %1783 }
0x1902   :  { %v1787_v45 = vmul.f32 1.442695, %v1785_v35  ;;  %v1786_v39 = vsub.f32 %v1776_v41, %v1784_v38 }
0x1903   :  { %v1809_v43 = vpop.permute.xlu1 %1808 }
0x1904   :  { %v1789_v44 = vmul.f32 1.442695, %v1786_v39  ;;  %3431 = vmatpush3.bf16.msra.mxu1 %v1809_v43  ;;  %3676 = vpow2.f32 %v1787_v45 }
0x1905   :  { %3432 = vmatprep.subr.bf16.mxu1 %v3747_v23 }
0x1906   :  { %3678 = vpow2.f32 %v1789_v44 }
0x1907   :  { %v1811_v46 = vpop.permute.xlu1 %1810 }
0x1908   :  { %3433 = vmatpush3.bf16.msra.mxu1 %v1811_v46 }
0x1909   :  { %3434 = vmatprep.subr.bf16.mxu1 %v3747_v23 }
0x190b   :  { %v1813_v53 = vpop.permute.xlu1 %1812 }
0x190c   :  { %3435 = vmatpush3.bf16.msra.mxu1 %v1813_v53 }
0x190d   :  { %3436 = vmatprep.subr.bf16.mxu1 %v3747_v23 }
0x190e   :  { %v3677_v58 = vpop.eup %3676 }
0x190f   :  { %v1815_v59 = vpop.permute.xlu1 %1814 }
0x1910   :  { %v3679_v50 = vpop.eup %3678  ;;  %3437 = vmatpush3.bf16.msra.mxu1 %v1815_v59 }
0x1911   :  { %v1791_v9 = vpack.c.bf16 %v3679_v50, %v3677_v58  ;;  %3454 = vmatprep.subr.bf16.mxu1 %v3747_v23 }
0x1913   :  { %3439 = vmatmul.mubr.msk.bf16.vlgmr.msra.gmra.mrb[44].mxu1 %vm345_vm4, %v1791_v9  ;;  %3451 = vmatmul.mubr.msk.bf16.vlgmr.msra.gmra.mrb[20].mxu0 %vm345_vm4, %v1791_v9  ;;  %v3608_v9 = vld [vmem:[%s4887_s6 + $0x20] sm:$0xff]  }
0x1914   :  { %3458 = vmatprep.mubr.msk.bf16.mxu1 %vm3748_vm1, %v3747_v23  ;;  %3486 = vmatprep.mubr.msk.bf16.mxu0 %vm3748_vm1, %v3747_v23 }
0x1915   :  { %3455 = vmatpush3.bf16.msra.mxu1 %v3606_v0  ;;  %v3609_v0 = vld [vmem:[%s4887_s6 + $0x28] sm:$0xff]  }
0x1916   :  { %3456 = vmatprep.subr.bf16.mxu1 %v3747_v23 }
0x1919   :  { %3457 = vmatpush3.bf16.msra.mxu1 %v3607_v6 }
0x191a   :  { %3462 = vmatprep.subr.bf16.mxu1 %v3747_v23 }
0x19e6   :  { %v1857_v51 = vpop.f32.mrb[44].mxu1  ;;  %v1898_v7 = vpop.f32.mrb[20].mxu0 }
0x19e7   :  { %3680 = vrcp.f32 %v1898_v7  ;;  %v3440_v10 = vpop.f32.mrb[45].mxu1  ;;  %v3452_v8 = vpop.f32.mrb[21].mxu0 }
0x19e8   :  { %v1860_v11 = vpop.f32.mrb[46].mxu1  ;;  %v1901_v34 = vpop.f32.mrb[22].mxu0 }
0x19e9   :  { %3682 = vrcp.f32 %v1901_v34  ;;  %v3441_v48 = vpop.f32.mrb[47].mxu1  ;;  %v3453_v62 = vpop.f32.mrb[23].mxu0  ;;  %v4601_v34 = vld [vmem:[%s4890_s9 + $0x18] sm:$0xff] }
0x19ea   :  { %v2006_v62 = vrot.slane %v4601_v34, %v3870_v36 }
0x19f1   :  { %v3681_v37 = vpop.eup %3680 }
0x19f2   :  { %v1907_v12 = vmul.f32 %v3681_v37, %v1857_v51 }
0x19f3   :  { %v3683_v22 = vpop.eup %3682 }
0x19f4   :  { %v1908_v13 = vmul.f32 %v3683_v22, %v1860_v11 }
0x19f6   :  { %v1909_v19 = vpack.c.bf16 %v1908_v13, %v1907_v12 }
0x19f8   :  { %3459 = vmatmul.mubr.msk.bf16.vlgmr.msra.gmra.mrb[48].mxu1 %vm73_vm0, %v1909_v19  ;;  %v2012_v19 = vrot.slane %v4601_v34, %v3875_v40 }
0x19f9   :  { %3466 = vmatprep.mubr.msk.bf16.mxu1 %vm3748_vm1, %v3747_v23  ;;  %3463 = vmatpush3.bf16.msra.mxu1 %v3608_v9 }
0x19fa   :  { %3464 = vmatprep.subr.bf16.mxu1 %v3747_v23 }
0x19fd   :  { %3465 = vmatpush3.bf16.msra.mxu1 %v3609_v0 }
0x19fe   :  { %3490 = vmatprep.subr.bf16.mxu1 %v3747_v23 }
0x1acb   :  { %v1968_v30 = vpop.f32.mrb[48].mxu1 }
0x1acc   :  { %v1969_v41 = vadd.f32 %v1968_v30, %v1918_v25  ;;  %v3460_v4 = vpop.f32.mrb[49].mxu1 }
0x1acd   :  { %v1971_v57 = vpop.f32.mrb[50].mxu1 }
0x1ace   :  { %v4577_v31 = vadd.f32 %v1969_v41, %v4417_v1  ;;  %v1972_v33 = vadd.f32 %v1971_v57, %v1918_v25  ;;  %v3461_v35 = vpop.f32.mrb[51].mxu1  ;;  %v3610_v57 = vld [vmem:[%s4888_s7 + $0x80] sm:$0xff]  }
0x1acf   :  { %3471 = vmatpush3.bf16.msra.mxu0 %v3610_v57  ;;  %v3612_v35 = vld [vmem:[%s4888_s7 + $0x90] sm:$0xff]  }
0x1ad0   :  { %v4580_v38 = vadd.f32 %v1972_v33, %v4420_v28  ;;  %v1977_v45 = vsel %vm73_vm0, %v4577_v31, 0.0  ;;  %3472 = vmatprep.subr.bf16.mxu0 %v3747_v23  ;;  %v3611_v33 = vld [vmem:[%s4888_s7 + $0x88] sm:$0xff]  }
0x1ad1   :  { %1978 = vadd.xlane.f32.xlu1 %v1977_v45  ;;  %v3613_v45 = vld [vmem:[%s4888_s7 + $0x98] sm:$0xff]  }
0x1ad2   :  { %v1980_v39 = vsel %vm73_vm0, %v4580_v38, 0.0 }
0x1ad3   :  { %1981 = vadd.xlane.f32.xlu0 %v1980_v39  ;;  %3473 = vmatpush3.bf16.msra.mxu0 %v3611_v33  ;;  %v3614_v39 = vld [vmem:[%s4888_s7 + $0xa0] sm:$0xff]  }
0x1ad4   :  { %3474 = vmatprep.subr.bf16.mxu0 %v3747_v23 }
0x1ad7   :  { %3475 = vmatpush3.bf16.msra.mxu0 %v3612_v35 }
0x1ad8   :  { %3476 = vmatprep.subr.bf16.mxu0 %v3747_v23 }
0x1adb   :  { %3477 = vmatpush3.bf16.msra.mxu0 %v3613_v45 }
0x1adc   :  { %3478 = vmatprep.subr.bf16.mxu0 %v3747_v23 }
0x1adf   :  { %3479 = vmatpush3.bf16.msra.mxu0 %v3614_v39 }
0x1ae0   :  { %3480 = vmatprep.subr.bf16.mxu0 %v3747_v23 }
0x1b5e   :  { %v1979_v14 = vpop.xlane.xlu1 %1978 }
0x1b5f   :  { %v1983_v43 = vmul.f32 0.03125, %v1979_v14  ;;  %v3615_v14 = vld [vmem:[%s4888_s7 + $0xa8] sm:$0xff]  }
0x1b60   :  { %v1982_v44 = vpop.xlane.xlu0 %1981  ;;  %3481 = vmatpush3.bf16.msra.mxu0 %v3615_v14 }
0x1b61   :  { %v1985_v46 = vsub.f32 %v4577_v31, %v1983_v43  ;;  %v1984_v1 = vmul.f32 0.03125, %v1982_v44  ;;  %v3616_v43 = vld [vmem:[%s4888_s7 + $0xb0] sm:$0xff]   ;;  %3482 = vmatprep.subr.bf16.mxu0 %v3747_v23  ;;  %v3617_v44 = vld [vmem:[%s4888_s7 + $0xb8] sm:$0xff]  }
0x1b63   :  { %v1986_v53 = vsub.f32 %v4580_v38, %v1984_v1  ;;  %v1987_v58 = vmul.f32 %v1985_v46, %v1985_v46 }
0x1b64   :  { %3483 = vmatpush3.bf16.msra.mxu0 %v3616_v43 }
0x1b65   :  { %v1989_v28 = vsel %vm73_vm0, %v1987_v58, 0.0  ;;  %v1988_v59 = vmul.f32 %v1986_v53, %v1986_v53  ;;  %3484 = vmatprep.subr.bf16.mxu0 %v3747_v23 }
0x1b66   :  { %1990 = vadd.xlane.f32.xlu0 %v1989_v28 }
0x1b67   :  { %v1992_v50 = vsel %vm73_vm0, %v1988_v59, 0.0 }
0x1b68   :  { %3485 = vmatpush3.bf16.msra.mxu0 %v3617_v44 }
0x1b69   :  { %3518 = vmatprep.subr.bf16.mxu0 %v3747_v23 }
0x1b6a   :  { %1993 = vadd.xlane.f32.xlu0 %v1992_v50 }
0x1bf3   :  { %v1991_v6 = vpop.xlane.xlu0 %1990 }
0x1bf4   :  { %v1995_v51 = vmul.f32 0.03125, %v1991_v6 }
0x1bf6   :  { %v1997_v7 = vadd.f32 1e-12, %v1995_v51 }
0x1bf7   :  { %v1994_v10 = vpop.xlane.xlu0 %1993 }
0x1bf8   :  { %3684 = vrsqrt.f32 %v1997_v7  ;;  %v1996_v8 = vmul.f32 0.03125, %v1994_v10 }
0x1bfa   :  { %v1998_v11 = vadd.f32 1e-12, %v1996_v8 }
0x1bfc   :  { %3686 = vrsqrt.f32 %v1998_v11 }
0x1c02   :  { %v3685_v48 = vpop.eup %3684 }
0x1c03   :  { %v2001_v37 = vmul.f32 %v3685_v48, %v1985_v46  ;;  %v4645_v46 = vld [vmem:[%s4889_s8] sm:$0xf] }
0x1c04   :  { %v2024_v1 = vrot.slane %v4645_v46, %v3883_v49 }
0x1c05   :  { %v2007_v22 = vmul.f32 %v2006_v62, %v2001_v37 }
0x1c06   :  { %v3687_v12 = vpop.eup %3686 }
0x1c07   :  { %v2002_v13 = vmul.f32 %v3687_v12, %v1986_v53  ;;  %v2013_v30 = vadd.f32 %v2012_v19, %v2007_v22 }
0x1c09   :  { %v2008_v25 = vmul.f32 %v2006_v62, %v2002_v13 }
0x1c0b   :  { %v2014_v41 = vadd.f32 %v2012_v19, %v2008_v25 }
0x1c0d   :  { %v2015_v4 = vpack.c.bf16 %v2014_v41, %v2013_v30 }
0x1c0f   :  { %3467 = vmatmul.mubr.msk.bf16.vlgmr.msra.gmra.mrb[52].mxu1 %vm73_vm0, %v2015_v4 }
0x1c10   :  { %3494 = vmatprep.mubr.msk.bf16.mxu1 %vm3748_vm1, %v3747_v23 }
0x1ce2   :  { %v2074_v53 = vpop.f32.mrb[52].mxu1 }
0x1ce3   :  { %v2075_v58 = vadd.f32 %v2074_v53, %v2024_v1  ;;  %v3468_v28 = vpop.f32.mrb[53].mxu1 }
0x1ce4   :  { %v2077_v59 = vpop.f32.mrb[54].mxu1 }
0x1ce5   :  { %v2083_v50 = vmul.f32 %v2075_v58, %v2075_v58  ;;  %v2078_v9 = vadd.f32 %v2077_v59, %v2024_v1  ;;  %v3469_v0 = vpop.f32.mrb[55].mxu1  ;;  %v2081_v19 = vmul.f32 0.5, %v2075_v58 }
0x1ce7   :  { %v2085_v6 = vmul.f32 %v2083_v50, %v2075_v58  ;;  %v2084_v51 = vmul.f32 %v2078_v9, %v2078_v9  ;;  %v2082_v25 = vmul.f32 0.5, %v2078_v9 }
0x1ce9   :  { %v2087_v7 = vmul.f32 0.044715, %v2085_v6  ;;  %v2086_v10 = vmul.f32 %v2084_v51, %v2078_v9  ;;  %v3618_v6 = vld [vmem:[%s4885_s4 + $0x30] sm:$0xff]   ;;  %v3619_v51 = vld [vmem:[%s4885_s4 + $0x38] sm:$0xff]  }
0x1cea   :  { %3491 = vmatpush3.bf16.msra.mxu1 %v3618_v6 }
0x1ceb   :  { %v2089_v8 = vadd.f32 %v2087_v7, %v2075_v58  ;;  %v2088_v11 = vmul.f32 0.044715, %v2086_v10  ;;  %3492 = vmatprep.subr.bf16.mxu1 %v3747_v23  ;;  %v2321_v7 = vrot.slane %v4601_v34, %v4138_v56  ;;  %v2247_v56 = vrot.slane %v4601_v34, %v3904_v63 }
0x1ced   :  { %v2091_v48 = vmul.f32 0.7978846, %v2089_v8  ;;  %v2090_v62 = vadd.f32 %v2088_v11, %v2078_v9 }
0x1cee   :  { %3493 = vmatpush3.bf16.msra.mxu1 %v3619_v51 }
0x1cef   :  { %3688 = vtanh.f32 %v2091_v48  ;;  %v2092_v37 = vmul.f32 0.7978846, %v2090_v62  ;;  %3498 = vmatprep.subr.bf16.mxu1 %v3747_v23 }
0x1cf1   :  { %3690 = vtanh.f32 %v2092_v37 }
0x1cf9   :  { %v3689_v12 = vpop.eup %3688 }
0x1cfa   :  { %v2095_v22 = vadd.f32 1.0, %v3689_v12 }
0x1cfb   :  { %v3691_v13 = vpop.eup %3690 }
0x1cfc   :  { %v2096_v30 = vadd.f32 1.0, %v3691_v13  ;;  %v2097_v41 = vmul.f32 %v2095_v22, %v2081_v19  ;;  %v2241_v22 = vrot.slane %v4601_v34, %v3859_v27 }
0x1cfe   :  { %v2098_v4 = vmul.f32 %v2096_v30, %v2082_v25 }
0x1d00   :  { %v2099_v57 = vpack.c.bf16 %v2098_v4, %v2097_v41 }
0x1d02   :  { %3487 = vmatmul.mubr.bf16.vlgmr.msra.gmra.mrb[24].mxu0 %v2099_v57 }
0x1d03   :  { %3519 = vmatpush3.bf16.msra.mxu0 %v4071_v3  ;;  %3526 = vmatprep.mubr.msk.bf16.mxu0 %vm3748_vm1, %v3747_v23  ;;  %v2120_v3 = vrot.slane %v4601_v34, %v3883_v49 }
0x1d04   :  { %3520 = vmatprep.subr.bf16.mxu0 %v3747_v23 }
0x1d07   :  { %3521 = vmatpush3.bf16.msra.mxu0 %v4076_v15 }
0x1d08   :  { %3522 = vmatprep.subr.bf16.mxu0 %v3747_v23 }
0x1d0b   :  { %3523 = vmatpush3.bf16.msra.mxu0 %v4084_v16 }
0x1d0c   :  { %3524 = vmatprep.subr.bf16.mxu0 %v3747_v23 }
0x1d0f   :  { %3525 = vmatpush3.bf16.msra.mxu0 %v4090_v5 }
0x1d10   :  { %3546 = vmatprep.subr.bf16.mxu0 %v3747_v23 }
0x1dd5   :  { %v2203_v33 = vpop.f32.mrb[24].mxu0 }
0x1dd6   :  { %v2204_v35 = vadd.f32 %v2203_v33, %v2120_v3  ;;  %v3488_v45 = vpop.f32.mrb[25].mxu0 }
0x1dd7   :  { %v2206_v39 = vpop.f32.mrb[26].mxu0 }
0x1dd8   :  { %v4662_v14 = vadd.f32 %v2204_v35, %v4577_v31  ;;  %v2207_v15 = vadd.f32 %v2206_v39, %v2120_v3  ;;  %v3489_v43 = vpop.f32.mrb[27].mxu0  ;;  %v2315_v35 = vrot.slane %v4601_v34, %v4111_v32 }
0x1dda   :  { %v4665_v16 = vadd.f32 %v2207_v15, %v4580_v38  ;;  %v2212_v5 = vsel %vm73_vm0, %v4662_v14, 0.0 }
0x1ddb   :  { %2213 = vadd.xlane.f32.xlu0 %v2212_v5 }
0x1ddc   :  { %v2215_v44 = vsel %vm73_vm0, %v4665_v16, 0.0 }
0x1ddf   :  { %2216 = vadd.xlane.f32.xlu0 %v2215_v44 }
0x1e68   :  { %v2214_v1 = vpop.xlane.xlu0 %2213 }
0x1e69   :  { %v2218_v53 = vmul.f32 0.03125, %v2214_v1 }
0x1e6b   :  { %v2220_v58 = vsub.f32 %v4662_v14, %v2218_v53 }
0x1e6c   :  { %v2217_v28 = vpop.xlane.xlu0 %2216 }
0x1e6d   :  { %v2219_v31 = vmul.f32 0.03125, %v2217_v28  ;;  %v2222_v59 = vmul.f32 %v2220_v58, %v2220_v58 }
0x1e6f   :  { %v2221_v50 = vsub.f32 %v4665_v16, %v2219_v31  ;;  %v2224_v38 = vsel %vm73_vm0, %v2222_v59, 0.0 }
0x1e70   :  { %2225 = vadd.xlane.f32.xlu0 %v2224_v38 }
0x1e71   :  { %v2223_v9 = vmul.f32 %v2221_v50, %v2221_v50 }
0x1e73   :  { %v2227_v0 = vsel %vm73_vm0, %v2223_v9, 0.0 }
0x1e74   :  { %2228 = vadd.xlane.f32.xlu0 %v2227_v0  ;;  %v2331_v0 = vrot.slane %v4601_v34, %v4143_v20 }
0x1e8a   :  { %2323 = vrot.lane.b32.xlu0 %v2321_v7, %s3749_s30 }
0x1efd   :  { %v2226_v10 = vpop.xlane.xlu0 %2225 }
0x1efe   :  { %v2230_v8 = vmul.f32 0.03125, %v2226_v10 }
0x1f00   :  { %v2232_v11 = vadd.f32 1e-12, %v2230_v8 }
0x1f01   :  { %v2229_v48 = vpop.xlane.xlu0 %2228 }
0x1f02   :  { %3692 = vrsqrt.f32 %v2232_v11  ;;  %v2231_v62 = vmul.f32 0.03125, %v2229_v48 }
0x1f04   :  { %v2233_v37 = vadd.f32 1e-12, %v2231_v62 }
0x1f05   :  { %v2324_v33 = vpop.permute.xlu0 %2323 }
0x1f06   :  { %3694 = vrsqrt.f32 %v2233_v37 }
0x1f0c   :  { %v3693_v12 = vpop.eup %3692 }
0x1f0d   :  { %v2236_v13 = vmul.f32 %v3693_v12, %v2220_v58 }
0x1f0f   :  { %v2242_v25 = vmul.f32 %v2241_v22, %v2236_v13 }
0x1f10   :  { %v3695_v19 = vpop.eup %3694 }
0x1f11   :  { %v2237_v30 = vmul.f32 %v3695_v19, %v2221_v50  ;;  %v2248_v4 = vadd.f32 %v2247_v56, %v2242_v25 }
0x1f13   :  { %v2243_v41 = vmul.f32 %v2241_v22, %v2237_v30 }
0x1f15   :  { %v2249_v57 = vadd.f32 %v2247_v56, %v2243_v41 }
0x1f17   :  { %v2250_v3 = vpack.c.bf16 %v2249_v57, %v2248_v4 }
0x1f19   :  { %3495 = vmatmul.mubr.msk.bf16.vlgmr.msra.gmra.mrb[56].mxu1 %vm73_vm0, %v2250_v3 }
0x1f1a   :  { %3502 = vmatprep.mubr.msk.bf16.mxu1 %vm3748_vm1, %v3747_v23 }
0x1fec   :  { %v4695_v45 = vpop.f32.mrb[56].mxu1 }
0x1fed   :  { %v2326_v39 = vadd.f32 %v2324_v33, %v4695_v45  ;;  %v3496_v15 = vpop.f32.mrb[57].mxu1  ;;  %v4701_v5 = vadd.f32 %v2315_v35, %v4695_v45 }
0x1fee   :  { %v4698_v43 = vpop.f32.mrb[58].mxu1 }
0x1fef   :  { %v4704_v44 = vadd.f32 %v2315_v35, %v4698_v43  ;;  %v2327_v1 = vadd.f32 %v2324_v33, %v4698_v43  ;;  %2340 = vrot.lane.b32.xlu1 %v2326_v39, %s3750_s11  ;;  %v3497_v53 = vpop.f32.mrb[59].mxu1 }
0x1ff1   :  { %v2436_v58 = vpack.c.bf16 %v4704_v44, %v4701_v5  ;;  %2342 = vrot.lane.b32.xlu0 %v2327_v1, %s3750_s11 }
0x2061   :  { %v2341_v28 = vpop.permute.xlu1 %2340 }
0x2062   :  { %2346 = vxpose.xlu1.b32.start [1/2] (short) (narrow) %v2341_v28, 32 }
0x2063   :  { %v2343_v31 = vpop.permute.xlu0 %2342 }
0x2066   :  { %2347 = vxpose.xlu1.b32.end [2/2] (short) (narrow) %v2343_v31, 32 }
0x20e2   :  { %v2362_v59 = vpop.trf.xlu1 }
0x20e3   :  { %2382 = vrot.lane.b32.xlu0 %v2362_v59, %s3752_s13 }
0x20e6   :  { %v2363_v50 = vpop.trf.xlu1 }
0x20e7   :  { %2394 = vrot.lane.b32.xlu0 %v2362_v59, %s3749_s30 }
0x20ea   :  { %v2364_v38 = vpop.trf.xlu1 }
0x20eb   :  { %2406 = vrot.lane.b32.xlu0 %v2362_v59, %s3753_s14 }
0x20ee   :  { %v2365_v9 = vpop.trf.xlu1 }
0x20ef   :  { %2384 = vrot.lane.b32.xlu0 %v2363_v50, %s3752_s13  ;;  %2412 = vrot.lane.b32.xlu1 %v2365_v9, %s3753_s14 }
0x20f3   :  { %2396 = vrot.lane.b32.xlu0 %v2363_v50, %s3749_s30 }
0x20f7   :  { %2408 = vrot.lane.b32.xlu0 %v2363_v50, %s3753_s14 }
0x20fb   :  { %2386 = vrot.lane.b32.xlu0 %v2364_v38, %s3752_s13 }
0x20ff   :  { %2398 = vrot.lane.b32.xlu0 %v2364_v38, %s3749_s30 }
0x2103   :  { %2388 = vrot.lane.b32.xlu0 %v2365_v9, %s3752_s13 }
0x2107   :  { %2400 = vrot.lane.b32.xlu0 %v2365_v9, %s3749_s30 }
0x210b   :  { %2410 = vrot.lane.b32.xlu0 %v2364_v38, %s3753_s14 }
0x210f   :  { %2333 = vrot.lane.b32.xlu0 %v2331_v0, %s3751_s12 }
0x2155   :  { %v2383_v6 = vpop.permute.xlu0 %2382 }
0x2156   :  { %v2418_v11 = vsel %vm280_vm2, %v2362_v59, %v2383_v6 }
0x2159   :  { %v2395_v51 = vpop.permute.xlu0 %2394 }
0x215a   :  { %v2422_v48 = vsel %vm73_vm0, %v2418_v11, %v2395_v51 }
0x215d   :  { %v2407_v7 = vpop.permute.xlu0 %2406 }
0x215e   :  { %v2426_v62 = vsel %vm289_vm3, %v2422_v48, %v2407_v7 }
0x215f   :  { %v2430_v34 = vmul.f32 %v4490_v29, %v2426_v62 }
0x2161   :  { %v2385_v10 = vpop.permute.xlu0 %2384  ;;  %v2413_v3 = vpop.permute.xlu1 %2412 }
0x2162   :  { %v2419_v37 = vsel %vm280_vm2, %v2363_v50, %v2385_v10 }
0x2165   :  { %v2397_v8 = vpop.permute.xlu0 %2396 }
0x2166   :  { %v2423_v12 = vsel %vm73_vm0, %v2419_v37, %v2397_v8 }
0x2169   :  { %v2409_v22 = vpop.permute.xlu0 %2408 }
0x216a   :  { %v2427_v20 = vsel %vm289_vm3, %v2423_v12, %v2409_v22 }
0x216b   :  { %v2431_v13 = vmul.f32 %v4496_v18, %v2427_v20 }
0x216d   :  { %v2434_v19 = vpack.c.bf16 %v2431_v13, %v2430_v34  ;;  %v2387_v25 = vpop.permute.xlu0 %2386  ;;  %v3620_v34 = vld [vmem:[%s4886_s5 + $0x30] sm:$0xff]   ;;  %v3621_v13 = vld [vmem:[%s4886_s5 + $0x38] sm:$0xff]  }
0x216e   :  { %v2420_v33 = vsel %vm280_vm2, %v2364_v38, %v2387_v25 }
0x216f   :  { %3499 = vmatpush3.bf16.msra.mxu1 %v2434_v19 }
0x2170   :  { %3500 = vmatprep.subr.bf16.mxu1 %v3747_v23 }
0x2171   :  { %v2399_v30 = vpop.permute.xlu0 %2398 }
0x2172   :  { %v2424_v29 = vsel %vm73_vm0, %v2420_v33, %v2399_v30 }
0x2175   :  { %v2389_v56 = vpop.permute.xlu0 %2388 }
0x2176   :  { %v2421_v41 = vsel %vm280_vm2, %v2365_v9, %v2389_v56 }
0x2179   :  { %v2401_v4 = vpop.permute.xlu0 %2400 }
0x217a   :  { %v2425_v57 = vsel %vm73_vm0, %v2421_v41, %v2401_v4 }
0x217b   :  { %v2429_v35 = vsel %vm289_vm3, %v2425_v57, %v2413_v3 }
0x217c   :  { %v2433_v15 = vmul.f32 %v4515_v42, %v2429_v35 }
0x217d   :  { %v2411_v18 = vpop.permute.xlu0 %2410 }
0x217e   :  { %v2428_v39 = vsel %vm289_vm3, %v2424_v29, %v2411_v18 }
0x217f   :  { %v2432_v1 = vmul.f32 %v4509_v47, %v2428_v39 }
0x2181   :  { %v2435_v53 = vpack.c.bf16 %v2433_v15, %v2432_v1  ;;  %v2334_v28 = vpop.permute.xlu0 %2333  ;;  %v4792_v15 = vld [vmem:[%s4890_s9 + $0x20] sm:$0x3f] }
0x2182   :  { %v2336_v31 = vadd.f32 %v2334_v28, %v4695_v45  ;;  %v2337_v59 = vadd.f32 %v2334_v28, %v4698_v43  ;;  %v2620_v1 = vrot.slane %v4792_v15, %v3870_v36 }
0x2183   :  { %3501 = vmatpush3.bf16.msra.mxu1 %v2435_v53 }
0x2184   :  { %v2494_v50 = vmul.f32 %v2336_v31, %v4014_v61  ;;  %v2495_v38 = vmul.f32 %v2337_v59, %v4019_v2  ;;  %v2498_v9 = vmul.f32 %v2336_v31, %v4036_v60  ;;  %v2499_v0 = vmul.f32 %v2337_v59, %v4039_v17  ;;  %3506 = vmatprep.subr.bf16.mxu1 %v3747_v23 }
0x2185   :  { %v2500_v42 = vmul.f32 %v2336_v31, %v4043_v21  ;;  %v2501_v47 = vmul.f32 %v2337_v59, %v4045_v24  ;;  %v2496_v6 = vmul.f32 %v2336_v31, %v4029_v52  ;;  %v2497_v45 = vmul.f32 %v2337_v59, %v4032_v55 }
0x2186   :  { %3503 = vmatmul.mubr.msk.bf16.vlgmr.msra.gmra.mrb[60].mxu1 %vm73_vm0, %v2436_v58  ;;  %v2502_v61 = vpack.c.bf16 %v2495_v38, %v2494_v50  ;;  %v2504_v2 = vpack.c.bf16 %v2499_v0, %v2498_v9 }
0x2187   :  { %v2505_v60 = vpack.c.bf16 %v2501_v47, %v2500_v42  ;;  %v2503_v43 = vpack.c.bf16 %v2497_v45, %v2496_v6  ;;  %3514 = vmatprep.mubr.msk.bf16.mxu1 %vm3748_vm1, %v3747_v23 }
0x2188   :  { %2510 = vrot.lane.b32.xlu1 %v2502_v61, %s3751_s12 }
0x218c   :  { %2514 = vrot.lane.b32.xlu1 %v2504_v2, %s3751_s12 }
0x2190   :  { %2516 = vrot.lane.b32.xlu1 %v2505_v60, %s3751_s12 }
0x21fa   :  { %v2511_v52 = vpop.permute.xlu1 %2510 }
0x21fb   :  { %3507 = vmatpush3.bf16.msra.mxu1 %v2511_v52 }
0x21fc   :  { %3508 = vmatprep.subr.bf16.mxu1 %v3747_v23 }
0x2259   :  { %v2474_v55 = vpop.f32.mrb[60].mxu1 }
0x225a   :  { %v2475_v17 = vadd.f32 %v4538_v54, %v2474_v55  ;;  %v3504_v21 = vpop.f32.mrb[61].mxu1  ;;  %v3622_v55 = vld [vmem:[%s4887_s6 + $0x30] sm:$0xff]  }
0x225b   :  { %v2477_v24 = vpop.f32.mrb[62].mxu1 }
0x225c   :  { %v2478_v5 = vadd.f32 %v4544_v26, %v2477_v24  ;;  %v3505_v44 = vpop.f32.mrb[63].mxu1  ;;  %v2481_v58 = vsel %vm345_vm4, %v2475_v17, -inf  ;;  %v2515_v26 = vpop.permute.xlu1 %2514 }
0x225d   :  { %2482 = vmax.xlane.f32.xlu0 %v2481_v58 }
0x225e   :  { %v2484_v51 = vsel %vm345_vm4, %v2478_v5, -inf }
0x2260   :  { %v2517_v37 = vpop.permute.xlu1 %2516 }
0x2261   :  { %2485 = vmax.xlane.f32.xlu0 %v2484_v51 }
0x2277   :  { %2512 = vrot.lane.b32.xlu0 %v2503_v43, %s3751_s12 }
0x22ea   :  { %v2483_v7 = vpop.xlane.xlu0 %2482 }
0x22eb   :  { %v2487_v10 = vsub.f32 %v2475_v17, %v2483_v7  ;;  %v3623_v17 = vld [vmem:[%s4887_s6 + $0x38] sm:$0xff]  }
0x22ed   :  { %v2489_v8 = vmul.f32 1.442695, %v2487_v10  ;;  %v2708_v10 = vrot.slane %v4792_v15, %v3875_v40  ;;  %v3625_v40 = vld [vmem:[%s4888_s7 + $0xc8] sm:$0xff]  }
0x22ee   :  { %v2486_v11 = vpop.xlane.xlu0 %2485 }
0x22ef   :  { %v2488_v48 = vsub.f32 %v2478_v5, %v2486_v11  ;;  %3696 = vpow2.f32 %v2489_v8 }
0x22f1   :  { %v2491_v62 = vmul.f32 1.442695, %v2488_v48 }
0x22f2   :  { %v2513_v54 = vpop.permute.xlu0 %2512 }
0x22f3   :  { %3698 = vpow2.f32 %v2491_v62  ;;  %3509 = vmatpush3.bf16.msra.mxu1 %v2513_v54  ;;  %v2714_v54 = vrot.slane %v4792_v15, %v3883_v49  ;;  %v3626_v49 = vld [vmem:[%s4888_s7 + $0xd0] sm:$0xff]  }
0x22f4   :  { %3510 = vmatprep.subr.bf16.mxu1 %v3747_v23 }
0x22f7   :  { %3511 = vmatpush3.bf16.msra.mxu1 %v2515_v26 }
0x22f8   :  { %3512 = vmatprep.subr.bf16.mxu1 %v3747_v23 }
0x22f9   :  { %v3697_v12 = vpop.eup %3696 }
0x22fb   :  { %3513 = vmatpush3.bf16.msra.mxu1 %v2517_v37 }
0x22fc   :  { %3530 = vmatprep.subr.bf16.mxu1 %v3747_v23 }
0x22fd   :  { %v3699_v22 = vpop.eup %3698 }
0x22fe   :  { %v2493_v20 = vpack.c.bf16 %v3699_v22, %v3697_v12 }
0x2300   :  { %3515 = vmatmul.mubr.msk.bf16.vlgmr.msra.gmra.mrb[64].mxu1 %vm345_vm4, %v2493_v20  ;;  %3527 = vmatmul.mubr.msk.bf16.vlgmr.msra.gmra.mrb[28].mxu0 %vm345_vm4, %v2493_v20  ;;  %v3624_v20 = vld [vmem:[%s4888_s7 + $0xc0] sm:$0xff]  }
0x2301   :  { %3534 = vmatprep.mubr.msk.bf16.mxu1 %vm3748_vm1, %v3747_v23  ;;  %3562 = vmatprep.mubr.msk.bf16.mxu0 %vm3748_vm1, %v3747_v23 }
0x2302   :  { %3531 = vmatpush3.bf16.msra.mxu1 %v3620_v34  ;;  %3547 = vmatpush3.bf16.msra.mxu0 %v3624_v20  ;;  %v3627_v34 = vld [vmem:[%s4888_s7 + $0xd8] sm:$0xff]   ;;  %v2943_v20 = vrot.slane %v4792_v15, %v3904_v63 }
0x2303   :  { %3532 = vmatprep.subr.bf16.mxu1 %v3747_v23  ;;  %3548 = vmatprep.subr.bf16.mxu0 %v3747_v23 }
0x2306   :  { %3533 = vmatpush3.bf16.msra.mxu1 %v3621_v13  ;;  %3549 = vmatpush3.bf16.msra.mxu0 %v3625_v40  ;;  %v3628_v13 = vld [vmem:[%s4888_s7 + $0xe0] sm:$0xff]  }
0x2307   :  { %3538 = vmatprep.subr.bf16.mxu1 %v3747_v23  ;;  %3550 = vmatprep.subr.bf16.mxu0 %v3747_v23 }
0x230a   :  { %3551 = vmatpush3.bf16.msra.mxu0 %v3626_v49 }
0x230b   :  { %3552 = vmatprep.subr.bf16.mxu0 %v3747_v23 }
0x230e   :  { %3553 = vmatpush3.bf16.msra.mxu0 %v3627_v34  ;;  %v2949_v34 = vrot.slane %v4792_v15, %v4111_v32 }
0x230f   :  { %3554 = vmatprep.subr.bf16.mxu0 %v3747_v23 }
0x2312   :  { %3555 = vmatpush3.bf16.msra.mxu0 %v3628_v13 }
0x2313   :  { %3556 = vmatprep.subr.bf16.mxu0 %v3747_v23 }
0x23d3   :  { %v2559_v19 = vpop.f32.mrb[64].mxu1  ;;  %v2600_v25 = vpop.f32.mrb[28].mxu0 }
0x23d4   :  { %3700 = vrcp.f32 %v2600_v25  ;;  %v3516_v30 = vpop.f32.mrb[65].mxu1  ;;  %v3528_v56 = vpop.f32.mrb[29].mxu0  ;;  %v3630_v25 = vld [vmem:[%s4888_s7 + $0xf0] sm:$0xff]  }
0x23d5   :  { %v2562_v41 = vpop.f32.mrb[66].mxu1  ;;  %v2603_v4 = vpop.f32.mrb[30].mxu0  ;;  %v3631_v30 = vld [vmem:[%s4888_s7 + $0xf8] sm:$0xff]   ;;  %v2726_v56 = vrot.slane %v4645_v46, %v3859_v27 }
0x23d6   :  { %3702 = vrcp.f32 %v2603_v4  ;;  %v3517_v57 = vpop.f32.mrb[67].mxu1  ;;  %v3529_v3 = vpop.f32.mrb[31].mxu0 }
0x23de   :  { %v3701_v33 = vpop.eup %3700 }
0x23df   :  { %v2609_v35 = vmul.f32 %v3701_v33, %v2559_v19  ;;  %v3629_v19 = vld [vmem:[%s4888_s7 + $0xe8] sm:$0xff]   ;;  %s3754_s7 = smov [#allocation2]  }
0x23e0   :  { %v3703_v29 = vpop.eup %3702  ;;  %3557 = vmatpush3.bf16.msra.mxu0 %v3629_v19  ;;  %s2959_s22 = sshll.u32 %s3754_s7, 4  ;;  %s2960_s22 = int_to_ptr.vmem [resolvable:$true] %s2959_s22 }
0x23e1   :  { %v2610_v18 = vmul.f32 %v3703_v29, %v2562_v41  ;;  %3558 = vmatprep.subr.bf16.mxu0 %v3747_v23  ;;  %s3723_s23 = scalar_lea.vmem %s2960_s22, 256  ;;  %p3728_p1 = scmp.lt.s32.totalorder %s2960_s22, %s2960_s22 }
0x23e2   :  { %p3724_p0 = scmp.ne.s32.totalorder %s2960_s22, %s3723_s23  ;;  %p3729_p2 = scmp.lt.s32.totalorder %s3723_s23, %s3723_s23 }
0x23e3   :  { %v2611_v39 = vpack.c.bf16 %v2610_v18, %v2609_v35 }
0x23e4   :  { %3559 = vmatpush3.bf16.msra.mxu0 %v3630_v25  ;;  %p3730_p3 = por %p3729_p2, %p3728_p1 }
0x23e5   :  { %3535 = vmatmul.mubr.msk.bf16.vlgmr.msra.gmra.mrb[68].mxu1 %vm73_vm0, %v2611_v39  ;;  %3560 = vmatprep.subr.bf16.mxu0 %v3747_v23 }
0x23e6   :  { %3542 = vmatprep.mubr.msk.bf16.mxu1 %vm3748_vm1, %v3747_v23  ;;  %3539 = vmatpush3.bf16.msra.mxu1 %v3622_v55  ;;  %p3731_p4 = pnand %p3730_p3, %p3724_p0 }
0x23e7   :  { %3540 = vmatprep.subr.bf16.mxu1 %v3747_v23 }
0x23e8   :  { %3561 = vmatpush3.bf16.msra.mxu0 %v3631_v30 }
0x23ea   :  { %3541 = vmatpush3.bf16.msra.mxu1 %v3623_v17 }
0x24b8   :  { %v2670_v53 = vpop.f32.mrb[68].mxu1 }
0x24b9   :  { %v2671_v28 = vadd.f32 %v2670_v53, %v2620_v1  ;;  %v3536_v31 = vpop.f32.mrb[69].mxu1 }
0x24ba   :  { %v2673_v59 = vpop.f32.mrb[70].mxu1 }
0x24bb   :  { %v4797_v50 = vadd.f32 %v2671_v28, %v4662_v14  ;;  %v2674_v38 = vadd.f32 %v2673_v59, %v2620_v1  ;;  %v3537_v9 = vpop.f32.mrb[71].mxu1 }
0x24bd   :  { %v4800_v0 = vadd.f32 %v2674_v38, %v4665_v16  ;;  %v2679_v42 = vsel %vm73_vm0, %v4797_v50, 0.0 }
0x24be   :  { %2680 = vadd.xlane.f32.xlu1 %v2679_v42 }
0x24bf   :  { %v2682_v47 = vsel %vm73_vm0, %v4800_v0, 0.0 }
0x24c0   :  { %2683 = vadd.xlane.f32.xlu0 %v2682_v47 }
0x254b   :  { %v2681_v36 = vpop.xlane.xlu1 %2680 }
0x254c   :  { %v2685_v6 = vmul.f32 0.03125, %v2681_v36 }
0x254d   :  { %v2684_v45 = vpop.xlane.xlu0 %2683 }
0x254e   :  { %v2687_v61 = vsub.f32 %v4797_v50, %v2685_v6  ;;  %v2686_v14 = vmul.f32 0.03125, %v2684_v45 }
0x2550   :  { %v2688_v2 = vsub.f32 %v4800_v0, %v2686_v14  ;;  %v2689_v60 = vmul.f32 %v2687_v61, %v2687_v61 }
0x2552   :  { %v2691_v16 = vsel %vm73_vm0, %v2689_v60, 0.0  ;;  %v2690_v43 = vmul.f32 %v2688_v2, %v2688_v2 }
0x2553   :  { %2692 = vadd.xlane.f32.xlu1 %v2691_v16 }
0x2554   :  { %v2694_v52 = vsel %vm73_vm0, %v2690_v43, 0.0 }
0x2557   :  { %2695 = vadd.xlane.f32.xlu1 %v2694_v52 }
0x25e0   :  { %v2693_v21 = vpop.xlane.xlu1 %2692 }
0x25e1   :  { %v2697_v24 = vmul.f32 0.03125, %v2693_v21 }
0x25e3   :  { %v2699_v5 = vadd.f32 1e-12, %v2697_v24 }
0x25e4   :  { %v2696_v44 = vpop.xlane.xlu1 %2695 }
0x25e5   :  { %3704 = vrsqrt.f32 %v2699_v5  ;;  %v2698_v58 = vmul.f32 0.03125, %v2696_v44 }
0x25e7   :  { %v2700_v51 = vadd.f32 1e-12, %v2698_v58 }
0x25e9   :  { %3706 = vrsqrt.f32 %v2700_v51 }
0x25ef   :  { %v3705_v7 = vpop.eup %3704 }
0x25f0   :  { %v2703_v8 = vmul.f32 %v3705_v7, %v2687_v61 }
0x25f2   :  { %v2709_v48 = vmul.f32 %v2708_v10, %v2703_v8 }
0x25f3   :  { %v3707_v11 = vpop.eup %3706 }
0x25f4   :  { %v2704_v62 = vmul.f32 %v3707_v11, %v2688_v2  ;;  %v2715_v37 = vadd.f32 %v2714_v54, %v2709_v48  ;;  %v2822_v2 = vrot.slane %v4792_v15, %v3859_v27 }
0x25f6   :  { %v2710_v26 = vmul.f32 %v2708_v10, %v2704_v62 }
0x25f8   :  { %v2716_v12 = vadd.f32 %v2714_v54, %v2710_v26 }
0x25fa   :  { %v2717_v22 = vpack.c.bf16 %v2716_v12, %v2715_v37 }
0x25fc   :  { %3543 = vmatmul.mubr.msk.bf16.vlgmr.msra.gmra.mrb[72].mxu1 %vm73_vm0, %v2717_v22 }
0x26cf   :  { %v2776_v41 = vpop.f32.mrb[72].mxu1 }
0x26d0   :  { %v2777_v4 = vadd.f32 %v2776_v41, %v2726_v56  ;;  %v3544_v57 = vpop.f32.mrb[73].mxu1 }
0x26d1   :  { %v2779_v3 = vpop.f32.mrb[74].mxu1 }
0x26d2   :  { %v2785_v33 = vmul.f32 %v2777_v4, %v2777_v4  ;;  %v2780_v35 = vadd.f32 %v2779_v3, %v2726_v56  ;;  %v3545_v29 = vpop.f32.mrb[75].mxu1  ;;  %v2783_v47 = vmul.f32 0.5, %v2777_v4 }
0x26d4   :  { %v2787_v18 = vmul.f32 %v2785_v33, %v2777_v4  ;;  %v2786_v39 = vmul.f32 %v2780_v35, %v2780_v35  ;;  %v2784_v36 = vmul.f32 0.5, %v2780_v35 }
0x26d6   :  { %v2789_v1 = vmul.f32 0.044715, %v2787_v18  ;;  %v2788_v53 = vmul.f32 %v2786_v39, %v2780_v35 }
0x26d8   :  { %v2791_v28 = vadd.f32 %v2789_v1, %v2777_v4  ;;  %v2790_v31 = vmul.f32 0.044715, %v2788_v53 }
0x26da   :  { %v2793_v59 = vmul.f32 0.7978846, %v2791_v28  ;;  %v2792_v38 = vadd.f32 %v2790_v31, %v2780_v35 }
0x26dc   :  { %3708 = vtanh.f32 %v2793_v59  ;;  %v2794_v23 = vmul.f32 0.7978846, %v2792_v38 }
0x26de   :  { %3710 = vtanh.f32 %v2794_v23 }
0x26e6   :  { %v3709_v9 = vpop.eup %3708 }
0x26e7   :  { %v2797_v46 = vadd.f32 1.0, %v3709_v9 }
0x26e8   :  { %v3711_v42 = vpop.eup %3710 }
0x26e9   :  { %v2798_v6 = vadd.f32 1.0, %v3711_v42  ;;  %v2799_v45 = vmul.f32 %v2797_v46, %v2783_v47 }
0x26eb   :  { %v2800_v61 = vmul.f32 %v2798_v6, %v2784_v36 }
0x26ed   :  { %v2801_v14 = vpack.c.bf16 %v2800_v61, %v2799_v45 }
0x26ef   :  { %3563 = vmatmul.mubr.bf16.vlgmr.msra.gmra.mrb[32].mxu0 %v2801_v14 }
0x27c2   :  { %v2905_v60 = vpop.f32.mrb[32].mxu0 }
0x27c3   :  { %v2906_v16 = vadd.f32 %v2905_v60, %v2822_v2  ;;  %v3564_v43 = vpop.f32.mrb[33].mxu0 }
0x27c4   :  { %v2908_v52 = vpop.f32.mrb[34].mxu0 }
0x27c5   :  { %v2912_v55 = vadd.f32 %v2906_v16, %v4797_v50  ;;  %v2909_v17 = vadd.f32 %v2908_v52, %v2822_v2  ;;  %v3565_v21 = vpop.f32.mrb[35].mxu0 }
0x27c7   :  { %v2913_v24 = vadd.f32 %v2909_v17, %v4800_v0  ;;  %v2914_v5 = vsel %vm73_vm0, %v2912_v55, 0.0 }
0x27c8   :  { %2915 = vadd.xlane.f32.xlu0 %v2914_v5 }
0x27c9   :  { %v2917_v44 = vsel %vm73_vm0, %v2913_v24, 0.0 }
0x27ca   :  { %2918 = vadd.xlane.f32.xlu1 %v2917_v44 }
0x2855   :  { %v2916_v58 = vpop.xlane.xlu0 %2915 }
0x2856   :  { %v2920_v51 = vmul.f32 0.03125, %v2916_v58 }
0x2857   :  { %v2919_v7 = vpop.xlane.xlu1 %2918 }
0x2858   :  { %v2922_v27 = vsub.f32 %v2912_v55, %v2920_v51  ;;  %v2921_v10 = vmul.f32 0.03125, %v2919_v7 }
0x285a   :  { %v2923_v8 = vsub.f32 %v2913_v24, %v2921_v10  ;;  %v2924_v11 = vmul.f32 %v2922_v27, %v2922_v27 }
0x285c   :  { %v2926_v48 = vsel %vm73_vm0, %v2924_v11, 0.0  ;;  %v2925_v50 = vmul.f32 %v2923_v8, %v2923_v8 }
0x285d   :  { %2927 = vadd.xlane.f32.xlu0 %v2926_v48 }
0x285e   :  { %v2929_v62 = vsel %vm73_vm0, %v2925_v50, 0.0 }
0x285f   :  { %2930 = vadd.xlane.f32.xlu1 %v2929_v62 }
0x28ea   :  { %v2928_v0 = vpop.xlane.xlu0 %2927 }
0x28eb   :  { %v2932_v54 = vmul.f32 0.03125, %v2928_v0 }
0x28ec   :  { %v2931_v26 = vpop.xlane.xlu1 %2930 }
0x28ed   :  { %v2934_v37 = vadd.f32 1e-12, %v2932_v54  ;;  %v2933_v12 = vmul.f32 0.03125, %v2931_v26 }
0x28ef   :  { %3712 = vrsqrt.f32 %v2934_v37  ;;  %v2935_v22 = vadd.f32 1e-12, %v2933_v12 }
0x28f1   :  { %3714 = vrsqrt.f32 %v2935_v22 }
0x28f9   :  { %v3713_v40 = vpop.eup %3712 }
0x28fa   :  { %v2938_v49 = vmul.f32 %v3713_v40, %v2922_v27 }
0x28fb   :  { %v3715_v13 = vpop.eup %3714 }
0x28fc   :  { %v2939_v19 = vmul.f32 %v3715_v13, %v2923_v8  ;;  %v2944_v25 = vmul.f32 %v2943_v20, %v2938_v49 }
0x28fe   :  { %v2945_v30 = vmul.f32 %v2943_v20, %v2939_v19  ;;  %v2950_v56 = vadd.f32 %v2949_v34, %v2944_v25 }
0x2900   :  { %v2951_v41 = vadd.f32 %v2949_v34, %v2945_v30  ;;  %2952 = vst.msk [vmem:[#allocation2] sm:$0xff] %vm73_vm0, %v2950_v56 }
0x2902   :  { %2953 = vst.msk [vmem:[#allocation2 + $0x8] sm:$0xff] %vm73_vm0, %v2951_v41 }
0x2903   :  { %3734 = shalt.err (!%p3731_p4)
}
0x2904   :  { %s3735_s30 = scalar_lea.hbm %s4891_s10, 256 }
0x2905   :  { %p3736_p5 = scmp.ne.s32.totalorder %s4891_s10, %s3735_s30  ;;  %p3739_p6 = scmp.lt.u32.totalorder %s3735_s30, %s4891_s10 }
0x2907   :  { %p3741_p7 = pnand %p3739_p6, %p3736_p5 }
0x2909   :  { %3744 = shalt.err (!%p3741_p7)
}
0x290a   :  { %s3755_s9 = smov 128   ;;  %s3756_s14 = smov 8  }
0x290b   :  { %2965 = dma.vmem_to_hbm [thread:$0]  %s2960_s22, 256, %s4891_s10, [#allocation3], %s3755_s9, %s3755_s9, %s3756_s14  }
0x290c   :  { %3745 = dma.done.wait [#allocation3], 256  }
0x290d   :  { %3746 = vsyncadd [#allocation3], 4294967040 }
0x290e   :  { %2969 = vsyncpa [#allocation3], 1 }

</bundles_post_ra>
